<compile_context>
chip_gen: v6e
topology: v6e:2x2x1
jax: 0.10.0
libtpu: 0.0.40
codegen_flags: <defaults>
</compile_context>

<pallas_src>
import functools

import jax
import jax.numpy as jnp
import numpy as np
from jax import lax
from jax.experimental import pallas as pl
from jax.experimental.pallas import tpu as pltpu


# ----------------------------------------------------------------------------
# Host-side helpers (static geometry -> numpy constants)
# ----------------------------------------------------------------------------
def _reflect_index(i, n):
    """np.pad(mode='reflect') / nn.ReflectionPad2d index map (single reflection)."""
    i = np.where(i < 0, -i, i)
    i = np.where(i >= n, 2 * n - 2 - i, i)
    return i


def _build_shift_matrices(H, W, K, stride):
    """S[t, q, p] = 1 iff flat input index q feeds tap t of flat output index p.

    Folds ReflectionPad2d + im2col into K*K one-hot (H*W, Ho*Wo) matrices so the
    kernel can express the whole conv as plain 2-D matmuls on a lane-dense
    (channels, H*W) layout with no in-kernel relayouts.
    """
    pad = K // 2
    Ho = (H + 2 * pad - K) // stride + 1
    Wo = (W + 2 * pad - K) // stride + 1
    hh, ww = np.meshgrid(np.arange(Ho), np.arange(Wo), indexing="ij")
    S = np.zeros((K * K, H * W, Ho * Wo), np.float32)
    p = np.arange(Ho * Wo)
    for kh in range(K):
        for kw in range(K):
            src_h = _reflect_index(hh * stride + kh - pad, H).reshape(-1)
            src_w = _reflect_index(ww * stride + kw - pad, W).reshape(-1)
            S[kh * K + kw, src_h * W + src_w, p] = 1.0
    return S, Ho, Wo


# ----------------------------------------------------------------------------
# Fused Decoder kernel: conv1 + leaky_relu + conv2 + leaky_relu per batch elem
# ----------------------------------------------------------------------------
def _decoder_kernel(x_ref, w1_ref, b1_ref, w2_ref, b2_ref, s_ref, o_ref, *,
                    K, neg_slope):
    """One batch element, both conv layers fused.

    x_ref : (1, Cin, HW)       w1_ref: (K*K, Cmid, Cin)   b1_ref: (Cmid, 1)
    s_ref : (K*K, HW, HW)      w2_ref: (K*K, Cout, Cmid)  b2_ref: (Cout, 1)
    o_ref : (1, Cout, HW)
    """
    center = (K // 2) * K + (K // 2)  # tap that samples the un-shifted pixel

    def conv_leaky(src, w_ref, b_ref):
        # acc[c, p] = sum_t sum_cin w_ref[t, c, cin] * src[cin, shift_t(p)]
        acc = jnp.dot(w_ref[center], src, preferred_element_type=jnp.float32)
        for t in range(K * K):
            if t == center:
                continue
            tap = jnp.dot(w_ref[t], src, preferred_element_type=jnp.float32)
            acc = acc + jnp.dot(tap, s_ref[t], preferred_element_type=jnp.float32)
        y = acc + b_ref[...]                               # (C, 1) lane-broadcast
        return jnp.where(y > 0, y, neg_slope * y)          # F.leaky_relu (0.01)

    y1 = conv_leaky(x_ref[0].astype(jnp.float32), w1_ref, b1_ref)  # (Cmid, HW)
    y2 = conv_leaky(y1, w2_ref, b2_ref)                            # (Cout, HW)
    o_ref[0] = y2.astype(o_ref.dtype)


def decoder_forward(x_nchw, params, *, kernel_size, stride):
    """Decoder.forward (NCHW in / NCHW out) — both ConvLayers in one Pallas call."""
    N, Cin, H, W = x_nchw.shape
    K = kernel_size
    # Fused kernel assumes geometry-preserving convs so both layers share the
    # same shift matrices (true for odd K, stride 1 — the Decoder's use case).
    # TODO(synk): general stride / even K needs per-layer shift matrices.
    assert stride == 1 and K % 2 == 1

    w1, b1 = params["w1"], params["b1"]   # (Cmid, Cin, K, K), (Cmid,)  (OIHW)
    w2, b2 = params["w2"], params["b2"]   # (Cout, Cmid, K, K), (Cout,)
    Cmid, Cout = w1.shape[0], w2.shape[0]
    HW = H * W

    S_np, Ho, Wo = _build_shift_matrices(H, W, K, stride)
    S = jnp.asarray(S_np)

    # Per-tap weights (K*K, Cdst, Csrc); biases as lane-broadcastable columns.
    kk = K * K
    w1_taps = jnp.transpose(w1, (2, 3, 0, 1)).reshape(kk, Cmid, Cin)
    w2_taps = jnp.transpose(w2, (2, 3, 0, 1)).reshape(kk, Cout, Cmid)
    b1c = b1.reshape(Cmid, 1).astype(jnp.float32)
    b2c = b2.reshape(Cout, 1).astype(jnp.float32)
    x_flat = x_nchw.reshape(N, Cin, HW)   # contiguous view — no transpose/copy

    flops = 2 * N * (kk * Cmid * Cin * HW + (kk - 1) * Cmid * HW * HW
                     + kk * Cout * Cmid * HW + (kk - 1) * Cout * HW * HW)
    bytes_accessed = 4 * (x_flat.size + S.size + w1_taps.size + w2_taps.size
                          + Cmid + Cout + N * Cout * HW)

    kernel = functools.partial(_decoder_kernel, K=K, neg_slope=0.01)

    out_flat = pl.pallas_call(
        kernel,
        out_shape=jax.ShapeDtypeStruct((N, Cout, HW), x_nchw.dtype),
        grid_spec=pltpu.PrefetchScalarGridSpec(
            num_scalar_prefetch=0,
            grid=(N,),
            in_specs=[
                pl.BlockSpec((1, Cin, HW), lambda n: (n, 0, 0)),
                pl.BlockSpec((kk, Cmid, Cin), lambda n: (0, 0, 0)),
                pl.BlockSpec((Cmid, 1), lambda n: (0, 0)),
                pl.BlockSpec((kk, Cout, Cmid), lambda n: (0, 0, 0)),
                pl.BlockSpec((Cout, 1), lambda n: (0, 0)),
                pl.BlockSpec((kk, HW, HW), lambda n: (0, 0, 0)),
            ],
            out_specs=pl.BlockSpec((1, Cout, HW), lambda n: (n, 0, 0)),
        ),
        compiler_params=pltpu.CompilerParams(
            dimension_semantics=("parallel",),
        ),
        cost_estimate=pl.CostEstimate(
            flops=flops, transcendentals=0, bytes_accessed=bytes_accessed),
    )(x_flat, w1_taps, b1c, w2_taps, b2c, S)

    return out_flat.reshape(N, Cout, Ho, Wo)


# ----------------------------------------------------------------------------
# Pure-JAX reference (matches the PyTorch module semantics)
# ----------------------------------------------------------------------------
def _reference_conv_layer(x, w, b, *, stride, neg_slope=0.01):
    pad = w.shape[-1] // 2
    xp = jnp.pad(x, ((0, 0), (0, 0), (pad, pad), (pad, pad)), mode="reflect")
    y = lax.conv_general_dilated(
        xp, w, window_strides=(stride, stride), padding="VALID",
        dimension_numbers=("NCHW", "OIHW", "NCHW"))
    y = y + b.reshape(1, -1, 1, 1)
    return jnp.where(y > 0, y, neg_slope * y)


def _reference_decoder(x, params, *, stride):
    x = _reference_conv_layer(x, params["w1"], params["b1"], stride=stride)
    x = _reference_conv_layer(x, params["w2"], params["b2"], stride=stride)
    return x


if __name__ == "__main__":
    # Decoder(in_channels=4, out_channels=4, kernel_size=3, stride=1)
    N, Cin, H, W = 2, 4, 16, 16
    Cout, K, stride = 4, 3, 1
    Cmid = Cin // 2

    key = jax.random.PRNGKey(0)
    k_x, k_w1, k_b1, k_w2, k_b2 = jax.random.split(key, 5)
    x = jax.random.normal(k_x, (N, Cin, H, W), dtype=jnp.float32)

    # Deterministic parameter init in PyTorch's OIHW layout, roughly kaiming-scaled.
    params = {
        "w1": jax.random.normal(k_w1, (Cmid, Cin, K, K), jnp.float32)
        * (1.0 / np.sqrt(K * K * Cin)),
        "b1": jax.random.normal(k_b1, (Cmid,), jnp.float32) * 0.1,
        "w2": jax.random.normal(k_w2, (Cout, Cmid, K, K), jnp.float32)
        * (1.0 / np.sqrt(K * K * Cmid)),
        "b2": jax.random.normal(k_b2, (Cout,), jnp.float32) * 0.1,
    }

    out = jax.block_until_ready(
        decoder_forward(x, params, kernel_size=K, stride=stride))
    ref = jax.block_until_ready(_reference_decoder(x, params, stride=stride))
    np.testing.assert_allclose(np.asarray(out), np.asarray(ref),
                               rtol=2e-5, atol=2e-5)

    print("KERNEL_OK")
</pallas_src>

<mosaic_0001>
module attributes {stable_mosaic.version = 11 : i64} {
  func.func @_decoder_kernel(%arg0: i32, %arg1: memref<1x4x256xf32, #tpu.memory_space<vmem>>, %arg2: memref<9x2x4xf32, #tpu.memory_space<vmem>>, %arg3: memref<2x1xf32, #tpu.memory_space<vmem>>, %arg4: memref<9x4x2xf32, #tpu.memory_space<vmem>>, %arg5: memref<4x1xf32, #tpu.memory_space<vmem>>, %arg6: memref<9x256x256xf32, #tpu.memory_space<vmem>>, %arg7: memref<1x4x256xf32, #tpu.memory_space<vmem>>) attributes {dimension_semantics = [#tpu.dimension_semantics<parallel>], iteration_bounds = array<i64: 2>, scalar_prefetch = 0 : i64, scratch_operands = 0 : i64, tpu.core_type = #tpu.core_type<tc>, window_params = [{transform_indices = @transform_0, window_bounds = array<i64: 1, 4, 256>}, {pipeline_mode = #tpu.pipeline_mode<synchronous>, transform_indices = @transform_1, window_bounds = array<i64: 9, 2, 4>}, {pipeline_mode = #tpu.pipeline_mode<synchronous>, transform_indices = @transform_2, window_bounds = array<i64: 2, 1>}, {pipeline_mode = #tpu.pipeline_mode<synchronous>, transform_indices = @transform_3, window_bounds = array<i64: 9, 4, 2>}, {pipeline_mode = #tpu.pipeline_mode<synchronous>, transform_indices = @transform_4, window_bounds = array<i64: 4, 1>}, {pipeline_mode = #tpu.pipeline_mode<synchronous>, transform_indices = @transform_5, window_bounds = array<i64: 9, 256, 256>}, {transform_indices = @transform_6, window_bounds = array<i64: 1, 4, 256>}]} {
    %c0 = arith.constant 0 : index
    %c0_0 = arith.constant 0 : index
    %c0_1 = arith.constant 0 : index
    %0 = vector.load %arg1[%c0, %c0_0, %c0_1] : memref<1x4x256xf32, #tpu.memory_space<vmem>>, vector<1x4x256xf32>
    %1 = vector.shape_cast %0 : vector<1x4x256xf32> to vector<4x256xf32>
    %c4 = arith.constant 4 : index
    %c0_2 = arith.constant 0 : index
    %c0_3 = arith.constant 0 : index
    %2 = vector.load %arg2[%c4, %c0_2, %c0_3] : memref<9x2x4xf32, #tpu.memory_space<vmem>>, vector<1x2x4xf32>
    %3 = vector.shape_cast %2 : vector<1x2x4xf32> to vector<2x4xf32>
    %cst = arith.constant dense<0.000000e+00> : vector<2x256xf32>
    %4 = tpu.matmul %3, %1, %cst {dimension_numbers = #tpu.dot_dimension_numbers<[1], [0], [0], [1], [0, 0, 1, 1], [], []>} : vector<2x4xf32>, vector<4x256xf32>, vector<2x256xf32> -> vector<2x256xf32>
    %c0_4 = arith.constant 0 : index
    %c0_5 = arith.constant 0 : index
    %c0_6 = arith.constant 0 : index
    %5 = vector.load %arg2[%c0_4, %c0_5, %c0_6] : memref<9x2x4xf32, #tpu.memory_space<vmem>>, vector<1x2x4xf32>
    %6 = vector.shape_cast %5 : vector<1x2x4xf32> to vector<2x4xf32>
    %cst_7 = arith.constant dense<0.000000e+00> : vector<2x256xf32>
    %7 = tpu.matmul %6, %1, %cst_7 {dimension_numbers = #tpu.dot_dimension_numbers<[1], [0], [0], [1], [0, 0, 1, 1], [], []>} : vector<2x4xf32>, vector<4x256xf32>, vector<2x256xf32> -> vector<2x256xf32>
    %c0_8 = arith.constant 0 : index
    %c0_9 = arith.constant 0 : index
    %c0_10 = arith.constant 0 : index
    %8 = vector.load %arg6[%c0_8, %c0_9, %c0_10] : memref<9x256x256xf32, #tpu.memory_space<vmem>>, vector<1x256x256xf32>
    %9 = vector.shape_cast %8 : vector<1x256x256xf32> to vector<256x256xf32>
    %cst_11 = arith.constant dense<0.000000e+00> : vector<2x256xf32>
    %10 = tpu.matmul %7, %9, %cst_11 {dimension_numbers = #tpu.dot_dimension_numbers<[1], [0], [0], [1], [0, 0, 1, 1], [], []>} : vector<2x256xf32>, vector<256x256xf32>, vector<2x256xf32> -> vector<2x256xf32>
    %11 = arith.addf %4, %10 : vector<2x256xf32>
    %c1 = arith.constant 1 : index
    %c0_12 = arith.constant 0 : index
    %c0_13 = arith.constant 0 : index
    %12 = vector.load %arg2[%c1, %c0_12, %c0_13] : memref<9x2x4xf32, #tpu.memory_space<vmem>>, vector<1x2x4xf32>
    %13 = vector.shape_cast %12 : vector<1x2x4xf32> to vector<2x4xf32>
    %cst_14 = arith.constant dense<0.000000e+00> : vector<2x256xf32>
    %14 = tpu.matmul %13, %1, %cst_14 {dimension_numbers = #tpu.dot_dimension_numbers<[1], [0], [0], [1], [0, 0, 1, 1], [], []>} : vector<2x4xf32>, vector<4x256xf32>, vector<2x256xf32> -> vector<2x256xf32>
    %c1_15 = arith.constant 1 : index
    %c0_16 = arith.constant 0 : index
    %c0_17 = arith.constant 0 : index
    %15 = vector.load %arg6[%c1_15, %c0_16, %c0_17] : memref<9x256x256xf32, #tpu.memory_space<vmem>>, vector<1x256x256xf32>
    %16 = vector.shape_cast %15 : vector<1x256x256xf32> to vector<256x256xf32>
    %cst_18 = arith.constant dense<0.000000e+00> : vector<2x256xf32>
    %17 = tpu.matmul %14, %16, %cst_18 {dimension_numbers = #tpu.dot_dimension_numbers<[1], [0], [0], [1], [0, 0, 1, 1], [], []>} : vector<2x256xf32>, vector<256x256xf32>, vector<2x256xf32> -> vector<2x256xf32>
    %18 = arith.addf %11, %17 : vector<2x256xf32>
    %c2 = arith.constant 2 : index
    %c0_19 = arith.constant 0 : index
    %c0_20 = arith.constant 0 : index
    %19 = vector.load %arg2[%c2, %c0_19, %c0_20] : memref<9x2x4xf32, #tpu.memory_space<vmem>>, vector<1x2x4xf32>
    %20 = vector.shape_cast %19 : vector<1x2x4xf32> to vector<2x4xf32>
    %cst_21 = arith.constant dense<0.000000e+00> : vector<2x256xf32>
    %21 = tpu.matmul %20, %1, %cst_21 {dimension_numbers = #tpu.dot_dimension_numbers<[1], [0], [0], [1], [0, 0, 1, 1], [], []>} : vector<2x4xf32>, vector<4x256xf32>, vector<2x256xf32> -> vector<2x256xf32>
    %c2_22 = arith.constant 2 : index
    %c0_23 = arith.constant 0 : index
    %c0_24 = arith.constant 0 : index
    %22 = vector.load %arg6[%c2_22, %c0_23, %c0_24] : memref<9x256x256xf32, #tpu.memory_space<vmem>>, vector<1x256x256xf32>
    %23 = vector.shape_cast %22 : vector<1x256x256xf32> to vector<256x256xf32>
    %cst_25 = arith.constant dense<0.000000e+00> : vector<2x256xf32>
    %24 = tpu.matmul %21, %23, %cst_25 {dimension_numbers = #tpu.dot_dimension_numbers<[1], [0], [0], [1], [0, 0, 1, 1], [], []>} : vector<2x256xf32>, vector<256x256xf32>, vector<2x256xf32> -> vector<2x256xf32>
    %25 = arith.addf %18, %24 : vector<2x256xf32>
    %c3 = arith.constant 3 : index
    %c0_26 = arith.constant 0 : index
    %c0_27 = arith.constant 0 : index
    %26 = vector.load %arg2[%c3, %c0_26, %c0_27] : memref<9x2x4xf32, #tpu.memory_space<vmem>>, vector<1x2x4xf32>
    %27 = vector.shape_cast %26 : vector<1x2x4xf32> to vector<2x4xf32>
    %cst_28 = arith.constant dense<0.000000e+00> : vector<2x256xf32>
    %28 = tpu.matmul %27, %1, %cst_28 {dimension_numbers = #tpu.dot_dimension_numbers<[1], [0], [0], [1], [0, 0, 1, 1], [], []>} : vector<2x4xf32>, vector<4x256xf32>, vector<2x256xf32> -> vector<2x256xf32>
    %c3_29 = arith.constant 3 : index
    %c0_30 = arith.constant 0 : index
    %c0_31 = arith.constant 0 : index
    %29 = vector.load %arg6[%c3_29, %c0_30, %c0_31] : memref<9x256x256xf32, #tpu.memory_space<vmem>>, vector<1x256x256xf32>
    %30 = vector.shape_cast %29 : vector<1x256x256xf32> to vector<256x256xf32>
    %cst_32 = arith.constant dense<0.000000e+00> : vector<2x256xf32>
    %31 = tpu.matmul %28, %30, %cst_32 {dimension_numbers = #tpu.dot_dimension_numbers<[1], [0], [0], [1], [0, 0, 1, 1], [], []>} : vector<2x256xf32>, vector<256x256xf32>, vector<2x256xf32> -> vector<2x256xf32>
    %32 = arith.addf %25, %31 : vector<2x256xf32>
    %c5 = arith.constant 5 : index
    %c0_33 = arith.constant 0 : index
    %c0_34 = arith.constant 0 : index
    %33 = vector.load %arg2[%c5, %c0_33, %c0_34] : memref<9x2x4xf32, #tpu.memory_space<vmem>>, vector<1x2x4xf32>
    %34 = vector.shape_cast %33 : vector<1x2x4xf32> to vector<2x4xf32>
    %cst_35 = arith.constant dense<0.000000e+00> : vector<2x256xf32>
    %35 = tpu.matmul %34, %1, %cst_35 {dimension_numbers = #tpu.dot_dimension_numbers<[1], [0], [0], [1], [0, 0, 1, 1], [], []>} : vector<2x4xf32>, vector<4x256xf32>, vector<2x256xf32> -> vector<2x256xf32>
    %c5_36 = arith.constant 5 : index
    %c0_37 = arith.constant 0 : index
    %c0_38 = arith.constant 0 : index
    %36 = vector.load %arg6[%c5_36, %c0_37, %c0_38] : memref<9x256x256xf32, #tpu.memory_space<vmem>>, vector<1x256x256xf32>
    %37 = vector.shape_cast %36 : vector<1x256x256xf32> to vector<256x256xf32>
    %cst_39 = arith.constant dense<0.000000e+00> : vector<2x256xf32>
    %38 = tpu.matmul %35, %37, %cst_39 {dimension_numbers = #tpu.dot_dimension_numbers<[1], [0], [0], [1], [0, 0, 1, 1], [], []>} : vector<2x256xf32>, vector<256x256xf32>, vector<2x256xf32> -> vector<2x256xf32>
    %39 = arith.addf %32, %38 : vector<2x256xf32>
    %c6 = arith.constant 6 : index
    %c0_40 = arith.constant 0 : index
    %c0_41 = arith.constant 0 : index
    %40 = vector.load %arg2[%c6, %c0_40, %c0_41] : memref<9x2x4xf32, #tpu.memory_space<vmem>>, vector<1x2x4xf32>
    %41 = vector.shape_cast %40 : vector<1x2x4xf32> to vector<2x4xf32>
    %cst_42 = arith.constant dense<0.000000e+00> : vector<2x256xf32>
    %42 = tpu.matmul %41, %1, %cst_42 {dimension_numbers = #tpu.dot_dimension_numbers<[1], [0], [0], [1], [0, 0, 1, 1], [], []>} : vector<2x4xf32>, vector<4x256xf32>, vector<2x256xf32> -> vector<2x256xf32>
    %c6_43 = arith.constant 6 : index
    %c0_44 = arith.constant 0 : index
    %c0_45 = arith.constant 0 : index
    %43 = vector.load %arg6[%c6_43, %c0_44, %c0_45] : memref<9x256x256xf32, #tpu.memory_space<vmem>>, vector<1x256x256xf32>
    %44 = vector.shape_cast %43 : vector<1x256x256xf32> to vector<256x256xf32>
    %cst_46 = arith.constant dense<0.000000e+00> : vector<2x256xf32>
    %45 = tpu.matmul %42, %44, %cst_46 {dimension_numbers = #tpu.dot_dimension_numbers<[1], [0], [0], [1], [0, 0, 1, 1], [], []>} : vector<2x256xf32>, vector<256x256xf32>, vector<2x256xf32> -> vector<2x256xf32>
    %46 = arith.addf %39, %45 : vector<2x256xf32>
    %c7 = arith.constant 7 : index
    %c0_47 = arith.constant 0 : index
    %c0_48 = arith.constant 0 : index
    %47 = vector.load %arg2[%c7, %c0_47, %c0_48] : memref<9x2x4xf32, #tpu.memory_space<vmem>>, vector<1x2x4xf32>
    %48 = vector.shape_cast %47 : vector<1x2x4xf32> to vector<2x4xf32>
    %cst_49 = arith.constant dense<0.000000e+00> : vector<2x256xf32>
    %49 = tpu.matmul %48, %1, %cst_49 {dimension_numbers = #tpu.dot_dimension_numbers<[1], [0], [0], [1], [0, 0, 1, 1], [], []>} : vector<2x4xf32>, vector<4x256xf32>, vector<2x256xf32> -> vector<2x256xf32>
    %c7_50 = arith.constant 7 : index
    %c0_51 = arith.constant 0 : index
    %c0_52 = arith.constant 0 : index
    %50 = vector.load %arg6[%c7_50, %c0_51, %c0_52] : memref<9x256x256xf32, #tpu.memory_space<vmem>>, vector<1x256x256xf32>
    %51 = vector.shape_cast %50 : vector<1x256x256xf32> to vector<256x256xf32>
    %cst_53 = arith.constant dense<0.000000e+00> : vector<2x256xf32>
    %52 = tpu.matmul %49, %51, %cst_53 {dimension_numbers = #tpu.dot_dimension_numbers<[1], [0], [0], [1], [0, 0, 1, 1], [], []>} : vector<2x256xf32>, vector<256x256xf32>, vector<2x256xf32> -> vector<2x256xf32>
    %53 = arith.addf %46, %52 : vector<2x256xf32>
    %c8 = arith.constant 8 : index
    %c0_54 = arith.constant 0 : index
    %c0_55 = arith.constant 0 : index
    %54 = vector.load %arg2[%c8, %c0_54, %c0_55] : memref<9x2x4xf32, #tpu.memory_space<vmem>>, vector<1x2x4xf32>
    %55 = vector.shape_cast %54 : vector<1x2x4xf32> to vector<2x4xf32>
    %cst_56 = arith.constant dense<0.000000e+00> : vector<2x256xf32>
    %56 = tpu.matmul %55, %1, %cst_56 {dimension_numbers = #tpu.dot_dimension_numbers<[1], [0], [0], [1], [0, 0, 1, 1], [], []>} : vector<2x4xf32>, vector<4x256xf32>, vector<2x256xf32> -> vector<2x256xf32>
    %c8_57 = arith.constant 8 : index
    %c0_58 = arith.constant 0 : index
    %c0_59 = arith.constant 0 : index
    %57 = vector.load %arg6[%c8_57, %c0_58, %c0_59] : memref<9x256x256xf32, #tpu.memory_space<vmem>>, vector<1x256x256xf32>
    %58 = vector.shape_cast %57 : vector<1x256x256xf32> to vector<256x256xf32>
    %cst_60 = arith.constant dense<0.000000e+00> : vector<2x256xf32>
    %59 = tpu.matmul %56, %58, %cst_60 {dimension_numbers = #tpu.dot_dimension_numbers<[1], [0], [0], [1], [0, 0, 1, 1], [], []>} : vector<2x256xf32>, vector<256x256xf32>, vector<2x256xf32> -> vector<2x256xf32>
    %60 = arith.addf %53, %59 : vector<2x256xf32>
    %c0_61 = arith.constant 0 : index
    %c0_62 = arith.constant 0 : index
    %61 = vector.load %arg3[%c0_61, %c0_62] : memref<2x1xf32, #tpu.memory_space<vmem>>, vector<2x1xf32>
    %62 = vector.broadcast %61 : vector<2x1xf32> to vector<2x256xf32>
    %63 = arith.addf %60, %62 : vector<2x256xf32>
    %cst_63 = arith.constant 0.000000e+00 : f32
    %64 = vector.broadcast %cst_63 : f32 to vector<2x256xf32>
    %65 = arith.cmpf ogt, %63, %64 : vector<2x256xf32>
    %cst_64 = arith.constant 0.00999999977 : f32
    %66 = vector.broadcast %cst_64 : f32 to vector<2x256xf32>
    %67 = arith.mulf %66, %63 : vector<2x256xf32>
    %68 = arith.select %65, %63, %67 : vector<2x256xi1>, vector<2x256xf32>
    %c4_65 = arith.constant 4 : index
    %c0_66 = arith.constant 0 : index
    %c0_67 = arith.constant 0 : index
    %69 = vector.load %arg4[%c4_65, %c0_66, %c0_67] : memref<9x4x2xf32, #tpu.memory_space<vmem>>, vector<1x4x2xf32>
    %70 = vector.shape_cast %69 : vector<1x4x2xf32> to vector<4x2xf32>
    %cst_68 = arith.constant dense<0.000000e+00> : vector<4x256xf32>
    %71 = tpu.matmul %70, %68, %cst_68 {dimension_numbers = #tpu.dot_dimension_numbers<[1], [0], [0], [1], [0, 0, 1, 1], [], []>} : vector<4x2xf32>, vector<2x256xf32>, vector<4x256xf32> -> vector<4x256xf32>
    %c0_69 = arith.constant 0 : index
    %c0_70 = arith.constant 0 : index
    %c0_71 = arith.constant 0 : index
    %72 = vector.load %arg4[%c0_69, %c0_70, %c0_71] : memref<9x4x2xf32, #tpu.memory_space<vmem>>, vector<1x4x2xf32>
    %73 = vector.shape_cast %72 : vector<1x4x2xf32> to vector<4x2xf32>
    %cst_72 = arith.constant dense<0.000000e+00> : vector<4x256xf32>
    %74 = tpu.matmul %73, %68, %cst_72 {dimension_numbers = #tpu.dot_dimension_numbers<[1], [0], [0], [1], [0, 0, 1, 1], [], []>} : vector<4x2xf32>, vector<2x256xf32>, vector<4x256xf32> -> vector<4x256xf32>
    %c0_73 = arith.constant 0 : index
    %c0_74 = arith.constant 0 : index
    %c0_75 = arith.constant 0 : index
    %75 = vector.load %arg6[%c0_73, %c0_74, %c0_75] : memref<9x256x256xf32, #tpu.memory_space<vmem>>, vector<1x256x256xf32>
    %76 = vector.shape_cast %75 : vector<1x256x256xf32> to vector<256x256xf32>
    %cst_76 = arith.constant dense<0.000000e+00> : vector<4x256xf32>
    %77 = tpu.matmul %74, %76, %cst_76 {dimension_numbers = #tpu.dot_dimension_numbers<[1], [0], [0], [1], [0, 0, 1, 1], [], []>} : vector<4x256xf32>, vector<256x256xf32>, vector<4x256xf32> -> vector<4x256xf32>
    %78 = arith.addf %71, %77 : vector<4x256xf32>
    %c1_77 = arith.constant 1 : index
    %c0_78 = arith.constant 0 : index
    %c0_79 = arith.constant 0 : index
    %79 = vector.load %arg4[%c1_77, %c0_78, %c0_79] : memref<9x4x2xf32, #tpu.memory_space<vmem>>, vector<1x4x2xf32>
    %80 = vector.shape_cast %79 : vector<1x4x2xf32> to vector<4x2xf32>
    %cst_80 = arith.constant dense<0.000000e+00> : vector<4x256xf32>
    %81 = tpu.matmul %80, %68, %cst_80 {dimension_numbers = #tpu.dot_dimension_numbers<[1], [0], [0], [1], [0, 0, 1, 1], [], []>} : vector<4x2xf32>, vector<2x256xf32>, vector<4x256xf32> -> vector<4x256xf32>
    %c1_81 = arith.constant 1 : index
    %c0_82 = arith.constant 0 : index
    %c0_83 = arith.constant 0 : index
    %82 = vector.load %arg6[%c1_81, %c0_82, %c0_83] : memref<9x256x256xf32, #tpu.memory_space<vmem>>, vector<1x256x256xf32>
    %83 = vector.shape_cast %82 : vector<1x256x256xf32> to vector<256x256xf32>
    %cst_84 = arith.constant dense<0.000000e+00> : vector<4x256xf32>
    %84 = tpu.matmul %81, %83, %cst_84 {dimension_numbers = #tpu.dot_dimension_numbers<[1], [0], [0], [1], [0, 0, 1, 1], [], []>} : vector<4x256xf32>, vector<256x256xf32>, vector<4x256xf32> -> vector<4x256xf32>
    %85 = arith.addf %78, %84 : vector<4x256xf32>
    %c2_85 = arith.constant 2 : index
    %c0_86 = arith.constant 0 : index
    %c0_87 = arith.constant 0 : index
    %86 = vector.load %arg4[%c2_85, %c0_86, %c0_87] : memref<9x4x2xf32, #tpu.memory_space<vmem>>, vector<1x4x2xf32>
    %87 = vector.shape_cast %86 : vector<1x4x2xf32> to vector<4x2xf32>
    %cst_88 = arith.constant dense<0.000000e+00> : vector<4x256xf32>
    %88 = tpu.matmul %87, %68, %cst_88 {dimension_numbers = #tpu.dot_dimension_numbers<[1], [0], [0], [1], [0, 0, 1, 1], [], []>} : vector<4x2xf32>, vector<2x256xf32>, vector<4x256xf32> -> vector<4x256xf32>
    %c2_89 = arith.constant 2 : index
    %c0_90 = arith.constant 0 : index
    %c0_91 = arith.constant 0 : index
    %89 = vector.load %arg6[%c2_89, %c0_90, %c0_91] : memref<9x256x256xf32, #tpu.memory_space<vmem>>, vector<1x256x256xf32>
    %90 = vector.shape_cast %89 : vector<1x256x256xf32> to vector<256x256xf32>
    %cst_92 = arith.constant dense<0.000000e+00> : vector<4x256xf32>
    %91 = tpu.matmul %88, %90, %cst_92 {dimension_numbers = #tpu.dot_dimension_numbers<[1], [0], [0], [1], [0, 0, 1, 1], [], []>} : vector<4x256xf32>, vector<256x256xf32>, vector<4x256xf32> -> vector<4x256xf32>
    %92 = arith.addf %85, %91 : vector<4x256xf32>
    %c3_93 = arith.constant 3 : index
    %c0_94 = arith.constant 0 : index
    %c0_95 = arith.constant 0 : index
    %93 = vector.load %arg4[%c3_93, %c0_94, %c0_95] : memref<9x4x2xf32, #tpu.memory_space<vmem>>, vector<1x4x2xf32>
    %94 = vector.shape_cast %93 : vector<1x4x2xf32> to vector<4x2xf32>
    %cst_96 = arith.constant dense<0.000000e+00> : vector<4x256xf32>
    %95 = tpu.matmul %94, %68, %cst_96 {dimension_numbers = #tpu.dot_dimension_numbers<[1], [0], [0], [1], [0, 0, 1, 1], [], []>} : vector<4x2xf32>, vector<2x256xf32>, vector<4x256xf32> -> vector<4x256xf32>
    %c3_97 = arith.constant 3 : index
    %c0_98 = arith.constant 0 : index
    %c0_99 = arith.constant 0 : index
    %96 = vector.load %arg6[%c3_97, %c0_98, %c0_99] : memref<9x256x256xf32, #tpu.memory_space<vmem>>, vector<1x256x256xf32>
    %97 = vector.shape_cast %96 : vector<1x256x256xf32> to vector<256x256xf32>
    %cst_100 = arith.constant dense<0.000000e+00> : vector<4x256xf32>
    %98 = tpu.matmul %95, %97, %cst_100 {dimension_numbers = #tpu.dot_dimension_numbers<[1], [0], [0], [1], [0, 0, 1, 1], [], []>} : vector<4x256xf32>, vector<256x256xf32>, vector<4x256xf32> -> vector<4x256xf32>
    %99 = arith.addf %92, %98 : vector<4x256xf32>
    %c5_101 = arith.constant 5 : index
    %c0_102 = arith.constant 0 : index
    %c0_103 = arith.constant 0 : index
    %100 = vector.load %arg4[%c5_101, %c0_102, %c0_103] : memref<9x4x2xf32, #tpu.memory_space<vmem>>, vector<1x4x2xf32>
    %101 = vector.shape_cast %100 : vector<1x4x2xf32> to vector<4x2xf32>
    %cst_104 = arith.constant dense<0.000000e+00> : vector<4x256xf32>
    %102 = tpu.matmul %101, %68, %cst_104 {dimension_numbers = #tpu.dot_dimension_numbers<[1], [0], [0], [1], [0, 0, 1, 1], [], []>} : vector<4x2xf32>, vector<2x256xf32>, vector<4x256xf32> -> vector<4x256xf32>
    %c5_105 = arith.constant 5 : index
    %c0_106 = arith.constant 0 : index
    %c0_107 = arith.constant 0 : index
    %103 = vector.load %arg6[%c5_105, %c0_106, %c0_107] : memref<9x256x256xf32, #tpu.memory_space<vmem>>, vector<1x256x256xf32>
    %104 = vector.shape_cast %103 : vector<1x256x256xf32> to vector<256x256xf32>
    %cst_108 = arith.constant dense<0.000000e+00> : vector<4x256xf32>
    %105 = tpu.matmul %102, %104, %cst_108 {dimension_numbers = #tpu.dot_dimension_numbers<[1], [0], [0], [1], [0, 0, 1, 1], [], []>} : vector<4x256xf32>, vector<256x256xf32>, vector<4x256xf32> -> vector<4x256xf32>
    %106 = arith.addf %99, %105 : vector<4x256xf32>
    %c6_109 = arith.constant 6 : index
    %c0_110 = arith.constant 0 : index
    %c0_111 = arith.constant 0 : index
    %107 = vector.load %arg4[%c6_109, %c0_110, %c0_111] : memref<9x4x2xf32, #tpu.memory_space<vmem>>, vector<1x4x2xf32>
    %108 = vector.shape_cast %107 : vector<1x4x2xf32> to vector<4x2xf32>
    %cst_112 = arith.constant dense<0.000000e+00> : vector<4x256xf32>
    %109 = tpu.matmul %108, %68, %cst_112 {dimension_numbers = #tpu.dot_dimension_numbers<[1], [0], [0], [1], [0, 0, 1, 1], [], []>} : vector<4x2xf32>, vector<2x256xf32>, vector<4x256xf32> -> vector<4x256xf32>
    %c6_113 = arith.constant 6 : index
    %c0_114 = arith.constant 0 : index
    %c0_115 = arith.constant 0 : index
    %110 = vector.load %arg6[%c6_113, %c0_114, %c0_115] : memref<9x256x256xf32, #tpu.memory_space<vmem>>, vector<1x256x256xf32>
    %111 = vector.shape_cast %110 : vector<1x256x256xf32> to vector<256x256xf32>
    %cst_116 = arith.constant dense<0.000000e+00> : vector<4x256xf32>
    %112 = tpu.matmul %109, %111, %cst_116 {dimension_numbers = #tpu.dot_dimension_numbers<[1], [0], [0], [1], [0, 0, 1, 1], [], []>} : vector<4x256xf32>, vector<256x256xf32>, vector<4x256xf32> -> vector<4x256xf32>
    %113 = arith.addf %106, %112 : vector<4x256xf32>
    %c7_117 = arith.constant 7 : index
    %c0_118 = arith.constant 0 : index
    %c0_119 = arith.constant 0 : index
    %114 = vector.load %arg4[%c7_117, %c0_118, %c0_119] : memref<9x4x2xf32, #tpu.memory_space<vmem>>, vector<1x4x2xf32>
    %115 = vector.shape_cast %114 : vector<1x4x2xf32> to vector<4x2xf32>
    %cst_120 = arith.constant dense<0.000000e+00> : vector<4x256xf32>
    %116 = tpu.matmul %115, %68, %cst_120 {dimension_numbers = #tpu.dot_dimension_numbers<[1], [0], [0], [1], [0, 0, 1, 1], [], []>} : vector<4x2xf32>, vector<2x256xf32>, vector<4x256xf32> -> vector<4x256xf32>
    %c7_121 = arith.constant 7 : index
    %c0_122 = arith.constant 0 : index
    %c0_123 = arith.constant 0 : index
    %117 = vector.load %arg6[%c7_121, %c0_122, %c0_123] : memref<9x256x256xf32, #tpu.memory_space<vmem>>, vector<1x256x256xf32>
    %118 = vector.shape_cast %117 : vector<1x256x256xf32> to vector<256x256xf32>
    %cst_124 = arith.constant dense<0.000000e+00> : vector<4x256xf32>
    %119 = tpu.matmul %116, %118, %cst_124 {dimension_numbers = #tpu.dot_dimension_numbers<[1], [0], [0], [1], [0, 0, 1, 1], [], []>} : vector<4x256xf32>, vector<256x256xf32>, vector<4x256xf32> -> vector<4x256xf32>
    %120 = arith.addf %113, %119 : vector<4x256xf32>
    %c8_125 = arith.constant 8 : index
    %c0_126 = arith.constant 0 : index
    %c0_127 = arith.constant 0 : index
    %121 = vector.load %arg4[%c8_125, %c0_126, %c0_127] : memref<9x4x2xf32, #tpu.memory_space<vmem>>, vector<1x4x2xf32>
    %122 = vector.shape_cast %121 : vector<1x4x2xf32> to vector<4x2xf32>
    %cst_128 = arith.constant dense<0.000000e+00> : vector<4x256xf32>
    %123 = tpu.matmul %122, %68, %cst_128 {dimension_numbers = #tpu.dot_dimension_numbers<[1], [0], [0], [1], [0, 0, 1, 1], [], []>} : vector<4x2xf32>, vector<2x256xf32>, vector<4x256xf32> -> vector<4x256xf32>
    %c8_129 = arith.constant 8 : index
    %c0_130 = arith.constant 0 : index
    %c0_131 = arith.constant 0 : index
    %124 = vector.load %arg6[%c8_129, %c0_130, %c0_131] : memref<9x256x256xf32, #tpu.memory_space<vmem>>, vector<1x256x256xf32>
    %125 = vector.shape_cast %124 : vector<1x256x256xf32> to vector<256x256xf32>
    %cst_132 = arith.constant dense<0.000000e+00> : vector<4x256xf32>
    %126 = tpu.matmul %123, %125, %cst_132 {dimension_numbers = #tpu.dot_dimension_numbers<[1], [0], [0], [1], [0, 0, 1, 1], [], []>} : vector<4x256xf32>, vector<256x256xf32>, vector<4x256xf32> -> vector<4x256xf32>
    %127 = arith.addf %120, %126 : vector<4x256xf32>
    %c0_133 = arith.constant 0 : index
    %c0_134 = arith.constant 0 : index
    %128 = vector.load %arg5[%c0_133, %c0_134] : memref<4x1xf32, #tpu.memory_space<vmem>>, vector<4x1xf32>
    %129 = vector.broadcast %128 : vector<4x1xf32> to vector<4x256xf32>
    %130 = arith.addf %127, %129 : vector<4x256xf32>
    %cst_135 = arith.constant 0.000000e+00 : f32
    %131 = vector.broadcast %cst_135 : f32 to vector<4x256xf32>
    %132 = arith.cmpf ogt, %130, %131 : vector<4x256xf32>
    %cst_136 = arith.constant 0.00999999977 : f32
    %133 = vector.broadcast %cst_136 : f32 to vector<4x256xf32>
    %134 = arith.mulf %133, %130 : vector<4x256xf32>
    %135 = arith.select %132, %130, %134 : vector<4x256xi1>, vector<4x256xf32>
    %c0_137 = arith.constant 0 : index
    %c0_138 = arith.constant 0 : index
    %c0_139 = arith.constant 0 : index
    %136 = vector.load %arg7[%c0_137, %c0_138, %c0_139] : memref<1x4x256xf32, #tpu.memory_space<vmem>>, vector<1x4x256xf32>
    %137 = vector.shape_cast %136 : vector<1x4x256xf32> to vector<4x256xf32>
    %138 = vector.shape_cast %135 : vector<4x256xf32> to vector<1x4x256xf32>
    tpu.vector_store %arg7[%c0_137, %c0_138, %c0_139], %138 {strides = array<i32>} : memref<1x4x256xf32, #tpu.memory_space<vmem>>, vector<1x4x256xf32>,
    return
  }
  func.func @transform_0(%arg0: i32) -> (i32, i32, i32) {
    %c0_i32 = arith.constant 0 : i32
    %c0_i32_0 = arith.constant 0 : i32
    %c0_i32_1 = arith.constant 0 : i32
    return %arg0, %c0_i32, %c0_i32_0 : i32, i32, i32
  }
  func.func @transform_1(%arg0: i32) -> (i32, i32, i32) {
    %c0_i32 = arith.constant 0 : i32
    %c0_i32_0 = arith.constant 0 : i32
    %c0_i32_1 = arith.constant 0 : i32
    %c0_i32_2 = arith.constant 0 : i32
    return %c0_i32, %c0_i32_0, %c0_i32_1 : i32, i32, i32
  }
  func.func @transform_2(%arg0: i32) -> (i32, i32) {
    %c0_i32 = arith.constant 0 : i32
    %c0_i32_0 = arith.constant 0 : i32
    %c0_i32_1 = arith.constant 0 : i32
    return %c0_i32, %c0_i32_0 : i32, i32
  }
  func.func @transform_3(%arg0: i32) -> (i32, i32, i32) {
    %c0_i32 = arith.constant 0 : i32
    %c0_i32_0 = arith.constant 0 : i32
    %c0_i32_1 = arith.constant 0 : i32
    %c0_i32_2 = arith.constant 0 : i32
    return %c0_i32, %c0_i32_0, %c0_i32_1 : i32, i32, i32
  }
  func.func @transform_4(%arg0: i32) -> (i32, i32) {
    %c0_i32 = arith.constant 0 : i32
    %c0_i32_0 = arith.constant 0 : i32
    %c0_i32_1 = arith.constant 0 : i32
    return %c0_i32, %c0_i32_0 : i32, i32
  }
  func.func @transform_5(%arg0: i32) -> (i32, i32, i32) {
    %c0_i32 = arith.constant 0 : i32
    %c0_i32_0 = arith.constant 0 : i32
    %c0_i32_1 = arith.constant 0 : i32
    %c0_i32_2 = arith.constant 0 : i32
    return %c0_i32, %c0_i32_0, %c0_i32_1 : i32, i32, i32
  }
  func.func @transform_6(%arg0: i32) -> (i32, i32, i32) {
    %c0_i32 = arith.constant 0 : i32
    %c0_i32_0 = arith.constant 0 : i32
    %c0_i32_1 = arith.constant 0 : i32
    return %arg0, %c0_i32, %c0_i32_0 : i32, i32, i32
  }
}

</mosaic_0001>

<bundles_post_ra>
// kernel: tpu_custom_call.1
= control target key start
LH: loop header
LB: loop body
LE: loop exit
PB: predicated region body
PF: predicated region fallthrough
CT: control target
= control target key end

     0   :  { %s4679_s0 = inlined_call_operand.hbm [shape: f32[2,4,256], index: 0, kind: input, shape index: {}]   ;;  %s4680_s1 = inlined_call_operand.vmem [shape: f32[9,2,4], index: 1, kind: input, shape index: {}]   ;;  %s4681_s2 = inlined_call_operand.vmem [shape: f32[2,1], index: 2, kind: input, shape index: {}]   ;;  %s4682_s3 = inlined_call_operand.vmem [shape: f32[9,4,2], index: 3, kind: input, shape index: {}]   ;;  %s4683_s4 = inlined_call_operand.vmem [shape: f32[4,1], index: 4, kind: input, shape index: {}]   ;;  %s4684_s5 = inlined_call_operand.hbm [shape: f32[9,256,256], index: 5, kind: input, shape index: {}]   ;;  %s4685_s6 = inlined_call_operand.hbm [shape: f32[2,4,256], index: 6, kind: output, shape index: {}]  }
   0x1   :  { %4690 = sst [smem:[#allocation11_spill]] %s4684_s5 }
   0x2   :  { %11 = vsyncpa [#allocation3], 0 }
   0x3   :  { %13 = vsyncpa [#allocation3 + $0x1], 0 }
   0x4   :  { %14 = vsyncpa [#allocation6], 0 }
   0x5   :  { %15 = vsyncpa [#allocation4], 0 }
   0x6   :  { %17 = vsyncpa [#allocation4 + $0x1], 0  ;;  %s4307_s21 = smov 0   ;;  %s4309_s22 = smov 0  }
   0x7   :  { %s4311_s23 = smov 0   ;;  %s4313_s24 = smov 0  }
   0x8 LB: > { %s4328_s25 = sadd.s32 4294967295, %s4263_s24   ;;  %s3477_s26 = sadd.s32 4294967294, %s4263_s24   ;;  %s4263_s24 = sphi %s4313_s24, %s4709_s24   ;;  %s4259_s23 = sphi %s4311_s23, %s4708_s23   ;;  %s4255_s22 = sphi %s4309_s22, %s4707_s22   ;;  %s4251_s21 = sphi %s4307_s21, %s4706_s21  }
   0x9   : > { %p43_p0 = scmp.ne.s32.totalorder %s4255_s22, %s4251_s21  ;;  %p4686_p1 = scmp.eq.s32.totalorder %s4328_s25, 0 }
   0xa   : > { %p178_p3 = scmp.eq.s32.totalorder %s3477_s26, 1  ;;  %p3478_p5 = scmp.ge.s32.totalorder %s4263_s24, 1 }
   0xb   : > { %p4337_p4 = por %p4686_p1, %p43_p0  ;;  %p185_p7 = scmp.lt.s32.totalorder %s4263_s24, 3 }
   0xc   : > { %p4342_p6 = por %p178_p3, %p43_p0  ;;  %s4265_s30 = smov [#allocation5]  }
   0xd   : > { %s4691_s27 = scalar_select %p4337_p4, 1, 0 }
   0xe   : > { %s4692_s28 = scalar_select %p4342_p6, 1, 0 }
   0xf   : > { %p4347_p8 = pnand %p3478_p5, %p185_p7  ;;  %s209_s7 = sshll.u32 %s4265_s30, 4  ;;  %s210_s7 = int_to_ptr.vmem [resolvable:$true] %s209_s7 }
  0x10   : > { %s4361_s9 = sadd.s32 1, %s4263_s24   ;;  %s30_s10 = sadd.s32 1, %s4259_s23 }
  0x11   : > { %s4693_s29 = scalar_select %p4347_p8, 1, 0 }
  0x12   : > { %p3573_p9 = pneg %p4347_p8  ;;  %s27_s11 = ssub.s32 %s4263_s24, %s4361_s9 }
  0x13   : > { %s4152_s12 = scalar_lea.vmem %s210_s7, 73728  ;;  %p4160_p5 = scmp.lt.s32.totalorder %s210_s7, %s210_s7 }
  0x14   : > { %p4356_p11 = pnand %p3573_p9, %p4686_p1  ;;  %p4153_p13 = scmp.ne.s32.totalorder %s210_s7, %s4152_s12 }
  0x15   : > { %p4161_p7 = scmp.lt.s32.totalorder %s4152_s12, %s4152_s12 }
  0x16   : > { %p4143_p12 = pneg %p4356_p11 }
  0x17   : > { %p4162_p10 = por %p4161_p7, %p4160_p5 }
  0x18   : > { %p4155_p0 = pnand %p4153_p13, %p4143_p12 }
  0x1a   : > { %p4156_p3 = pneg %p4155_p0 }
  0x1c   : > { %p4163_p2 = pnand %p4162_p10, %p4156_p3 }
  0x1e   : > { %4166 = shalt.err (!%p4163_p2)
}
  0x1f   : > { %s4266_s13 = smov 256   ;;  %s4267_s14 = smov 16  }
  0x20   : > { %s4695_s5 = sld [smem:[#allocation11_spill]]  ;;  %p28_p9 = scmp.eq.s32.totalorder %s27_s11, 0 }
  0x21   : > { %p37_p12 = scmp.ne.s32.totalorder %s4259_s23, %s4255_s22  ;;  %p38_p10 = scmp.eq.s32.totalorder %s4263_s24, 0 }
  0x22   : > { %p3586_p2 = scmp.lt.s32.totalorder %s4263_s24, 2  ;;  %p4696_p0 = scmp.eq.s32.totalorder %s4328_s25, 1 }
  0x23   : > { %s4378_s17 = scalar_select %p28_p9, %s4259_s23, %s30_s10  }
  0x24   : > { %p39_p13 = por %p38_p10, %p37_p12  ;;  %p4382_p3 = por %p4696_p0, %p37_p12 }
  0x25   : > { %s223_s19 = sand.u32 1, %s4259_s23   ;;  %s3563_s20 = sshll.u32 %s4263_s24, 7 }
  0x26   : > { %3576 = dma.hbm_to_vmem [thread:$0]  (!%p4356_p11), %s4695_s5, 73728, %s210_s7, [#allocation6], %s4266_s13, %s4266_s13, %s4267_s14  }
  0x27   : > { %s4697_s18 = scalar_select %p4382_p3, 1, 0 }
  0x28   : > { %s3481_s26 = sshll.u32 %s223_s19, 3  ;;  %s4391_s12 = scalar_lea.hbm %s4679_s0, %s3563_s20 }
  0x29   : > { %s227_s7 = scalar_lea.vmem [#allocation2], %s3481_s26  ;;  %p4393_p11 = pnand %p3586_p2, %p39_p13 }
  0x2a   : > { %s235_s10 = sshll.u32 %s227_s7, 4  ;;  %s224_s13 = scalar_lea.sflag [#allocation3], %s223_s19  ;;  %s236_s10 = int_to_ptr.vmem [resolvable:$true] %s235_s10 }
  0x2b   : > { %s4167_s14 = scalar_lea.hbm %s4391_s12, 128  ;;  %p4169_p7 = pneg %p4393_p11 }
  0x2c   : > { %p4168_p5 = scmp.ne.s32.totalorder %s4391_s12, %s4167_s14  ;;  %s4172_s20 = scalar_lea.hbm %s4679_s0, 256 }
  0x2d   : > { %p4173_p10 = scmp.lt.s32.totalorder %s4391_s12, %s4679_s0  ;;  %p4174_p2 = scmp.lt.s32.totalorder %s4172_s20, %s4167_s14 }
  0x2e   : > { %p4170_p9 = pnand %p4169_p7, %p4168_p5 }
  0x2f   : > { %p4175_p13 = por %p4174_p2, %p4173_p10 }
  0x30   : > { %p4171_p12 = pneg %p4170_p9 }
  0x32   : > { %p4176_p0 = pnand %p4175_p13, %p4171_p12 }
  0x34   : > { %4179 = shalt.err (!%p4176_p0)
}
  0x35   : > { %s4180_s8 = scalar_lea.vmem %s236_s10, 128  ;;  %s4268_s19 = smov [#allocation2]  }
  0x36   : > { %p4181_p1 = scmp.ne.s32.totalorder %s236_s10, %s4180_s8  ;;  %s4185_s7 = sshll.u32 %s4268_s19, 4  ;;  %s4186_s7 = int_to_ptr.vmem [resolvable:$false] %s4185_s7 }
  0x37   : > { %s4187_s5 = scalar_lea.vmem %s4186_s7, 256  ;;  %p4188_p5 = scmp.lt.s32.totalorder %s236_s10, %s4186_s7 }
  0x38   : > { %p4183_p6 = pnand %p4181_p1, %p4169_p7  ;;  %p4189_p9 = scmp.lt.s32.totalorder %s4187_s5, %s4180_s8 }
  0x3a   : > { %p4184_p3 = pneg %p4183_p6  ;;  %p4190_p4 = por %p4189_p9, %p4188_p5 }
  0x3c   : > { %p4191_p8 = pnand %p4190_p4, %p4184_p3 }
  0x3e   : > { %4194 = shalt.err (!%p4191_p8)
}
  0x3f   : > { %3580 = dma.hbm_to_vmem [thread:$0]  (!%p4393_p11), %s4391_s12, 128, %s236_s10, %s224_s13  }
  0x40   : > { %p4699_p12 = scmp.ne.s32.totalorder %s4693_s29, 0 }
  0x41   : > { %s4414_s14 = sand.u32 (!%p4699_p12), 1, %s4255_s22   ;;  %p4700_p1 = scmp.ne.s32.totalorder (!%p4699_p12), %s4691_s27, 0 }
  0x42   : > { %244 = sbr.rel (%p4699_p12) target bundleno = 2104 (0x838), region = 44  ;;  %s3485_s15 = sshll.u32 (!%p4699_p12), %s4414_s14, 3 }
  0x43   : > { %s247_s16 = scalar_lea.sflag (!%p4699_p12), [#allocation3], %s4414_s14  ;;  %s4420_s5 = scalar_lea.vmem (!%p4699_p12), [#allocation2], %s3485_s15 }
  0x47   : > { %4238 = dma.done.wait (%p4700_p1), %s247_s16, 128  }
  0x48   : > { %4240 = vsyncadd (%p4700_p1), %s247_s16, 4294967168  ;;  %p4701_p4 = scmp.eq.s32.totalorder %s4328_s25, 0 }
  0x4a   : > { %4242 = dma.done.wait (%p4701_p4), [#allocation6], 73728   ;;  %p4702_p6 = pmov %p4701_p4 }
  0x4b   : > { %v4269_v0 = vmov 0.0   ;;  %v4433_v1 = vld [vmem:[%s4420_s5] sm:$0xff]  ;;  %vm293_vm0 = vcmask 1043456   ;;  %vm289_vm1 = vcmask 31744   ;;  %v398_v9 = vld [vmem:[#allocation5 + $0xe8] sm:$0xff]  ;;  %v397_v11 = vld [vmem:[#allocation5 + $0xe0] sm:$0xff] }
  0x4c   : > { %4244 = vsyncadd (%p4702_p6), [#allocation6], 4294893568  ;;  %362 = vmatprep.mubr.f32.mxu1 %v4269_v0  ;;  %647 = vmatprep.mubr.f32.mxu0 %v4269_v0  ;;  %v4437_v2 = vcombine.high %v4433_v1, %v4433_v1  ;;  %v286_v3 = vld [vmem:[%s4680_s1] sm:$0x3]  ;;  %v3495_v4 = vld [vmem:[%s4680_s1 + $0x2] sm:$0x3] }
  0x4d   : > { %v400_v5 = vld [vmem:[#allocation5 + $0xf8] sm:$0xff]  ;;  %v399_v7 = vld [vmem:[#allocation5 + $0xf0] sm:$0xff]  ;;  %v684_v10 = vld [vmem:[#allocation5 + $0x2e8] sm:$0xff]  ;;  %vm2097_vm4 = vcmask 1041408   ;;  %vm2093_vm5 = vcmask 15360   ;;  %s3564_s16 = sshll.u32 %s4328_s25, 7 }
  0x4e   : > { %3489 = vmatprep.subr.msk.mxu1 %vm293_vm0, %v4437_v2  ;;  %3496 = vmatprep.subr.msk.mxu0 %vm293_vm0, %v4437_v2  ;;  %v686_v6 = vld [vmem:[#allocation5 + $0x2f8] sm:$0xff]  ;;  %v685_v8 = vld [vmem:[#allocation5 + $0x2f0] sm:$0xff]  ;;  %v683_v12 = vld [vmem:[#allocation5 + $0x2e0] sm:$0xff]  ;;  %s3395_s10 = scalar_lea.hbm %s4685_s6, %s3564_s16  ;;  %s3383_s11 = scalar_lea.sflag [#allocation4], %s4414_s14 }
  0x4f   : > { %3490 = vmatpush1.msk.msra.mxu1 %vm293_vm0, %v4433_v1  ;;  %3497 = vmatpush1.msk.msra.mxu0 %vm293_vm0, %v4433_v1  ;;  %v396_v13 = vld [vmem:[#allocation5 + $0xd8] sm:$0xff]  ;;  %v395_v15 = vld [vmem:[#allocation5 + $0xd0] sm:$0xff]  ;;  %v394_v17 = vld [vmem:[#allocation5 + $0xc8] sm:$0xff]  ;;  %p4703_p3 = scmp.ne.s32.totalorder %s4697_s18, 0  ;;  %s4271_s20 = smov [#allocation7]  }
  0x50   : > { %3491 = vmatmul.mubr.msk.f32.vlgmr.msra.gmra.mxu1 %vm289_vm1, %v286_v3  ;;  %3498 = vmatmul.mubr.msk.f32.vlgmr.msra.gmra.mxu0 %vm289_vm1, %v3495_v4  ;;  %v682_v14 = vld [vmem:[#allocation5 + $0x2d8] sm:$0xff]  ;;  %v681_v16 = vld [vmem:[#allocation5 + $0x2d0] sm:$0xff]  ;;  %v680_v18 = vld [vmem:[#allocation5 + $0x2c8] sm:$0xff]  ;;  %s4199_s25 = sshll.u32 %s4271_s20, 4  ;;  %s4200_s25 = int_to_ptr.vmem [resolvable:$false] %s4199_s25 }
  0x51   : > { %433 = vmatprep.subr.mxu1 %v400_v5  ;;  %719 = vmatprep.subr.mxu0 %v686_v6  ;;  %v393_v19 = vld [vmem:[#allocation5 + $0xc0] sm:$0xff]  ;;  %v392_v21 = vld [vmem:[#allocation5 + $0xb8] sm:$0xff]  ;;  %v391_v23 = vld [vmem:[#allocation5 + $0xb0] sm:$0xff] }
  0x52   : > { %434 = vmatpush1.msra.mxu1 %v399_v7  ;;  %720 = vmatpush1.msra.mxu0 %v685_v8  ;;  %v679_v20 = vld [vmem:[#allocation5 + $0x2c0] sm:$0xff]  ;;  %v678_v22 = vld [vmem:[#allocation5 + $0x2b8] sm:$0xff]  ;;  %v677_v24 = vld [vmem:[#allocation5 + $0x2b0] sm:$0xff] }
  0x53   : > { %435 = vmatprep.subr.mxu1 %v398_v9  ;;  %721 = vmatprep.subr.mxu0 %v684_v10  ;;  %v390_v25 = vld [vmem:[#allocation5 + $0xa8] sm:$0xff]  ;;  %v389_v27 = vld [vmem:[#allocation5 + $0xa0] sm:$0xff]  ;;  %v388_v29 = vld [vmem:[#allocation5 + $0x98] sm:$0xff] }
  0x54   : > { %436 = vmatpush1.msra.mxu1 %v397_v11  ;;  %722 = vmatpush1.msra.mxu0 %v683_v12  ;;  %v676_v26 = vld [vmem:[#allocation5 + $0x2a8] sm:$0xff]  ;;  %v675_v28 = vld [vmem:[#allocation5 + $0x2a0] sm:$0xff]  ;;  %v674_v30 = vld [vmem:[#allocation5 + $0x298] sm:$0xff] }
  0x55   : > { %437 = vmatprep.subr.mxu1 %v396_v13  ;;  %723 = vmatprep.subr.mxu0 %v682_v14  ;;  %v387_v31 = vld [vmem:[#allocation5 + $0x90] sm:$0xff]  ;;  %v386_v33 = vld [vmem:[#allocation5 + $0x88] sm:$0xff]  ;;  %v385_v35 = vld [vmem:[#allocation5 + $0x80] sm:$0xff] }
  0x56   : > { %438 = vmatpush1.msra.mxu1 %v395_v15  ;;  %724 = vmatpush1.msra.mxu0 %v681_v16  ;;  %v673_v32 = vld [vmem:[#allocation5 + $0x290] sm:$0xff]  ;;  %v672_v34 = vld [vmem:[#allocation5 + $0x288] sm:$0xff]  ;;  %v671_v36 = vld [vmem:[#allocation5 + $0x280] sm:$0xff] }
  0x57   : > { %439 = vmatprep.subr.mxu1 %v394_v17  ;;  %725 = vmatprep.subr.mxu0 %v680_v18  ;;  %v384_v37 = vld [vmem:[#allocation5 + $0x78] sm:$0xff]  ;;  %v383_v39 = vld [vmem:[#allocation5 + $0x70] sm:$0xff]  ;;  %v382_v41 = vld [vmem:[#allocation5 + $0x68] sm:$0xff] }
  0x58   : > { %440 = vmatpush1.msra.mxu1 %v393_v19  ;;  %726 = vmatpush1.msra.mxu0 %v679_v20  ;;  %v670_v38 = vld [vmem:[#allocation5 + $0x278] sm:$0xff]  ;;  %v669_v40 = vld [vmem:[#allocation5 + $0x270] sm:$0xff]  ;;  %v668_v42 = vld [vmem:[#allocation5 + $0x268] sm:$0xff] }
  0x59   : > { %441 = vmatprep.subr.mxu1 %v392_v21  ;;  %727 = vmatprep.subr.mxu0 %v678_v22  ;;  %v381_v43 = vld [vmem:[#allocation5 + $0x60] sm:$0xff]  ;;  %v380_v45 = vld [vmem:[#allocation5 + $0x58] sm:$0xff]  ;;  %v379_v47 = vld [vmem:[#allocation5 + $0x50] sm:$0xff] }
  0x5a   : > { %442 = vmatpush1.msra.mxu1 %v391_v23  ;;  %728 = vmatpush1.msra.mxu0 %v677_v24  ;;  %v667_v44 = vld [vmem:[#allocation5 + $0x260] sm:$0xff]  ;;  %v666_v46 = vld [vmem:[#allocation5 + $0x258] sm:$0xff]  ;;  %v665_v48 = vld [vmem:[#allocation5 + $0x250] sm:$0xff] }
  0x5b   : > { %443 = vmatprep.subr.mxu1 %v390_v25  ;;  %729 = vmatprep.subr.mxu0 %v676_v26  ;;  %v378_v49 = vld [vmem:[#allocation5 + $0x48] sm:$0xff]  ;;  %v377_v51 = vld [vmem:[#allocation5 + $0x40] sm:$0xff]  ;;  %v376_v53 = vld [vmem:[#allocation5 + $0x38] sm:$0xff] }
  0x5c   : > { %444 = vmatpush1.msra.mxu1 %v389_v27  ;;  %730 = vmatpush1.msra.mxu0 %v675_v28  ;;  %v664_v50 = vld [vmem:[#allocation5 + $0x248] sm:$0xff]  ;;  %v663_v52 = vld [vmem:[#allocation5 + $0x240] sm:$0xff]  ;;  %v662_v54 = vld [vmem:[#allocation5 + $0x238] sm:$0xff] }
  0x5d   : > { %445 = vmatprep.subr.mxu1 %v388_v29  ;;  %731 = vmatprep.subr.mxu0 %v674_v30  ;;  %v375_v55 = vld [vmem:[#allocation5 + $0x30] sm:$0xff]  ;;  %v374_v57 = vld [vmem:[#allocation5 + $0x28] sm:$0xff]  ;;  %v373_v59 = vld [vmem:[#allocation5 + $0x20] sm:$0xff] }
  0x5e   : > { %446 = vmatpush1.msra.mxu1 %v387_v31  ;;  %732 = vmatpush1.msra.mxu0 %v673_v32  ;;  %v661_v56 = vld [vmem:[#allocation5 + $0x230] sm:$0xff]  ;;  %v660_v58 = vld [vmem:[#allocation5 + $0x228] sm:$0xff]  ;;  %v659_v60 = vld [vmem:[#allocation5 + $0x220] sm:$0xff] }
  0x5f   : > { %447 = vmatprep.subr.mxu1 %v386_v33  ;;  %733 = vmatprep.subr.mxu0 %v672_v34  ;;  %v372_v61 = vld [vmem:[#allocation5 + $0x18] sm:$0xff]  ;;  %v371_v63 = vld [vmem:[#allocation5 + $0x10] sm:$0xff]  ;;  %v370_v4 = vld [vmem:[#allocation5 + $0x8] sm:$0xff] }
  0x60   : > { %448 = vmatpush1.msra.mxu1 %v385_v35  ;;  %734 = vmatpush1.msra.mxu0 %v671_v36  ;;  %v658_v62 = vld [vmem:[#allocation5 + $0x218] sm:$0xff]  ;;  %v657_v3 = vld [vmem:[#allocation5 + $0x210] sm:$0xff]  ;;  %v656_v5 = vld [vmem:[#allocation5 + $0x208] sm:$0xff] }
  0x61   : > { %449 = vmatprep.subr.mxu1 %v384_v37  ;;  %735 = vmatprep.subr.mxu0 %v670_v38  ;;  %v369_v6 = vld [vmem:[#allocation5] sm:$0xff]  ;;  %v432_v8 = vld [vmem:[#allocation5 + $0x1f8] sm:$0xff]  ;;  %v431_v10 = vld [vmem:[#allocation5 + $0x1f0] sm:$0xff] }
  0x62   : > { %450 = vmatpush1.msra.mxu1 %v383_v39  ;;  %736 = vmatpush1.msra.mxu0 %v669_v40  ;;  %v655_v7 = vld [vmem:[#allocation5 + $0x200] sm:$0xff]  ;;  %v718_v9 = vld [vmem:[#allocation5 + $0x3f8] sm:$0xff]  ;;  %v717_v11 = vld [vmem:[#allocation5 + $0x3f0] sm:$0xff] }
  0x63   : > { %451 = vmatprep.subr.mxu1 %v382_v41  ;;  %737 = vmatprep.subr.mxu0 %v668_v42  ;;  %v430_v12 = vld [vmem:[#allocation5 + $0x1e8] sm:$0xff]  ;;  %v429_v14 = vld [vmem:[#allocation5 + $0x1e0] sm:$0xff]  ;;  %v428_v16 = vld [vmem:[#allocation5 + $0x1d8] sm:$0xff] }
  0x64   : > { %452 = vmatpush1.msra.mxu1 %v381_v43  ;;  %738 = vmatpush1.msra.mxu0 %v667_v44  ;;  %v716_v13 = vld [vmem:[#allocation5 + $0x3e8] sm:$0xff]  ;;  %v715_v15 = vld [vmem:[#allocation5 + $0x3e0] sm:$0xff]  ;;  %v714_v17 = vld [vmem:[#allocation5 + $0x3d8] sm:$0xff] }
  0x65   : > { %453 = vmatprep.subr.mxu1 %v380_v45  ;;  %739 = vmatprep.subr.mxu0 %v666_v46  ;;  %v427_v18 = vld [vmem:[#allocation5 + $0x1d0] sm:$0xff]  ;;  %v426_v20 = vld [vmem:[#allocation5 + $0x1c8] sm:$0xff]  ;;  %v425_v22 = vld [vmem:[#allocation5 + $0x1c0] sm:$0xff] }
  0x66   : > { %454 = vmatpush1.msra.mxu1 %v379_v47  ;;  %740 = vmatpush1.msra.mxu0 %v665_v48  ;;  %v713_v19 = vld [vmem:[#allocation5 + $0x3d0] sm:$0xff]  ;;  %v712_v21 = vld [vmem:[#allocation5 + $0x3c8] sm:$0xff]  ;;  %v711_v23 = vld [vmem:[#allocation5 + $0x3c0] sm:$0xff] }
  0x67   : > { %455 = vmatprep.subr.mxu1 %v378_v49  ;;  %741 = vmatprep.subr.mxu0 %v664_v50  ;;  %v424_v24 = vld [vmem:[#allocation5 + $0x1b8] sm:$0xff]  ;;  %v423_v26 = vld [vmem:[#allocation5 + $0x1b0] sm:$0xff]  ;;  %v422_v28 = vld [vmem:[#allocation5 + $0x1a8] sm:$0xff] }
  0x68   : > { %456 = vmatpush1.msra.mxu1 %v377_v51  ;;  %742 = vmatpush1.msra.mxu0 %v663_v52  ;;  %v710_v25 = vld [vmem:[#allocation5 + $0x3b8] sm:$0xff]  ;;  %v709_v27 = vld [vmem:[#allocation5 + $0x3b0] sm:$0xff]  ;;  %v708_v29 = vld [vmem:[#allocation5 + $0x3a8] sm:$0xff] }
  0x69   : > { %457 = vmatprep.subr.mxu1 %v376_v53  ;;  %743 = vmatprep.subr.mxu0 %v662_v54  ;;  %v421_v30 = vld [vmem:[#allocation5 + $0x1a0] sm:$0xff]  ;;  %v420_v32 = vld [vmem:[#allocation5 + $0x198] sm:$0xff]  ;;  %v419_v34 = vld [vmem:[#allocation5 + $0x190] sm:$0xff] }
  0x6a   : > { %458 = vmatpush1.msra.mxu1 %v375_v55  ;;  %744 = vmatpush1.msra.mxu0 %v661_v56  ;;  %v707_v31 = vld [vmem:[#allocation5 + $0x3a0] sm:$0xff]  ;;  %v706_v33 = vld [vmem:[#allocation5 + $0x398] sm:$0xff]  ;;  %v705_v35 = vld [vmem:[#allocation5 + $0x390] sm:$0xff] }
  0x6b   : > { %459 = vmatprep.subr.mxu1 %v374_v57  ;;  %745 = vmatprep.subr.mxu0 %v660_v58  ;;  %v418_v36 = vld [vmem:[#allocation5 + $0x188] sm:$0xff]  ;;  %v417_v38 = vld [vmem:[#allocation5 + $0x180] sm:$0xff]  ;;  %v416_v40 = vld [vmem:[#allocation5 + $0x178] sm:$0xff] }
  0x6c   : > { %460 = vmatpush1.msra.mxu1 %v373_v59  ;;  %746 = vmatpush1.msra.mxu0 %v659_v60  ;;  %v704_v37 = vld [vmem:[#allocation5 + $0x388] sm:$0xff]  ;;  %v703_v39 = vld [vmem:[#allocation5 + $0x380] sm:$0xff]  ;;  %v702_v41 = vld [vmem:[#allocation5 + $0x378] sm:$0xff] }
  0x6d   : > { %461 = vmatprep.subr.mxu1 %v372_v61  ;;  %747 = vmatprep.subr.mxu0 %v658_v62  ;;  %v415_v42 = vld [vmem:[#allocation5 + $0x170] sm:$0xff]  ;;  %v414_v44 = vld [vmem:[#allocation5 + $0x168] sm:$0xff]  ;;  %v413_v46 = vld [vmem:[#allocation5 + $0x160] sm:$0xff] }
  0x6e   : > { %462 = vmatpush1.msra.mxu1 %v371_v63  ;;  %748 = vmatpush1.msra.mxu0 %v657_v3  ;;  %v701_v43 = vld [vmem:[#allocation5 + $0x370] sm:$0xff]  ;;  %v700_v45 = vld [vmem:[#allocation5 + $0x368] sm:$0xff]  ;;  %v699_v47 = vld [vmem:[#allocation5 + $0x360] sm:$0xff] }
  0x6f   : > { %463 = vmatprep.subr.mxu1 %v370_v4  ;;  %749 = vmatprep.subr.mxu0 %v656_v5  ;;  %v412_v48 = vld [vmem:[#allocation5 + $0x158] sm:$0xff]  ;;  %v411_v50 = vld [vmem:[#allocation5 + $0x150] sm:$0xff]  ;;  %v410_v52 = vld [vmem:[#allocation5 + $0x148] sm:$0xff] }
  0x70   : > { %464 = vmatpush1.msra.mxu1 %v369_v6  ;;  %750 = vmatpush1.msra.mxu0 %v655_v7  ;;  %v698_v49 = vld [vmem:[#allocation5 + $0x358] sm:$0xff]  ;;  %v697_v51 = vld [vmem:[#allocation5 + $0x350] sm:$0xff]  ;;  %v696_v53 = vld [vmem:[#allocation5 + $0x348] sm:$0xff] }
  0x71   : > { %465 = vmatprep.subr.mxu1 %v432_v8  ;;  %751 = vmatprep.subr.mxu0 %v718_v9  ;;  %v409_v54 = vld [vmem:[#allocation5 + $0x140] sm:$0xff]  ;;  %v408_v56 = vld [vmem:[#allocation5 + $0x138] sm:$0xff]  ;;  %v407_v58 = vld [vmem:[#allocation5 + $0x130] sm:$0xff] }
  0x72   : > { %466 = vmatpush2.msra.mxu1 %v431_v10  ;;  %752 = vmatpush2.msra.mxu0 %v717_v11  ;;  %v695_v55 = vld [vmem:[#allocation5 + $0x340] sm:$0xff]  ;;  %v694_v57 = vld [vmem:[#allocation5 + $0x338] sm:$0xff]  ;;  %v693_v59 = vld [vmem:[#allocation5 + $0x330] sm:$0xff] }
  0x73   : > { %467 = vmatprep.subr.mxu1 %v430_v12  ;;  %753 = vmatprep.subr.mxu0 %v716_v13  ;;  %v406_v60 = vld [vmem:[#allocation5 + $0x128] sm:$0xff]  ;;  %v405_v62 = vld [vmem:[#allocation5 + $0x120] sm:$0xff]  ;;  %v404_v63 = vld [vmem:[#allocation5 + $0x118] sm:$0xff] }
  0x74   : > { %468 = vmatpush2.msra.mxu1 %v429_v14  ;;  %754 = vmatpush2.msra.mxu0 %v715_v15  ;;  %v692_v61 = vld [vmem:[#allocation5 + $0x328] sm:$0xff]  ;;  %v691_v3 = vld [vmem:[#allocation5 + $0x320] sm:$0xff]  ;;  %v403_v4 = vld [vmem:[#allocation5 + $0x110] sm:$0xff] }
  0x75   : > { %469 = vmatprep.subr.mxu1 %v428_v16  ;;  %755 = vmatprep.subr.mxu0 %v714_v17  ;;  %v690_v5 = vld [vmem:[#allocation5 + $0x318] sm:$0xff]  ;;  %v402_v6 = vld [vmem:[#allocation5 + $0x108] sm:$0xff]  ;;  %v689_v7 = vld [vmem:[#allocation5 + $0x310] sm:$0xff] }
  0x76   : > { %470 = vmatpush2.msra.mxu1 %v427_v18  ;;  %756 = vmatpush2.msra.mxu0 %v713_v19  ;;  %v401_v8 = vld [vmem:[#allocation5 + $0x100] sm:$0xff]  ;;  %v688_v9 = vld [vmem:[#allocation5 + $0x308] sm:$0xff]  ;;  %v1114_v15 = vld [vmem:[#allocation5 + $0x6f8] sm:$0xff] }
  0x77   : > { %471 = vmatprep.subr.mxu1 %v426_v20  ;;  %757 = vmatprep.subr.mxu0 %v712_v21  ;;  %v687_v10 = vld [vmem:[#allocation5 + $0x300] sm:$0xff]  ;;  %v3488_v16 = vld [vmem:[%s4680_s1 + $0x8] sm:$0x3]  ;;  %v3503_v17 = vld [vmem:[%s4680_s1 + $0x6] sm:$0x3] }
  0x78   : > { %472 = vmatpush2.msra.mxu1 %v425_v22  ;;  %758 = vmatpush2.msra.mxu0 %v711_v23  ;;  %v1113_v18 = vld [vmem:[#allocation5 + $0x6f0] sm:$0xff]  ;;  %v900_v19 = vld [vmem:[#allocation5 + $0x4f8] sm:$0xff]  ;;  %v1112_v20 = vld [vmem:[#allocation5 + $0x6e8] sm:$0xff] }
  0x79   : > { %473 = vmatprep.subr.mxu1 %v424_v24  ;;  %759 = vmatprep.subr.mxu0 %v710_v25  ;;  %v3499_v21 = vld [vmem:[%s4680_s1 + $0x4] sm:$0x3]  ;;  %v1111_v22 = vld [vmem:[#allocation5 + $0x6e0] sm:$0xff]  ;;  %v1110_v24 = vld [vmem:[#allocation5 + $0x6d8] sm:$0xff] }
  0x7a   : > { %474 = vmatpush2.msra.mxu1 %v423_v26  ;;  %760 = vmatpush2.msra.mxu0 %v709_v27  ;;  %v899_v23 = vld [vmem:[#allocation5 + $0x4f0] sm:$0xff]  ;;  %v898_v25 = vld [vmem:[#allocation5 + $0x4e8] sm:$0xff]  ;;  %v897_v27 = vld [vmem:[#allocation5 + $0x4e0] sm:$0xff] }
  0x7b   : > { %475 = vmatprep.subr.mxu1 %v422_v28  ;;  %761 = vmatprep.subr.mxu0 %v708_v29  ;;  %v1109_v26 = vld [vmem:[#allocation5 + $0x6d0] sm:$0xff]  ;;  %v1108_v28 = vld [vmem:[#allocation5 + $0x6c8] sm:$0xff]  ;;  %v1107_v29 = vld [vmem:[#allocation5 + $0x6c0] sm:$0xff] }
  0x7c   : > { %476 = vmatpush2.msra.mxu1 %v421_v30  ;;  %762 = vmatpush2.msra.mxu0 %v707_v31  ;;  %v895_v30 = vld [vmem:[#allocation5 + $0x4d0] sm:$0xff]  ;;  %v1106_v31 = vld [vmem:[#allocation5 + $0x6b8] sm:$0xff] }
  0x7d   : > { %477 = vmatprep.subr.mxu1 %v420_v32  ;;  %763 = vmatprep.subr.mxu0 %v706_v33  ;;  %v894_v32 = vld [vmem:[#allocation5 + $0x4c8] sm:$0xff]  ;;  %v1105_v33 = vld [vmem:[#allocation5 + $0x6b0] sm:$0xff] }
  0x7e   : > { %478 = vmatpush2.msra.mxu1 %v419_v34  ;;  %764 = vmatpush2.msra.mxu0 %v705_v35  ;;  %v893_v34 = vld [vmem:[#allocation5 + $0x4c0] sm:$0xff]  ;;  %v1104_v35 = vld [vmem:[#allocation5 + $0x6a8] sm:$0xff] }
  0x7f   : > { %479 = vmatprep.subr.mxu1 %v418_v36  ;;  %765 = vmatprep.subr.mxu0 %v704_v37  ;;  %v892_v36 = vld [vmem:[#allocation5 + $0x4b8] sm:$0xff]  ;;  %v1103_v37 = vld [vmem:[#allocation5 + $0x6a0] sm:$0xff] }
  0x80   : > { %480 = vmatpush2.msra.mxu1 %v417_v38  ;;  %766 = vmatpush2.msra.mxu0 %v703_v39  ;;  %v891_v38 = vld [vmem:[#allocation5 + $0x4b0] sm:$0xff]  ;;  %v1102_v39 = vld [vmem:[#allocation5 + $0x698] sm:$0xff] }
  0x81   : > { %481 = vmatprep.subr.mxu1 %v416_v40  ;;  %767 = vmatprep.subr.mxu0 %v702_v41  ;;  %v890_v40 = vld [vmem:[#allocation5 + $0x4a8] sm:$0xff]  ;;  %v1101_v41 = vld [vmem:[#allocation5 + $0x690] sm:$0xff] }
  0x82   : > { %482 = vmatpush2.msra.mxu1 %v415_v42  ;;  %768 = vmatpush2.msra.mxu0 %v701_v43  ;;  %v889_v42 = vld [vmem:[#allocation5 + $0x4a0] sm:$0xff]  ;;  %v1100_v43 = vld [vmem:[#allocation5 + $0x688] sm:$0xff] }
  0x83   : > { %483 = vmatprep.subr.mxu1 %v414_v44  ;;  %769 = vmatprep.subr.mxu0 %v700_v45  ;;  %v888_v44 = vld [vmem:[#allocation5 + $0x498] sm:$0xff]  ;;  %v1099_v45 = vld [vmem:[#allocation5 + $0x680] sm:$0xff] }
  0x84   : > { %484 = vmatpush2.msra.mxu1 %v413_v46  ;;  %770 = vmatpush2.msra.mxu0 %v699_v47  ;;  %v887_v46 = vld [vmem:[#allocation5 + $0x490] sm:$0xff]  ;;  %v1098_v47 = vld [vmem:[#allocation5 + $0x678] sm:$0xff] }
  0x85   : > { %485 = vmatprep.subr.mxu1 %v412_v48  ;;  %771 = vmatprep.subr.mxu0 %v698_v49  ;;  %v886_v48 = vld [vmem:[#allocation5 + $0x488] sm:$0xff]  ;;  %v1097_v49 = vld [vmem:[#allocation5 + $0x670] sm:$0xff] }
  0x86   : > { %486 = vmatpush2.msra.mxu1 %v411_v50  ;;  %772 = vmatpush2.msra.mxu0 %v697_v51  ;;  %v885_v50 = vld [vmem:[#allocation5 + $0x480] sm:$0xff]  ;;  %v1096_v51 = vld [vmem:[#allocation5 + $0x668] sm:$0xff] }
  0x87   : > { %487 = vmatprep.subr.mxu1 %v410_v52  ;;  %773 = vmatprep.subr.mxu0 %v696_v53  ;;  %v884_v52 = vld [vmem:[#allocation5 + $0x478] sm:$0xff]  ;;  %v1095_v53 = vld [vmem:[#allocation5 + $0x660] sm:$0xff] }
  0x88   : > { %488 = vmatpush2.msra.mxu1 %v409_v54  ;;  %774 = vmatpush2.msra.mxu0 %v695_v55  ;;  %v883_v54 = vld [vmem:[#allocation5 + $0x470] sm:$0xff]  ;;  %v1094_v55 = vld [vmem:[#allocation5 + $0x658] sm:$0xff] }
  0x89   : > { %489 = vmatprep.subr.mxu1 %v408_v56  ;;  %775 = vmatprep.subr.mxu0 %v694_v57  ;;  %v882_v56 = vld [vmem:[#allocation5 + $0x468] sm:$0xff]  ;;  %v1093_v57 = vld [vmem:[#allocation5 + $0x650] sm:$0xff] }
  0x8a   : > { %490 = vmatpush2.msra.mxu1 %v407_v58  ;;  %776 = vmatpush2.msra.mxu0 %v693_v59  ;;  %v881_v58 = vld [vmem:[#allocation5 + $0x460] sm:$0xff]  ;;  %v1092_v59 = vld [vmem:[#allocation5 + $0x648] sm:$0xff] }
  0x8b   : > { %491 = vmatprep.subr.mxu1 %v406_v60  ;;  %777 = vmatprep.subr.mxu0 %v692_v61  ;;  %v880_v60 = vld [vmem:[#allocation5 + $0x458] sm:$0xff]  ;;  %v1091_v61 = vld [vmem:[#allocation5 + $0x640] sm:$0xff] }
  0x8c   : > { %492 = vmatpush2.msra.mxu1 %v405_v62  ;;  %778 = vmatpush2.msra.mxu0 %v691_v3  ;;  %v879_v62 = vld [vmem:[#allocation5 + $0x450] sm:$0xff]  ;;  %v878_v3 = vld [vmem:[#allocation5 + $0x448] sm:$0xff] }
  0x8d   : > { %493 = vmatprep.subr.mxu1 %v404_v63  ;;  %779 = vmatprep.subr.mxu0 %v690_v5  ;;  %v1090_v63 = vld [vmem:[#allocation5 + $0x638] sm:$0xff]  ;;  %v877_v5 = vld [vmem:[#allocation5 + $0x440] sm:$0xff] }
  0x8e   : > { %494 = vmatpush2.msra.mxu1 %v403_v4  ;;  %780 = vmatpush2.msra.mxu0 %v689_v7  ;;  %v1089_v4 = vld [vmem:[#allocation5 + $0x630] sm:$0xff]  ;;  %v876_v7 = vld [vmem:[#allocation5 + $0x438] sm:$0xff] }
  0x8f   : > { %495 = vmatprep.subr.mxu1 %v402_v6  ;;  %781 = vmatprep.subr.mxu0 %v688_v9  ;;  %v1088_v6 = vld [vmem:[#allocation5 + $0x628] sm:$0xff]  ;;  %v875_v9 = vld [vmem:[#allocation5 + $0x430] sm:$0xff] }
  0x90   : > { %496 = vmatpush2.msra.mxu1 %v401_v8  ;;  %782 = vmatpush2.msra.mxu0 %v687_v10  ;;  %v1087_v8 = vld [vmem:[#allocation5 + $0x620] sm:$0xff]  ;;  %v1086_v10 = vld [vmem:[#allocation5 + $0x618] sm:$0xff] }
  0x91   : > { %3492 = vmatprep.subr.msk.mxu1 %vm293_vm0, %v4437_v2  ;;  %3504 = vmatprep.subr.msk.mxu0 %vm293_vm0, %v4437_v2 }
 0x110   : > { %v364_v11 = vpop.f32.mrf.mxu1  ;;  %v649_v12 = vpop.f32.mrf.mxu0 }
 0x112   : > { %v366_v13 = vpop.f32.mrf.mxu1  ;;  %v651_v14 = vpop.f32.mrf.mxu0 }
 0x113   : > { %497 = vmatprep.mubr.f32.mxu1 %v366_v13  ;;  %783 = vmatprep.mubr.f32.mxu0 %v651_v14  ;;  %v873_v13 = vld [vmem:[#allocation5 + $0x420] sm:$0xff]  ;;  %v1084_v14 = vld [vmem:[#allocation5 + $0x608] sm:$0xff] }
 0x114   : > { %498 = vmatmul.mubr.f32.vlgmr.msra.gmra.mxu1 %v364_v11  ;;  %784 = vmatmul.mubr.f32.vlgmr.msra.gmra.mxu0 %v649_v12  ;;  %v874_v11 = vld [vmem:[#allocation5 + $0x428] sm:$0xff]  ;;  %v1085_v12 = vld [vmem:[#allocation5 + $0x610] sm:$0xff] }
 0x115   : > { %3493 = vmatpush1.msk.msra.mxu1 %vm293_vm0, %v4433_v1  ;;  %571 = vmatprep.mubr.f32.mxu1 %v4269_v0 }
 0x116   : > { %3505 = vmatpush1.msk.msra.mxu0 %vm293_vm0, %v4433_v1  ;;  %1075 = vmatprep.mubr.f32.mxu0 %v4269_v0 }
 0x117   : > { %3500 = vmatprep.subr.msk.mxu1 %vm293_vm0, %v4437_v2  ;;  %1147 = vmatprep.subr.mxu0 %v1114_v15  ;;  %v872_v15 = vld [vmem:[#allocation5 + $0x418] sm:$0xff] }
 0x118   : > { %3494 = vmatmul.mubr.msk.f32.vlgmr.msra.gmra.mxu1 %vm289_vm1, %v3488_v16  ;;  %3506 = vmatmul.mubr.msk.f32.vlgmr.msra.gmra.mxu0 %vm289_vm1, %v3503_v17  ;;  %v1083_v16 = vld [vmem:[#allocation5 + $0x600] sm:$0xff]  ;;  %v871_v17 = vld [vmem:[#allocation5 + $0x410] sm:$0xff] }
 0x119   : > { %3501 = vmatpush1.msk.msra.mxu1 %vm293_vm0, %v4433_v1  ;;  %861 = vmatprep.mubr.f32.mxu1 %v4269_v0  ;;  %v896_v1 = vld [vmem:[#allocation5 + $0x4d8] sm:$0xff] }
 0x11a   : > { %1148 = vmatpush1.msra.mxu0 %v1113_v18  ;;  %933 = vmatprep.subr.mxu1 %v900_v19  ;;  %v1146_v18 = vld [vmem:[#allocation5 + $0x7f8] sm:$0xff]  ;;  %v870_v19 = vld [vmem:[#allocation5 + $0x408] sm:$0xff] }
 0x11b   : > { %1149 = vmatprep.subr.mxu0 %v1112_v20  ;;  %v1145_v20 = vld [vmem:[#allocation5 + $0x7f0] sm:$0xff] }
 0x11c   : > { %3502 = vmatmul.mubr.msk.f32.vlgmr.msra.gmra.mxu1 %vm289_vm1, %v3499_v21  ;;  %1150 = vmatpush1.msra.mxu0 %v1111_v22  ;;  %v869_v21 = vld [vmem:[#allocation5 + $0x400] sm:$0xff]  ;;  %v1144_v22 = vld [vmem:[#allocation5 + $0x7e8] sm:$0xff] }
 0x11d   : > { %934 = vmatpush1.msra.mxu1 %v899_v23  ;;  %1151 = vmatprep.subr.mxu0 %v1110_v24  ;;  %v932_v23 = vld [vmem:[#allocation5 + $0x5f8] sm:$0xff]  ;;  %v1143_v24 = vld [vmem:[#allocation5 + $0x7e0] sm:$0xff] }
 0x11e   : > { %935 = vmatprep.subr.mxu1 %v898_v25  ;;  %1152 = vmatpush1.msra.mxu0 %v1109_v26  ;;  %v931_v25 = vld [vmem:[#allocation5 + $0x5f0] sm:$0xff]  ;;  %v1142_v26 = vld [vmem:[#allocation5 + $0x7d8] sm:$0xff] }
 0x11f   : > { %936 = vmatpush1.msra.mxu1 %v897_v27  ;;  %1153 = vmatprep.subr.mxu0 %v1108_v28  ;;  %v930_v27 = vld [vmem:[#allocation5 + $0x5e8] sm:$0xff]  ;;  %v1141_v28 = vld [vmem:[#allocation5 + $0x7d0] sm:$0xff] }
 0x120   : > { %937 = vmatprep.subr.mxu1 %v896_v1  ;;  %1154 = vmatpush1.msra.mxu0 %v1107_v29  ;;  %v929_v1 = vld [vmem:[#allocation5 + $0x5e0] sm:$0xff]  ;;  %v1140_v29 = vld [vmem:[#allocation5 + $0x7c8] sm:$0xff] }
 0x121   : > { %938 = vmatpush1.msra.mxu1 %v895_v30  ;;  %1155 = vmatprep.subr.mxu0 %v1106_v31  ;;  %v928_v30 = vld [vmem:[#allocation5 + $0x5d8] sm:$0xff]  ;;  %v1139_v31 = vld [vmem:[#allocation5 + $0x7c0] sm:$0xff] }
 0x122   : > { %939 = vmatprep.subr.mxu1 %v894_v32  ;;  %1156 = vmatpush1.msra.mxu0 %v1105_v33  ;;  %v927_v32 = vld [vmem:[#allocation5 + $0x5d0] sm:$0xff]  ;;  %v1138_v33 = vld [vmem:[#allocation5 + $0x7b8] sm:$0xff] }
 0x123   : > { %940 = vmatpush1.msra.mxu1 %v893_v34  ;;  %1157 = vmatprep.subr.mxu0 %v1104_v35  ;;  %v926_v34 = vld [vmem:[#allocation5 + $0x5c8] sm:$0xff]  ;;  %v1137_v35 = vld [vmem:[#allocation5 + $0x7b0] sm:$0xff] }
 0x124   : > { %941 = vmatprep.subr.mxu1 %v892_v36  ;;  %1158 = vmatpush1.msra.mxu0 %v1103_v37  ;;  %v925_v36 = vld [vmem:[#allocation5 + $0x5c0] sm:$0xff]  ;;  %v1136_v37 = vld [vmem:[#allocation5 + $0x7a8] sm:$0xff] }
 0x125   : > { %942 = vmatpush1.msra.mxu1 %v891_v38  ;;  %1159 = vmatprep.subr.mxu0 %v1102_v39  ;;  %v924_v38 = vld [vmem:[#allocation5 + $0x5b8] sm:$0xff]  ;;  %v1135_v39 = vld [vmem:[#allocation5 + $0x7a0] sm:$0xff] }
 0x126   : > { %943 = vmatprep.subr.mxu1 %v890_v40  ;;  %1160 = vmatpush1.msra.mxu0 %v1101_v41  ;;  %v923_v40 = vld [vmem:[#allocation5 + $0x5b0] sm:$0xff]  ;;  %v1134_v41 = vld [vmem:[#allocation5 + $0x798] sm:$0xff] }
 0x127   : > { %944 = vmatpush1.msra.mxu1 %v889_v42  ;;  %1161 = vmatprep.subr.mxu0 %v1100_v43  ;;  %v922_v42 = vld [vmem:[#allocation5 + $0x5a8] sm:$0xff]  ;;  %v1133_v43 = vld [vmem:[#allocation5 + $0x790] sm:$0xff] }
 0x128   : > { %945 = vmatprep.subr.mxu1 %v888_v44  ;;  %1162 = vmatpush1.msra.mxu0 %v1099_v45  ;;  %v921_v44 = vld [vmem:[#allocation5 + $0x5a0] sm:$0xff]  ;;  %v1132_v45 = vld [vmem:[#allocation5 + $0x788] sm:$0xff] }
 0x129   : > { %946 = vmatpush1.msra.mxu1 %v887_v46  ;;  %1163 = vmatprep.subr.mxu0 %v1098_v47  ;;  %v920_v46 = vld [vmem:[#allocation5 + $0x598] sm:$0xff]  ;;  %v1131_v47 = vld [vmem:[#allocation5 + $0x780] sm:$0xff] }
 0x12a   : > { %947 = vmatprep.subr.mxu1 %v886_v48  ;;  %1164 = vmatpush1.msra.mxu0 %v1097_v49  ;;  %v919_v48 = vld [vmem:[#allocation5 + $0x590] sm:$0xff]  ;;  %v1130_v49 = vld [vmem:[#allocation5 + $0x778] sm:$0xff] }
 0x12b   : > { %948 = vmatpush1.msra.mxu1 %v885_v50  ;;  %1165 = vmatprep.subr.mxu0 %v1096_v51  ;;  %v918_v50 = vld [vmem:[#allocation5 + $0x588] sm:$0xff]  ;;  %v1129_v51 = vld [vmem:[#allocation5 + $0x770] sm:$0xff] }
 0x12c   : > { %949 = vmatprep.subr.mxu1 %v884_v52  ;;  %1166 = vmatpush1.msra.mxu0 %v1095_v53  ;;  %v917_v52 = vld [vmem:[#allocation5 + $0x580] sm:$0xff]  ;;  %v1128_v53 = vld [vmem:[#allocation5 + $0x768] sm:$0xff] }
 0x12d   : > { %950 = vmatpush1.msra.mxu1 %v883_v54  ;;  %1167 = vmatprep.subr.mxu0 %v1094_v55  ;;  %v916_v54 = vld [vmem:[#allocation5 + $0x578] sm:$0xff]  ;;  %v1127_v55 = vld [vmem:[#allocation5 + $0x760] sm:$0xff] }
 0x12e   : > { %951 = vmatprep.subr.mxu1 %v882_v56  ;;  %1168 = vmatpush1.msra.mxu0 %v1093_v57  ;;  %v915_v56 = vld [vmem:[#allocation5 + $0x570] sm:$0xff]  ;;  %v1126_v57 = vld [vmem:[#allocation5 + $0x758] sm:$0xff] }
 0x12f   : > { %952 = vmatpush1.msra.mxu1 %v881_v58  ;;  %1169 = vmatprep.subr.mxu0 %v1092_v59  ;;  %v914_v58 = vld [vmem:[#allocation5 + $0x568] sm:$0xff]  ;;  %v1125_v59 = vld [vmem:[#allocation5 + $0x750] sm:$0xff] }
 0x130   : > { %953 = vmatprep.subr.mxu1 %v880_v60  ;;  %1170 = vmatpush1.msra.mxu0 %v1091_v61  ;;  %v913_v60 = vld [vmem:[#allocation5 + $0x560] sm:$0xff]  ;;  %v1124_v61 = vld [vmem:[#allocation5 + $0x748] sm:$0xff] }
 0x131   : > { %954 = vmatpush1.msra.mxu1 %v879_v62  ;;  %1171 = vmatprep.subr.mxu0 %v1090_v63  ;;  %v912_v62 = vld [vmem:[#allocation5 + $0x558] sm:$0xff]  ;;  %v1123_v63 = vld [vmem:[#allocation5 + $0x740] sm:$0xff] }
 0x132   : > { %955 = vmatprep.subr.mxu1 %v878_v3  ;;  %1172 = vmatpush1.msra.mxu0 %v1089_v4  ;;  %v911_v3 = vld [vmem:[#allocation5 + $0x550] sm:$0xff]  ;;  %v1122_v4 = vld [vmem:[#allocation5 + $0x738] sm:$0xff] }
 0x133   : > { %956 = vmatpush1.msra.mxu1 %v877_v5  ;;  %1173 = vmatprep.subr.mxu0 %v1088_v6  ;;  %v910_v5 = vld [vmem:[#allocation5 + $0x548] sm:$0xff]  ;;  %v1121_v6 = vld [vmem:[#allocation5 + $0x730] sm:$0xff] }
 0x134   : > { %957 = vmatprep.subr.mxu1 %v876_v7  ;;  %1174 = vmatpush1.msra.mxu0 %v1087_v8  ;;  %v909_v7 = vld [vmem:[#allocation5 + $0x540] sm:$0xff]  ;;  %v1120_v8 = vld [vmem:[#allocation5 + $0x728] sm:$0xff] }
 0x135   : > { %958 = vmatpush1.msra.mxu1 %v875_v9  ;;  %1175 = vmatprep.subr.mxu0 %v1086_v10  ;;  %v908_v9 = vld [vmem:[#allocation5 + $0x538] sm:$0xff]  ;;  %v1119_v10 = vld [vmem:[#allocation5 + $0x720] sm:$0xff] }
 0x136   : > { %959 = vmatprep.subr.mxu1 %v874_v11  ;;  %1176 = vmatpush1.msra.mxu0 %v1085_v12  ;;  %v907_v11 = vld [vmem:[#allocation5 + $0x530] sm:$0xff]  ;;  %v1118_v12 = vld [vmem:[#allocation5 + $0x718] sm:$0xff] }
 0x137   : > { %960 = vmatpush1.msra.mxu1 %v873_v13  ;;  %1177 = vmatprep.subr.mxu0 %v1084_v14  ;;  %v906_v13 = vld [vmem:[#allocation5 + $0x528] sm:$0xff]  ;;  %v1117_v14 = vld [vmem:[#allocation5 + $0x710] sm:$0xff] }
 0x138   : > { %961 = vmatprep.subr.mxu1 %v872_v15  ;;  %1178 = vmatpush1.msra.mxu0 %v1083_v16  ;;  %v905_v15 = vld [vmem:[#allocation5 + $0x520] sm:$0xff]  ;;  %v1116_v16 = vld [vmem:[#allocation5 + $0x708] sm:$0xff] }
 0x139   : > { %962 = vmatpush1.msra.mxu1 %v871_v17  ;;  %1179 = vmatprep.subr.mxu0 %v1146_v18  ;;  %v904_v17 = vld [vmem:[#allocation5 + $0x518] sm:$0xff]  ;;  %v1115_v18 = vld [vmem:[#allocation5 + $0x700] sm:$0xff] }
 0x13a   : > { %963 = vmatprep.subr.mxu1 %v870_v19  ;;  %1180 = vmatpush2.msra.mxu0 %v1145_v20  ;;  %v903_v19 = vld [vmem:[#allocation5 + $0x510] sm:$0xff]  ;;  %v902_v20 = vld [vmem:[#allocation5 + $0x508] sm:$0xff] }
 0x13b   : > { %964 = vmatpush1.msra.mxu1 %v869_v21  ;;  %1181 = vmatprep.subr.mxu0 %v1144_v22  ;;  %v901_v21 = vld [vmem:[#allocation5 + $0x500] sm:$0xff] }
 0x13c   : > { %965 = vmatprep.subr.mxu1 %v932_v23  ;;  %1182 = vmatpush2.msra.mxu0 %v1143_v24 }
 0x13d   : > { %966 = vmatpush2.msra.mxu1 %v931_v25  ;;  %1183 = vmatprep.subr.mxu0 %v1142_v26 }
 0x13e   : > { %967 = vmatprep.subr.mxu1 %v930_v27  ;;  %1184 = vmatpush2.msra.mxu0 %v1141_v28 }
 0x13f   : > { %968 = vmatpush2.msra.mxu1 %v929_v1  ;;  %1185 = vmatprep.subr.mxu0 %v1140_v29 }
 0x140   : > { %969 = vmatprep.subr.mxu1 %v928_v30  ;;  %1186 = vmatpush2.msra.mxu0 %v1139_v31  ;;  %v1542_v31 = vld [vmem:[#allocation5 + $0xcf8] sm:$0xff] }
 0x141   : > { %970 = vmatpush2.msra.mxu1 %v927_v32  ;;  %1187 = vmatprep.subr.mxu0 %v1138_v33 }
 0x142   : > { %971 = vmatprep.subr.mxu1 %v926_v34  ;;  %1188 = vmatpush2.msra.mxu0 %v1137_v35  ;;  %v4489_v34 = vld [vmem:[%s4420_s5] sm:$0xff]  ;;  %s282_s5 = scalar_lea.vmem [#allocation7], %s3485_s15  ;;  %s4201_s15 = scalar_lea.vmem %s4200_s25, 256 }
 0x143   : > { %972 = vmatpush2.msra.mxu1 %v925_v36  ;;  %1189 = vmatprep.subr.mxu0 %v1136_v37  ;;  %v3511_v35 = vld [vmem:[%s4680_s1 + $0xc] sm:$0x3]  ;;  %s3397_s27 = sshll.u32 %s282_s5, 4  ;;  %s3398_s27 = int_to_ptr.vmem [resolvable:$true] %s3397_s27 }
 0x144   : > { %973 = vmatprep.subr.mxu1 %v924_v38  ;;  %1190 = vmatpush2.msra.mxu0 %v1135_v39  ;;  %v1541_v38 = vld [vmem:[#allocation5 + $0xcf0] sm:$0xff]  ;;  %v1328_v39 = vld [vmem:[#allocation5 + $0xaf8] sm:$0xff]  ;;  %s4195_s13 = scalar_lea.vmem %s3398_s27, 128  ;;  %p4202_p10 = scmp.lt.s32.totalorder %s3398_s27, %s4200_s25 }
 0x145   : > { %974 = vmatpush2.msra.mxu1 %v923_v40  ;;  %1191 = vmatprep.subr.mxu0 %v1134_v41  ;;  %v1540_v40 = vld [vmem:[#allocation5 + $0xce8] sm:$0xff]  ;;  %v3507_v41 = vld [vmem:[%s4680_s1 + $0xa] sm:$0x3]  ;;  %p4196_p8 = scmp.ne.s32.totalorder %s3398_s27, %s4195_s13  ;;  %p4203_p2 = scmp.lt.s32.totalorder %s4201_s15, %s4195_s13 }
 0x146   : > { %975 = vmatprep.subr.mxu1 %v922_v42  ;;  %1192 = vmatpush2.msra.mxu0 %v1133_v43  ;;  %v1539_v42 = vld [vmem:[#allocation5 + $0xce0] sm:$0xff]  ;;  %v1327_v43 = vld [vmem:[#allocation5 + $0xaf0] sm:$0xff] }
 0x147   : > { %976 = vmatpush2.msra.mxu1 %v921_v44  ;;  %1193 = vmatprep.subr.mxu0 %v1132_v45  ;;  %v1538_v44 = vld [vmem:[#allocation5 + $0xcd8] sm:$0xff]  ;;  %v1326_v45 = vld [vmem:[#allocation5 + $0xae8] sm:$0xff]  ;;  %p4197_p11 = pnand %p4196_p8, %p4703_p3  ;;  %p4204_p13 = por %p4203_p2, %p4202_p10 }
 0x148   : > { %977 = vmatprep.subr.mxu1 %v920_v46  ;;  %1194 = vmatpush2.msra.mxu0 %v1131_v47  ;;  %v1537_v46 = vld [vmem:[#allocation5 + $0xcd0] sm:$0xff]  ;;  %v1325_v47 = vld [vmem:[#allocation5 + $0xae0] sm:$0xff] }
 0x149   : > { %978 = vmatpush2.msra.mxu1 %v919_v48  ;;  %1195 = vmatprep.subr.mxu0 %v1130_v49  ;;  %v1536_v48 = vld [vmem:[#allocation5 + $0xcc8] sm:$0xff]  ;;  %v1324_v49 = vld [vmem:[#allocation5 + $0xad8] sm:$0xff]  ;;  %p4198_p7 = pneg %p4197_p11 }
 0x14a   : > { %979 = vmatprep.subr.mxu1 %v918_v50  ;;  %1196 = vmatpush2.msra.mxu0 %v1129_v51  ;;  %v1535_v50 = vld [vmem:[#allocation5 + $0xcc0] sm:$0xff]  ;;  %v1323_v51 = vld [vmem:[#allocation5 + $0xad0] sm:$0xff] }
 0x14b   : > { %980 = vmatpush2.msra.mxu1 %v917_v52  ;;  %1197 = vmatprep.subr.mxu0 %v1128_v53  ;;  %v1534_v52 = vld [vmem:[#allocation5 + $0xcb8] sm:$0xff]  ;;  %v1322_v53 = vld [vmem:[#allocation5 + $0xac8] sm:$0xff]  ;;  %p4205_p0 = pnand %p4204_p13, %p4198_p7 }
 0x14c   : > { %981 = vmatprep.subr.mxu1 %v916_v54  ;;  %1198 = vmatpush2.msra.mxu0 %v1127_v55  ;;  %v1533_v54 = vld [vmem:[#allocation5 + $0xcb0] sm:$0xff]  ;;  %v1321_v55 = vld [vmem:[#allocation5 + $0xac0] sm:$0xff] }
 0x14d   : > { %982 = vmatpush2.msra.mxu1 %v915_v56  ;;  %1199 = vmatprep.subr.mxu0 %v1126_v57  ;;  %v1532_v56 = vld [vmem:[#allocation5 + $0xca8] sm:$0xff]  ;;  %v1320_v57 = vld [vmem:[#allocation5 + $0xab8] sm:$0xff] }
 0x14e   : > { %983 = vmatprep.subr.mxu1 %v914_v58  ;;  %1200 = vmatpush2.msra.mxu0 %v1125_v59  ;;  %v1531_v58 = vld [vmem:[#allocation5 + $0xca0] sm:$0xff]  ;;  %v1319_v59 = vld [vmem:[#allocation5 + $0xab0] sm:$0xff] }
 0x14f   : > { %984 = vmatpush2.msra.mxu1 %v913_v60  ;;  %1201 = vmatprep.subr.mxu0 %v1124_v61  ;;  %v1530_v60 = vld [vmem:[#allocation5 + $0xc98] sm:$0xff]  ;;  %v1318_v61 = vld [vmem:[#allocation5 + $0xaa8] sm:$0xff] }
 0x150   : > { %985 = vmatprep.subr.mxu1 %v912_v62  ;;  %1202 = vmatpush2.msra.mxu0 %v1123_v63  ;;  %v1529_v62 = vld [vmem:[#allocation5 + $0xc90] sm:$0xff]  ;;  %v1317_v63 = vld [vmem:[#allocation5 + $0xaa0] sm:$0xff] }
 0x151   : > { %986 = vmatpush2.msra.mxu1 %v911_v3  ;;  %1203 = vmatprep.subr.mxu0 %v1122_v4  ;;  %v1528_v3 = vld [vmem:[#allocation5 + $0xc88] sm:$0xff]  ;;  %v1316_v4 = vld [vmem:[#allocation5 + $0xa98] sm:$0xff] }
 0x152   : > { %987 = vmatprep.subr.mxu1 %v910_v5  ;;  %1204 = vmatpush2.msra.mxu0 %v1121_v6  ;;  %v1527_v5 = vld [vmem:[#allocation5 + $0xc80] sm:$0xff]  ;;  %v1315_v6 = vld [vmem:[#allocation5 + $0xa90] sm:$0xff] }
 0x153   : > { %988 = vmatpush2.msra.mxu1 %v909_v7  ;;  %1205 = vmatprep.subr.mxu0 %v1120_v8  ;;  %v1526_v7 = vld [vmem:[#allocation5 + $0xc78] sm:$0xff]  ;;  %v1314_v8 = vld [vmem:[#allocation5 + $0xa88] sm:$0xff] }
 0x154   : > { %989 = vmatprep.subr.mxu1 %v908_v9  ;;  %1206 = vmatpush2.msra.mxu0 %v1119_v10  ;;  %v1525_v9 = vld [vmem:[#allocation5 + $0xc70] sm:$0xff]  ;;  %v1313_v10 = vld [vmem:[#allocation5 + $0xa80] sm:$0xff] }
 0x155   : > { %990 = vmatpush2.msra.mxu1 %v907_v11  ;;  %1207 = vmatprep.subr.mxu0 %v1118_v12  ;;  %v1524_v11 = vld [vmem:[#allocation5 + $0xc68] sm:$0xff]  ;;  %v1312_v12 = vld [vmem:[#allocation5 + $0xa78] sm:$0xff] }
 0x156   : > { %991 = vmatprep.subr.mxu1 %v906_v13  ;;  %1208 = vmatpush2.msra.mxu0 %v1117_v14  ;;  %v1523_v13 = vld [vmem:[#allocation5 + $0xc60] sm:$0xff]  ;;  %v1311_v14 = vld [vmem:[#allocation5 + $0xa70] sm:$0xff] }
 0x157   : > { %992 = vmatpush2.msra.mxu1 %v905_v15  ;;  %1209 = vmatprep.subr.mxu0 %v1116_v16  ;;  %v1522_v15 = vld [vmem:[#allocation5 + $0xc58] sm:$0xff]  ;;  %v1310_v16 = vld [vmem:[#allocation5 + $0xa68] sm:$0xff] }
 0x158   : > { %993 = vmatprep.subr.mxu1 %v904_v17  ;;  %1210 = vmatpush2.msra.mxu0 %v1115_v18  ;;  %v1521_v17 = vld [vmem:[#allocation5 + $0xc50] sm:$0xff]  ;;  %v1309_v18 = vld [vmem:[#allocation5 + $0xa60] sm:$0xff] }
 0x159   : > { %994 = vmatpush2.msra.mxu1 %v903_v19  ;;  %3512 = vmatprep.subr.msk.mxu0 %vm293_vm0, %v4437_v2  ;;  %v1520_v19 = vld [vmem:[#allocation5 + $0xc48] sm:$0xff] }
 0x15a   : > { %995 = vmatprep.subr.mxu1 %v902_v20  ;;  %v1308_v20 = vld [vmem:[#allocation5 + $0xa58] sm:$0xff] }
 0x15b   : > { %996 = vmatpush2.msra.mxu1 %v901_v21  ;;  %v1519_v21 = vld [vmem:[#allocation5 + $0xc40] sm:$0xff] }
 0x15c   : > { %3508 = vmatprep.subr.msk.mxu1 %vm293_vm0, %v4437_v2 }
 0x1d4   : > { %v499_v22 = vpop.f32.mrf.mxu1  ;;  %v785_v23 = vpop.f32.mrf.mxu0 }
 0x1d6   : > { %v501_v24 = vpop.f32.mrf.mxu1  ;;  %v787_v25 = vpop.f32.mrf.mxu0 }
 0x1d8   : > { %v573_v26 = vpop.f32.mrf.mxu1  ;;  %v1077_v27 = vpop.f32.mrf.mxu0 }
 0x1d9   : > { %v574_v28 = vadd.f32 %v573_v26, %v499_v22  ;;  %v1307_v22 = vld [vmem:[#allocation5 + $0xa50] sm:$0xff]  ;;  %v1305_v26 = vld [vmem:[#allocation5 + $0xa40] sm:$0xff] }
 0x1da   : > { %v575_v1 = vpop.f32.mrf.mxu1  ;;  %v1079_v29 = vpop.f32.mrf.mxu0 }
 0x1db   : > { %v576_v30 = vadd.f32 %v575_v1, %v501_v24  ;;  %1211 = vmatprep.mubr.f32.mxu0 %v1079_v29  ;;  %v4486_v32 = vadd.f32 %v785_v23, %v574_v28  ;;  %v1518_v23 = vld [vmem:[#allocation5 + $0xc38] sm:$0xff]  ;;  %v1306_v24 = vld [vmem:[#allocation5 + $0xa48] sm:$0xff]  ;;  %v1515_v1 = vld [vmem:[#allocation5 + $0xc20] sm:$0xff] }
 0x1dc   : > { %v863_v33 = vpop.f32.mrf.mxu1  ;;  %1212 = vmatmul.mubr.f32.vlgmr.msra.gmra.mxu0 %v1077_v27  ;;  %v1516_v27 = vld [vmem:[#allocation5 + $0xc28] sm:$0xff]  ;;  %v1304_v28 = vld [vmem:[#allocation5 + $0xa38] sm:$0xff]  ;;  %v1303_v29 = vld [vmem:[#allocation5 + $0xa30] sm:$0xff] }
 0x1dd   : > { %3513 = vmatpush1.msk.msra.mxu0 %vm293_vm0, %v4489_v34  ;;  %1503 = vmatprep.mubr.f32.mxu0 %v4269_v0  ;;  %v4497_v36 = vadd.f32 %v787_v25, %v576_v30  ;;  %v1517_v25 = vld [vmem:[#allocation5 + $0xc30] sm:$0xff]  ;;  %v1514_v30 = vld [vmem:[#allocation5 + $0xc18] sm:$0xff] }
 0x1de   : > { %v865_v37 = vpop.f32.mrf.mxu1  ;;  %1575 = vmatprep.subr.mxu0 %v1542_v31  ;;  %v1302_v31 = vld [vmem:[#allocation5 + $0xa28] sm:$0xff] }
 0x1df   : > { %997 = vmatprep.mubr.f32.mxu1 %v865_v37  ;;  %v1512_v37 = vld [vmem:[#allocation5 + $0xc08] sm:$0xff] }
 0x1e0   : > { %998 = vmatmul.mubr.f32.vlgmr.msra.gmra.mxu1 %v863_v33  ;;  %3514 = vmatmul.mubr.msk.f32.vlgmr.msra.gmra.mxu0 %vm289_vm1, %v3511_v35  ;;  %v1513_v33 = vld [vmem:[#allocation5 + $0xc10] sm:$0xff]  ;;  %v1301_v35 = vld [vmem:[#allocation5 + $0xa20] sm:$0xff] }
 0x1e1   : > { %3509 = vmatpush1.msk.msra.mxu1 %vm293_vm0, %v4489_v34  ;;  %1289 = vmatprep.mubr.f32.mxu1 %v4269_v0 }
 0x1e2   : > { %1576 = vmatpush1.msra.mxu0 %v1541_v38  ;;  %1361 = vmatprep.subr.mxu1 %v1328_v39  ;;  %v1300_v38 = vld [vmem:[#allocation5 + $0xa18] sm:$0xff]  ;;  %v1511_v39 = vld [vmem:[#allocation5 + $0xc00] sm:$0xff] }
 0x1e3   : > { %1577 = vmatprep.subr.mxu0 %v1540_v40  ;;  %v1299_v40 = vld [vmem:[#allocation5 + $0xa10] sm:$0xff] }
 0x1e4   : > { %3510 = vmatmul.mubr.msk.f32.vlgmr.msra.gmra.mxu1 %vm289_vm1, %v3507_v41  ;;  %1578 = vmatpush1.msra.mxu0 %v1539_v42  ;;  %v1574_v41 = vld [vmem:[#allocation5 + $0xdf8] sm:$0xff]  ;;  %v1298_v42 = vld [vmem:[#allocation5 + $0xa08] sm:$0xff] }
 0x1e5   : > { %1362 = vmatpush1.msra.mxu1 %v1327_v43  ;;  %1579 = vmatprep.subr.mxu0 %v1538_v44  ;;  %v1573_v43 = vld [vmem:[#allocation5 + $0xdf0] sm:$0xff]  ;;  %v1297_v44 = vld [vmem:[#allocation5 + $0xa00] sm:$0xff] }
 0x1e6   : > { %1363 = vmatprep.subr.mxu1 %v1326_v45  ;;  %1580 = vmatpush1.msra.mxu0 %v1537_v46  ;;  %v1572_v45 = vld [vmem:[#allocation5 + $0xde8] sm:$0xff]  ;;  %v1360_v46 = vld [vmem:[#allocation5 + $0xbf8] sm:$0xff] }
 0x1e7   : > { %1364 = vmatpush1.msra.mxu1 %v1325_v47  ;;  %1581 = vmatprep.subr.mxu0 %v1536_v48  ;;  %v1571_v47 = vld [vmem:[#allocation5 + $0xde0] sm:$0xff]  ;;  %v1359_v48 = vld [vmem:[#allocation5 + $0xbf0] sm:$0xff] }
 0x1e8   : > { %1365 = vmatprep.subr.mxu1 %v1324_v49  ;;  %1582 = vmatpush1.msra.mxu0 %v1535_v50  ;;  %v1570_v49 = vld [vmem:[#allocation5 + $0xdd8] sm:$0xff]  ;;  %v1358_v50 = vld [vmem:[#allocation5 + $0xbe8] sm:$0xff] }
 0x1e9   : > { %1366 = vmatpush1.msra.mxu1 %v1323_v51  ;;  %1583 = vmatprep.subr.mxu0 %v1534_v52  ;;  %v1569_v51 = vld [vmem:[#allocation5 + $0xdd0] sm:$0xff]  ;;  %v1357_v52 = vld [vmem:[#allocation5 + $0xbe0] sm:$0xff] }
 0x1ea   : > { %1367 = vmatprep.subr.mxu1 %v1322_v53  ;;  %1584 = vmatpush1.msra.mxu0 %v1533_v54  ;;  %v1568_v53 = vld [vmem:[#allocation5 + $0xdc8] sm:$0xff]  ;;  %v1356_v54 = vld [vmem:[#allocation5 + $0xbd8] sm:$0xff] }
 0x1eb   : > { %1368 = vmatpush1.msra.mxu1 %v1321_v55  ;;  %1585 = vmatprep.subr.mxu0 %v1532_v56  ;;  %v1567_v55 = vld [vmem:[#allocation5 + $0xdc0] sm:$0xff]  ;;  %v1355_v56 = vld [vmem:[#allocation5 + $0xbd0] sm:$0xff] }
 0x1ec   : > { %1369 = vmatprep.subr.mxu1 %v1320_v57  ;;  %1586 = vmatpush1.msra.mxu0 %v1531_v58  ;;  %v1566_v57 = vld [vmem:[#allocation5 + $0xdb8] sm:$0xff]  ;;  %v1354_v58 = vld [vmem:[#allocation5 + $0xbc8] sm:$0xff] }
 0x1ed   : > { %1370 = vmatpush1.msra.mxu1 %v1319_v59  ;;  %1587 = vmatprep.subr.mxu0 %v1530_v60  ;;  %v1565_v59 = vld [vmem:[#allocation5 + $0xdb0] sm:$0xff]  ;;  %v1353_v60 = vld [vmem:[#allocation5 + $0xbc0] sm:$0xff] }
 0x1ee   : > { %1371 = vmatprep.subr.mxu1 %v1318_v61  ;;  %1588 = vmatpush1.msra.mxu0 %v1529_v62  ;;  %v1564_v61 = vld [vmem:[#allocation5 + $0xda8] sm:$0xff]  ;;  %v1352_v62 = vld [vmem:[#allocation5 + $0xbb8] sm:$0xff] }
 0x1ef   : > { %1372 = vmatpush1.msra.mxu1 %v1317_v63  ;;  %1589 = vmatprep.subr.mxu0 %v1528_v3  ;;  %v1563_v63 = vld [vmem:[#allocation5 + $0xda0] sm:$0xff]  ;;  %v1351_v3 = vld [vmem:[#allocation5 + $0xbb0] sm:$0xff] }
 0x1f0   : > { %1373 = vmatprep.subr.mxu1 %v1316_v4  ;;  %1590 = vmatpush1.msra.mxu0 %v1527_v5  ;;  %v1562_v4 = vld [vmem:[#allocation5 + $0xd98] sm:$0xff]  ;;  %v1350_v5 = vld [vmem:[#allocation5 + $0xba8] sm:$0xff] }
 0x1f1   : > { %1374 = vmatpush1.msra.mxu1 %v1315_v6  ;;  %1591 = vmatprep.subr.mxu0 %v1526_v7  ;;  %v1561_v6 = vld [vmem:[#allocation5 + $0xd90] sm:$0xff]  ;;  %v1349_v7 = vld [vmem:[#allocation5 + $0xba0] sm:$0xff] }
 0x1f2   : > { %1375 = vmatprep.subr.mxu1 %v1314_v8  ;;  %1592 = vmatpush1.msra.mxu0 %v1525_v9  ;;  %v1560_v8 = vld [vmem:[#allocation5 + $0xd88] sm:$0xff]  ;;  %v1348_v9 = vld [vmem:[#allocation5 + $0xb98] sm:$0xff] }
 0x1f3   : > { %1376 = vmatpush1.msra.mxu1 %v1313_v10  ;;  %1593 = vmatprep.subr.mxu0 %v1524_v11  ;;  %v1559_v10 = vld [vmem:[#allocation5 + $0xd80] sm:$0xff]  ;;  %v1347_v11 = vld [vmem:[#allocation5 + $0xb90] sm:$0xff] }
 0x1f4   : > { %1377 = vmatprep.subr.mxu1 %v1312_v12  ;;  %1594 = vmatpush1.msra.mxu0 %v1523_v13  ;;  %v1558_v12 = vld [vmem:[#allocation5 + $0xd78] sm:$0xff]  ;;  %v1346_v13 = vld [vmem:[#allocation5 + $0xb88] sm:$0xff] }
 0x1f5   : > { %1378 = vmatpush1.msra.mxu1 %v1311_v14  ;;  %1595 = vmatprep.subr.mxu0 %v1522_v15  ;;  %v1557_v14 = vld [vmem:[#allocation5 + $0xd70] sm:$0xff]  ;;  %v1345_v15 = vld [vmem:[#allocation5 + $0xb80] sm:$0xff] }
 0x1f6   : > { %1379 = vmatprep.subr.mxu1 %v1310_v16  ;;  %1596 = vmatpush1.msra.mxu0 %v1521_v17  ;;  %v1556_v16 = vld [vmem:[#allocation5 + $0xd68] sm:$0xff]  ;;  %v1344_v17 = vld [vmem:[#allocation5 + $0xb78] sm:$0xff] }
 0x1f7   : > { %1380 = vmatpush1.msra.mxu1 %v1309_v18  ;;  %1597 = vmatprep.subr.mxu0 %v1520_v19  ;;  %v1555_v18 = vld [vmem:[#allocation5 + $0xd60] sm:$0xff]  ;;  %v1343_v19 = vld [vmem:[#allocation5 + $0xb70] sm:$0xff] }
 0x1f8   : > { %1381 = vmatprep.subr.mxu1 %v1308_v20  ;;  %1598 = vmatpush1.msra.mxu0 %v1519_v21  ;;  %v1554_v20 = vld [vmem:[#allocation5 + $0xd58] sm:$0xff]  ;;  %v1342_v21 = vld [vmem:[#allocation5 + $0xb68] sm:$0xff] }
 0x1f9   : > { %1382 = vmatpush1.msra.mxu1 %v1307_v22  ;;  %1599 = vmatprep.subr.mxu0 %v1518_v23  ;;  %v1553_v22 = vld [vmem:[#allocation5 + $0xd50] sm:$0xff]  ;;  %v1341_v23 = vld [vmem:[#allocation5 + $0xb60] sm:$0xff] }
 0x1fa   : > { %1383 = vmatprep.subr.mxu1 %v1306_v24  ;;  %1600 = vmatpush1.msra.mxu0 %v1517_v25  ;;  %v1552_v24 = vld [vmem:[#allocation5 + $0xd48] sm:$0xff]  ;;  %v1340_v25 = vld [vmem:[#allocation5 + $0xb58] sm:$0xff] }
 0x1fb   : > { %1384 = vmatpush1.msra.mxu1 %v1305_v26  ;;  %1601 = vmatprep.subr.mxu0 %v1516_v27  ;;  %v1551_v26 = vld [vmem:[#allocation5 + $0xd40] sm:$0xff]  ;;  %v1339_v27 = vld [vmem:[#allocation5 + $0xb50] sm:$0xff] }
 0x1fc   : > { %1385 = vmatprep.subr.mxu1 %v1304_v28  ;;  %1602 = vmatpush1.msra.mxu0 %v1515_v1  ;;  %v1550_v28 = vld [vmem:[#allocation5 + $0xd38] sm:$0xff]  ;;  %v1338_v1 = vld [vmem:[#allocation5 + $0xb48] sm:$0xff] }
 0x1fd   : > { %1386 = vmatpush1.msra.mxu1 %v1303_v29  ;;  %1603 = vmatprep.subr.mxu0 %v1514_v30  ;;  %v1549_v29 = vld [vmem:[#allocation5 + $0xd30] sm:$0xff]  ;;  %v1337_v30 = vld [vmem:[#allocation5 + $0xb40] sm:$0xff] }
 0x1fe   : > { %1387 = vmatprep.subr.mxu1 %v1302_v31  ;;  %1604 = vmatpush1.msra.mxu0 %v1513_v33  ;;  %v1548_v31 = vld [vmem:[#allocation5 + $0xd28] sm:$0xff]  ;;  %v1336_v33 = vld [vmem:[#allocation5 + $0xb38] sm:$0xff] }
 0x1ff   : > { %1388 = vmatpush1.msra.mxu1 %v1301_v35  ;;  %1605 = vmatprep.subr.mxu0 %v1512_v37  ;;  %v1547_v35 = vld [vmem:[#allocation5 + $0xd20] sm:$0xff]  ;;  %v1335_v37 = vld [vmem:[#allocation5 + $0xb30] sm:$0xff] }
 0x200   : > { %1389 = vmatprep.subr.mxu1 %v1300_v38  ;;  %1606 = vmatpush1.msra.mxu0 %v1511_v39  ;;  %v1546_v38 = vld [vmem:[#allocation5 + $0xd18] sm:$0xff]  ;;  %v1334_v39 = vld [vmem:[#allocation5 + $0xb28] sm:$0xff] }
 0x201   : > { %1390 = vmatpush1.msra.mxu1 %v1299_v40  ;;  %1607 = vmatprep.subr.mxu0 %v1574_v41  ;;  %v1545_v40 = vld [vmem:[#allocation5 + $0xd10] sm:$0xff]  ;;  %v1333_v41 = vld [vmem:[#allocation5 + $0xb20] sm:$0xff] }
 0x202   : > { %1391 = vmatprep.subr.mxu1 %v1298_v42  ;;  %1608 = vmatpush2.msra.mxu0 %v1573_v43  ;;  %v1544_v42 = vld [vmem:[#allocation5 + $0xd08] sm:$0xff]  ;;  %v1332_v43 = vld [vmem:[#allocation5 + $0xb18] sm:$0xff] }
 0x203   : > { %1392 = vmatpush1.msra.mxu1 %v1297_v44  ;;  %1609 = vmatprep.subr.mxu0 %v1572_v45  ;;  %v1543_v44 = vld [vmem:[#allocation5 + $0xd00] sm:$0xff]  ;;  %v1331_v45 = vld [vmem:[#allocation5 + $0xb10] sm:$0xff] }
 0x204   : > { %1393 = vmatprep.subr.mxu1 %v1360_v46  ;;  %1610 = vmatpush2.msra.mxu0 %v1571_v47  ;;  %v1330_v46 = vld [vmem:[#allocation5 + $0xb08] sm:$0xff]  ;;  %v1329_v47 = vld [vmem:[#allocation5 + $0xb00] sm:$0xff] }
 0x205   : > { %1394 = vmatpush2.msra.mxu1 %v1359_v48  ;;  %1611 = vmatprep.subr.mxu0 %v1570_v49 }
 0x206   : > { %1395 = vmatprep.subr.mxu1 %v1358_v50  ;;  %1612 = vmatpush2.msra.mxu0 %v1569_v51 }
 0x207   : > { %1396 = vmatpush2.msra.mxu1 %v1357_v52  ;;  %1613 = vmatprep.subr.mxu0 %v1568_v53 }
 0x208   : > { %1397 = vmatprep.subr.mxu1 %v1356_v54  ;;  %1614 = vmatpush2.msra.mxu0 %v1567_v55 }
 0x209   : > { %1398 = vmatpush2.msra.mxu1 %v1355_v56  ;;  %1615 = vmatprep.subr.mxu0 %v1566_v57  ;;  %v1970_v56 = vld [vmem:[#allocation5 + $0x10f8] sm:$0xff] }
 0x20a   : > { %1399 = vmatprep.subr.mxu1 %v1354_v58  ;;  %1616 = vmatpush2.msra.mxu0 %v1565_v59 }
 0x20b   : > { %1400 = vmatpush2.msra.mxu1 %v1353_v60  ;;  %1617 = vmatprep.subr.mxu0 %v1564_v61  ;;  %v1756_v60 = vld [vmem:[#allocation5 + $0xef8] sm:$0xff]  ;;  %v1968_v61 = vld [vmem:[#allocation5 + $0x10e8] sm:$0xff] }
 0x20c   : > { %1401 = vmatprep.subr.mxu1 %v1352_v62  ;;  %1618 = vmatpush2.msra.mxu0 %v1563_v63  ;;  %v3515_v62 = vld [vmem:[%s4680_s1 + $0xe] sm:$0x3]  ;;  %v1967_v63 = vld [vmem:[#allocation5 + $0x10e0] sm:$0xff] }
 0x20d   : > { %1402 = vmatpush2.msra.mxu1 %v1351_v3  ;;  %1619 = vmatprep.subr.mxu0 %v1562_v4  ;;  %v1755_v3 = vld [vmem:[#allocation5 + $0xef0] sm:$0xff]  ;;  %v1966_v4 = vld [vmem:[#allocation5 + $0x10d8] sm:$0xff] }
 0x20e   : > { %1403 = vmatprep.subr.mxu1 %v1350_v5  ;;  %1620 = vmatpush2.msra.mxu0 %v1561_v6  ;;  %v1754_v5 = vld [vmem:[#allocation5 + $0xee8] sm:$0xff]  ;;  %v1965_v6 = vld [vmem:[#allocation5 + $0x10d0] sm:$0xff] }
 0x20f   : > { %1404 = vmatpush2.msra.mxu1 %v1349_v7  ;;  %1621 = vmatprep.subr.mxu0 %v1560_v8  ;;  %v1753_v7 = vld [vmem:[#allocation5 + $0xee0] sm:$0xff]  ;;  %v1964_v8 = vld [vmem:[#allocation5 + $0x10c8] sm:$0xff] }
 0x210   : > { %1405 = vmatprep.subr.mxu1 %v1348_v9  ;;  %1622 = vmatpush2.msra.mxu0 %v1559_v10  ;;  %v1963_v9 = vld [vmem:[#allocation5 + $0x10c0] sm:$0xff]  ;;  %v1751_v10 = vld [vmem:[#allocation5 + $0xed0] sm:$0xff] }
 0x211   : > { %1406 = vmatpush2.msra.mxu1 %v1347_v11  ;;  %1623 = vmatprep.subr.mxu0 %v1558_v12  ;;  %v1962_v11 = vld [vmem:[#allocation5 + $0x10b8] sm:$0xff]  ;;  %v1750_v12 = vld [vmem:[#allocation5 + $0xec8] sm:$0xff] }
 0x212   : > { %1407 = vmatprep.subr.mxu1 %v1346_v13  ;;  %1624 = vmatpush2.msra.mxu0 %v1557_v14  ;;  %v1961_v13 = vld [vmem:[#allocation5 + $0x10b0] sm:$0xff]  ;;  %v1749_v14 = vld [vmem:[#allocation5 + $0xec0] sm:$0xff] }
 0x213   : > { %1408 = vmatpush2.msra.mxu1 %v1345_v15  ;;  %1625 = vmatprep.subr.mxu0 %v1556_v16  ;;  %v1960_v15 = vld [vmem:[#allocation5 + $0x10a8] sm:$0xff]  ;;  %v1748_v16 = vld [vmem:[#allocation5 + $0xeb8] sm:$0xff] }
 0x214   : > { %1409 = vmatprep.subr.mxu1 %v1344_v17  ;;  %1626 = vmatpush2.msra.mxu0 %v1555_v18  ;;  %v1959_v17 = vld [vmem:[#allocation5 + $0x10a0] sm:$0xff]  ;;  %v1747_v18 = vld [vmem:[#allocation5 + $0xeb0] sm:$0xff] }
 0x215   : > { %1410 = vmatpush2.msra.mxu1 %v1343_v19  ;;  %1627 = vmatprep.subr.mxu0 %v1554_v20  ;;  %v1958_v19 = vld [vmem:[#allocation5 + $0x1098] sm:$0xff]  ;;  %v1746_v20 = vld [vmem:[#allocation5 + $0xea8] sm:$0xff] }
 0x216   : > { %1411 = vmatprep.subr.mxu1 %v1342_v21  ;;  %1628 = vmatpush2.msra.mxu0 %v1553_v22  ;;  %v1957_v21 = vld [vmem:[#allocation5 + $0x1090] sm:$0xff]  ;;  %v1745_v22 = vld [vmem:[#allocation5 + $0xea0] sm:$0xff] }
 0x217   : > { %1412 = vmatpush2.msra.mxu1 %v1341_v23  ;;  %1629 = vmatprep.subr.mxu0 %v1552_v24  ;;  %v1956_v23 = vld [vmem:[#allocation5 + $0x1088] sm:$0xff]  ;;  %v1744_v24 = vld [vmem:[#allocation5 + $0xe98] sm:$0xff] }
 0x218   : > { %1413 = vmatprep.subr.mxu1 %v1340_v25  ;;  %1630 = vmatpush2.msra.mxu0 %v1551_v26  ;;  %v1955_v25 = vld [vmem:[#allocation5 + $0x1080] sm:$0xff]  ;;  %v1743_v26 = vld [vmem:[#allocation5 + $0xe90] sm:$0xff] }
 0x219   : > { %1414 = vmatpush2.msra.mxu1 %v1339_v27  ;;  %1631 = vmatprep.subr.mxu0 %v1550_v28  ;;  %v1954_v27 = vld [vmem:[#allocation5 + $0x1078] sm:$0xff]  ;;  %v1742_v28 = vld [vmem:[#allocation5 + $0xe88] sm:$0xff] }
 0x21a   : > { %1415 = vmatprep.subr.mxu1 %v1338_v1  ;;  %1632 = vmatpush2.msra.mxu0 %v1549_v29  ;;  %v1953_v1 = vld [vmem:[#allocation5 + $0x1070] sm:$0xff]  ;;  %v1741_v29 = vld [vmem:[#allocation5 + $0xe80] sm:$0xff] }
 0x21b   : > { %1416 = vmatpush2.msra.mxu1 %v1337_v30  ;;  %1633 = vmatprep.subr.mxu0 %v1548_v31  ;;  %v1952_v30 = vld [vmem:[#allocation5 + $0x1068] sm:$0xff]  ;;  %v1740_v31 = vld [vmem:[#allocation5 + $0xe78] sm:$0xff] }
 0x21c   : > { %1417 = vmatprep.subr.mxu1 %v1336_v33  ;;  %1634 = vmatpush2.msra.mxu0 %v1547_v35  ;;  %v1951_v33 = vld [vmem:[#allocation5 + $0x1060] sm:$0xff]  ;;  %v1739_v35 = vld [vmem:[#allocation5 + $0xe70] sm:$0xff] }
 0x21d   : > { %1418 = vmatpush2.msra.mxu1 %v1335_v37  ;;  %1635 = vmatprep.subr.mxu0 %v1546_v38  ;;  %v1950_v37 = vld [vmem:[#allocation5 + $0x1058] sm:$0xff]  ;;  %v1738_v38 = vld [vmem:[#allocation5 + $0xe68] sm:$0xff] }
 0x21e   : > { %1419 = vmatprep.subr.mxu1 %v1334_v39  ;;  %1636 = vmatpush2.msra.mxu0 %v1545_v40  ;;  %v1949_v39 = vld [vmem:[#allocation5 + $0x1050] sm:$0xff]  ;;  %v1737_v40 = vld [vmem:[#allocation5 + $0xe60] sm:$0xff] }
 0x21f   : > { %1420 = vmatpush2.msra.mxu1 %v1333_v41  ;;  %1637 = vmatprep.subr.mxu0 %v1544_v42  ;;  %v1948_v41 = vld [vmem:[#allocation5 + $0x1048] sm:$0xff]  ;;  %v1736_v42 = vld [vmem:[#allocation5 + $0xe58] sm:$0xff] }
 0x220   : > { %1421 = vmatprep.subr.mxu1 %v1332_v43  ;;  %1638 = vmatpush2.msra.mxu0 %v1543_v44  ;;  %v1947_v43 = vld [vmem:[#allocation5 + $0x1040] sm:$0xff]  ;;  %v1735_v44 = vld [vmem:[#allocation5 + $0xe50] sm:$0xff] }
 0x221   : > { %1422 = vmatpush2.msra.mxu1 %v1331_v45  ;;  %3520 = vmatprep.subr.msk.mxu0 %vm293_vm0, %v4437_v2  ;;  %v1946_v45 = vld [vmem:[#allocation5 + $0x1038] sm:$0xff] }
 0x222   : > { %1423 = vmatprep.subr.mxu1 %v1330_v46  ;;  %v1734_v46 = vld [vmem:[#allocation5 + $0xe48] sm:$0xff] }
 0x223   : > { %1424 = vmatpush2.msra.mxu1 %v1329_v47  ;;  %v1945_v47 = vld [vmem:[#allocation5 + $0x1030] sm:$0xff] }
 0x224   : > { %3516 = vmatprep.subr.msk.mxu1 %vm293_vm0, %v4437_v2  ;;  %v3519_v2 = vld [vmem:[%s4680_s1 + $0x10] sm:$0x3] }
 0x29c   : > { %v1213_v48 = vpop.f32.mrf.mxu0 }
 0x29e   : > { %v1215_v49 = vpop.f32.mrf.mxu0 }
 0x2a0   : > { %v999_v50 = vpop.f32.mrf.mxu1  ;;  %v1505_v51 = vpop.f32.mrf.mxu0 }
 0x2a1   : > { %v1004_v52 = vadd.f32 %v999_v50, %v4486_v32  ;;  %v1732_v50 = vld [vmem:[#allocation5 + $0xe38] sm:$0xff] }
 0x2a2   : > { %v1001_v53 = vpop.f32.mrf.mxu1  ;;  %v1507_v54 = vpop.f32.mrf.mxu0 }
 0x2a3   : > { %v1005_v55 = vadd.f32 %v1001_v53, %v4497_v36  ;;  %1639 = vmatprep.mubr.f32.mxu0 %v1507_v54  ;;  %v4513_v57 = vadd.f32 %v1213_v48, %v1004_v52  ;;  %v1969_v36 = vld [vmem:[#allocation5 + $0x10f0] sm:$0xff]  ;;  %v1733_v48 = vld [vmem:[#allocation5 + $0xe40] sm:$0xff]  ;;  %v1942_v53 = vld [vmem:[#allocation5 + $0x1018] sm:$0xff] }
 0x2a4   : > { %v1291_v58 = vpop.f32.mrf.mxu1  ;;  %1640 = vmatmul.mubr.f32.vlgmr.msra.gmra.mxu0 %v1505_v51  ;;  %v1943_v51 = vld [vmem:[#allocation5 + $0x1020] sm:$0xff]  ;;  %v1731_v52 = vld [vmem:[#allocation5 + $0xe30] sm:$0xff]  ;;  %v1730_v54 = vld [vmem:[#allocation5 + $0xe28] sm:$0xff] }
 0x2a5   : > { %3521 = vmatpush1.msk.msra.mxu0 %vm293_vm0, %v4489_v34  ;;  %1931 = vmatprep.mubr.f32.mxu0 %v4269_v0  ;;  %v4521_v32 = vadd.f32 %v1215_v49, %v1005_v55  ;;  %v1944_v49 = vld [vmem:[#allocation5 + $0x1028] sm:$0xff]  ;;  %v1941_v55 = vld [vmem:[#allocation5 + $0x1010] sm:$0xff] }
 0x2a6   : > { %v1293_v59 = vpop.f32.mrf.mxu1  ;;  %2003 = vmatprep.subr.mxu0 %v1970_v56  ;;  %v1729_v56 = vld [vmem:[#allocation5 + $0xe20] sm:$0xff] }
 0x2a7   : > { %1425 = vmatprep.mubr.f32.mxu1 %v1293_v59  ;;  %v1939_v59 = vld [vmem:[#allocation5 + $0x1000] sm:$0xff] }
 0x2a8   : > { %1426 = vmatmul.mubr.f32.vlgmr.msra.gmra.mxu1 %v1291_v58  ;;  %3522 = vmatmul.mubr.msk.f32.vlgmr.msra.gmra.mxu0 %vm289_vm1, %v3519_v2  ;;  %v1940_v58 = vld [vmem:[#allocation5 + $0x1008] sm:$0xff]  ;;  %v1728_v2 = vld [vmem:[#allocation5 + $0xe18] sm:$0xff] }
 0x2a9   : > { %3517 = vmatpush1.msk.msra.mxu1 %vm293_vm0, %v4489_v34  ;;  %1717 = vmatprep.mubr.f32.mxu1 %v4269_v0  ;;  %v1752_v34 = vld [vmem:[#allocation5 + $0xed8] sm:$0xff] }
 0x2aa   : > { %2004 = vmatpush1.msra.mxu0 %v1969_v36  ;;  %1789 = vmatprep.subr.mxu1 %v1756_v60  ;;  %v1727_v36 = vld [vmem:[#allocation5 + $0xe10] sm:$0xff]  ;;  %v2002_v60 = vld [vmem:[#allocation5 + $0x11f8] sm:$0xff] }
 0x2ab   : > { %2005 = vmatprep.subr.mxu0 %v1968_v61  ;;  %v1726_v61 = vld [vmem:[#allocation5 + $0xe08] sm:$0xff] }
 0x2ac   : > { %3518 = vmatmul.mubr.msk.f32.vlgmr.msra.gmra.mxu1 %vm289_vm1, %v3515_v62  ;;  %2006 = vmatpush1.msra.mxu0 %v1967_v63  ;;  %v2001_v62 = vld [vmem:[#allocation5 + $0x11f0] sm:$0xff]  ;;  %v1725_v63 = vld [vmem:[#allocation5 + $0xe00] sm:$0xff] }
 0x2ad   : > { %1790 = vmatpush1.msra.mxu1 %v1755_v3  ;;  %2007 = vmatprep.subr.mxu0 %v1966_v4  ;;  %v2000_v3 = vld [vmem:[#allocation5 + $0x11e8] sm:$0xff]  ;;  %v1788_v4 = vld [vmem:[#allocation5 + $0xff8] sm:$0xff] }
 0x2ae   : > { %1791 = vmatprep.subr.mxu1 %v1754_v5  ;;  %2008 = vmatpush1.msra.mxu0 %v1965_v6  ;;  %v1999_v5 = vld [vmem:[#allocation5 + $0x11e0] sm:$0xff]  ;;  %v1787_v6 = vld [vmem:[#allocation5 + $0xff0] sm:$0xff] }
 0x2af   : > { %1792 = vmatpush1.msra.mxu1 %v1753_v7  ;;  %2009 = vmatprep.subr.mxu0 %v1964_v8  ;;  %v1998_v7 = vld [vmem:[#allocation5 + $0x11d8] sm:$0xff]  ;;  %v1786_v8 = vld [vmem:[#allocation5 + $0xfe8] sm:$0xff] }
 0x2b0   : > { %1793 = vmatprep.subr.mxu1 %v1752_v34  ;;  %2010 = vmatpush1.msra.mxu0 %v1963_v9  ;;  %v1997_v34 = vld [vmem:[#allocation5 + $0x11d0] sm:$0xff]  ;;  %v1785_v9 = vld [vmem:[#allocation5 + $0xfe0] sm:$0xff] }
 0x2b1   : > { %1794 = vmatpush1.msra.mxu1 %v1751_v10  ;;  %2011 = vmatprep.subr.mxu0 %v1962_v11  ;;  %v1996_v10 = vld [vmem:[#allocation5 + $0x11c8] sm:$0xff]  ;;  %v1784_v11 = vld [vmem:[#allocation5 + $0xfd8] sm:$0xff] }
 0x2b2   : > { %1795 = vmatprep.subr.mxu1 %v1750_v12  ;;  %2012 = vmatpush1.msra.mxu0 %v1961_v13  ;;  %v1995_v12 = vld [vmem:[#allocation5 + $0x11c0] sm:$0xff]  ;;  %v1783_v13 = vld [vmem:[#allocation5 + $0xfd0] sm:$0xff] }
 0x2b3   : > { %1796 = vmatpush1.msra.mxu1 %v1749_v14  ;;  %2013 = vmatprep.subr.mxu0 %v1960_v15  ;;  %v1994_v14 = vld [vmem:[#allocation5 + $0x11b8] sm:$0xff]  ;;  %v1782_v15 = vld [vmem:[#allocation5 + $0xfc8] sm:$0xff] }
 0x2b4   : > { %1797 = vmatprep.subr.mxu1 %v1748_v16  ;;  %2014 = vmatpush1.msra.mxu0 %v1959_v17  ;;  %v1993_v16 = vld [vmem:[#allocation5 + $0x11b0] sm:$0xff]  ;;  %v1781_v17 = vld [vmem:[#allocation5 + $0xfc0] sm:$0xff] }
 0x2b5   : > { %1798 = vmatpush1.msra.mxu1 %v1747_v18  ;;  %2015 = vmatprep.subr.mxu0 %v1958_v19  ;;  %v1992_v18 = vld [vmem:[#allocation5 + $0x11a8] sm:$0xff]  ;;  %v1780_v19 = vld [vmem:[#allocation5 + $0xfb8] sm:$0xff] }
 0x2b6   : > { %1799 = vmatprep.subr.mxu1 %v1746_v20  ;;  %2016 = vmatpush1.msra.mxu0 %v1957_v21  ;;  %v1991_v20 = vld [vmem:[#allocation5 + $0x11a0] sm:$0xff]  ;;  %v1779_v21 = vld [vmem:[#allocation5 + $0xfb0] sm:$0xff] }
 0x2b7   : > { %1800 = vmatpush1.msra.mxu1 %v1745_v22  ;;  %2017 = vmatprep.subr.mxu0 %v1956_v23  ;;  %v1990_v22 = vld [vmem:[#allocation5 + $0x1198] sm:$0xff]  ;;  %v1778_v23 = vld [vmem:[#allocation5 + $0xfa8] sm:$0xff] }
 0x2b8   : > { %1801 = vmatprep.subr.mxu1 %v1744_v24  ;;  %2018 = vmatpush1.msra.mxu0 %v1955_v25  ;;  %v1989_v24 = vld [vmem:[#allocation5 + $0x1190] sm:$0xff]  ;;  %v1777_v25 = vld [vmem:[#allocation5 + $0xfa0] sm:$0xff] }
 0x2b9   : > { %1802 = vmatpush1.msra.mxu1 %v1743_v26  ;;  %2019 = vmatprep.subr.mxu0 %v1954_v27  ;;  %v1988_v26 = vld [vmem:[#allocation5 + $0x1188] sm:$0xff]  ;;  %v1776_v27 = vld [vmem:[#allocation5 + $0xf98] sm:$0xff] }
 0x2ba   : > { %1803 = vmatprep.subr.mxu1 %v1742_v28  ;;  %2020 = vmatpush1.msra.mxu0 %v1953_v1  ;;  %v1987_v28 = vld [vmem:[#allocation5 + $0x1180] sm:$0xff]  ;;  %v1775_v1 = vld [vmem:[#allocation5 + $0xf90] sm:$0xff] }
 0x2bb   : > { %1804 = vmatpush1.msra.mxu1 %v1741_v29  ;;  %2021 = vmatprep.subr.mxu0 %v1952_v30  ;;  %v1986_v29 = vld [vmem:[#allocation5 + $0x1178] sm:$0xff]  ;;  %v1774_v30 = vld [vmem:[#allocation5 + $0xf88] sm:$0xff] }
 0x2bc   : > { %1805 = vmatprep.subr.mxu1 %v1740_v31  ;;  %2022 = vmatpush1.msra.mxu0 %v1951_v33  ;;  %v1985_v31 = vld [vmem:[#allocation5 + $0x1170] sm:$0xff]  ;;  %v1773_v33 = vld [vmem:[#allocation5 + $0xf80] sm:$0xff] }
 0x2bd   : > { %1806 = vmatpush1.msra.mxu1 %v1739_v35  ;;  %2023 = vmatprep.subr.mxu0 %v1950_v37  ;;  %v1984_v35 = vld [vmem:[#allocation5 + $0x1168] sm:$0xff]  ;;  %v1772_v37 = vld [vmem:[#allocation5 + $0xf78] sm:$0xff] }
 0x2be   : > { %1807 = vmatprep.subr.mxu1 %v1738_v38  ;;  %2024 = vmatpush1.msra.mxu0 %v1949_v39  ;;  %v1983_v38 = vld [vmem:[#allocation5 + $0x1160] sm:$0xff]  ;;  %v1771_v39 = vld [vmem:[#allocation5 + $0xf70] sm:$0xff] }
 0x2bf   : > { %1808 = vmatpush1.msra.mxu1 %v1737_v40  ;;  %2025 = vmatprep.subr.mxu0 %v1948_v41  ;;  %v1982_v40 = vld [vmem:[#allocation5 + $0x1158] sm:$0xff]  ;;  %v1770_v41 = vld [vmem:[#allocation5 + $0xf68] sm:$0xff] }
 0x2c0   : > { %1809 = vmatprep.subr.mxu1 %v1736_v42  ;;  %2026 = vmatpush1.msra.mxu0 %v1947_v43  ;;  %v1981_v42 = vld [vmem:[#allocation5 + $0x1150] sm:$0xff]  ;;  %v1769_v43 = vld [vmem:[#allocation5 + $0xf60] sm:$0xff] }
 0x2c1   : > { %1810 = vmatpush1.msra.mxu1 %v1735_v44  ;;  %2027 = vmatprep.subr.mxu0 %v1946_v45  ;;  %v1980_v44 = vld [vmem:[#allocation5 + $0x1148] sm:$0xff]  ;;  %v1768_v45 = vld [vmem:[#allocation5 + $0xf58] sm:$0xff] }
 0x2c2   : > { %1811 = vmatprep.subr.mxu1 %v1734_v46  ;;  %2028 = vmatpush1.msra.mxu0 %v1945_v47  ;;  %v1979_v46 = vld [vmem:[#allocation5 + $0x1140] sm:$0xff]  ;;  %v1767_v47 = vld [vmem:[#allocation5 + $0xf50] sm:$0xff] }
 0x2c3   : > { %1812 = vmatpush1.msra.mxu1 %v1733_v48  ;;  %2029 = vmatprep.subr.mxu0 %v1944_v49  ;;  %v1978_v48 = vld [vmem:[#allocation5 + $0x1138] sm:$0xff]  ;;  %v1766_v49 = vld [vmem:[#allocation5 + $0xf48] sm:$0xff] }
 0x2c4   : > { %1813 = vmatprep.subr.mxu1 %v1732_v50  ;;  %2030 = vmatpush1.msra.mxu0 %v1943_v51  ;;  %v1977_v50 = vld [vmem:[#allocation5 + $0x1130] sm:$0xff]  ;;  %v1765_v51 = vld [vmem:[#allocation5 + $0xf40] sm:$0xff] }
 0x2c5   : > { %1814 = vmatpush1.msra.mxu1 %v1731_v52  ;;  %2031 = vmatprep.subr.mxu0 %v1942_v53  ;;  %v1976_v52 = vld [vmem:[#allocation5 + $0x1128] sm:$0xff]  ;;  %v1764_v53 = vld [vmem:[#allocation5 + $0xf38] sm:$0xff] }
 0x2c6   : > { %1815 = vmatprep.subr.mxu1 %v1730_v54  ;;  %2032 = vmatpush1.msra.mxu0 %v1941_v55  ;;  %v1975_v54 = vld [vmem:[#allocation5 + $0x1120] sm:$0xff]  ;;  %v1763_v55 = vld [vmem:[#allocation5 + $0xf30] sm:$0xff] }
 0x2c7   : > { %1816 = vmatpush1.msra.mxu1 %v1729_v56  ;;  %2033 = vmatprep.subr.mxu0 %v1940_v58  ;;  %v1974_v56 = vld [vmem:[#allocation5 + $0x1118] sm:$0xff]  ;;  %v1762_v58 = vld [vmem:[#allocation5 + $0xf28] sm:$0xff] }
 0x2c8   : > { %1817 = vmatprep.subr.mxu1 %v1728_v2  ;;  %2034 = vmatpush1.msra.mxu0 %v1939_v59  ;;  %v1973_v2 = vld [vmem:[#allocation5 + $0x1110] sm:$0xff]  ;;  %v1761_v59 = vld [vmem:[#allocation5 + $0xf20] sm:$0xff] }
 0x2c9   : > { %1818 = vmatpush1.msra.mxu1 %v1727_v36  ;;  %2035 = vmatprep.subr.mxu0 %v2002_v60  ;;  %v1972_v36 = vld [vmem:[#allocation5 + $0x1108] sm:$0xff]  ;;  %v1760_v60 = vld [vmem:[#allocation5 + $0xf18] sm:$0xff] }
 0x2ca   : > { %1819 = vmatprep.subr.mxu1 %v1726_v61  ;;  %2036 = vmatpush2.msra.mxu0 %v2001_v62  ;;  %v1971_v61 = vld [vmem:[#allocation5 + $0x1100] sm:$0xff]  ;;  %v1759_v62 = vld [vmem:[#allocation5 + $0xf10] sm:$0xff] }
 0x2cb   : > { %1820 = vmatpush1.msra.mxu1 %v1725_v63  ;;  %2037 = vmatprep.subr.mxu0 %v2000_v3  ;;  %v1758_v63 = vld [vmem:[#allocation5 + $0xf08] sm:$0xff]  ;;  %v1757_v3 = vld [vmem:[#allocation5 + $0xf00] sm:$0xff] }
 0x2cc   : > { %1821 = vmatprep.subr.mxu1 %v1788_v4  ;;  %2038 = vmatpush2.msra.mxu0 %v1999_v5  ;;  %v2076_v4 = vld [vmem:[%s4681_s2] sm:$0x3]  ;;  %v4270_v5 = vmov 0  }
 0x2cd   : > { %1822 = vmatpush2.msra.mxu1 %v1787_v6  ;;  %2039 = vmatprep.subr.mxu0 %v1998_v7  ;;  %v3363_v6 = vld [vmem:[%s4683_s4] sm:$0xf] }
 0x2ce   : > { %1823 = vmatprep.subr.mxu1 %v1786_v8  ;;  %2040 = vmatpush2.msra.mxu0 %v1997_v34 }
 0x2cf   : > { %1824 = vmatpush2.msra.mxu1 %v1785_v9  ;;  %2041 = vmatprep.subr.mxu0 %v1996_v10 }
 0x2d0   : > { %1825 = vmatprep.subr.mxu1 %v1784_v11  ;;  %2042 = vmatpush2.msra.mxu0 %v1995_v12 }
 0x2d1   : > { %1826 = vmatpush2.msra.mxu1 %v1783_v13  ;;  %2043 = vmatprep.subr.mxu0 %v1994_v14 }
 0x2d2   : > { %1827 = vmatprep.subr.mxu1 %v1782_v15  ;;  %2044 = vmatpush2.msra.mxu0 %v1993_v16 }
 0x2d3   : > { %1828 = vmatpush2.msra.mxu1 %v1781_v17  ;;  %2045 = vmatprep.subr.mxu0 %v1992_v18 }
 0x2d4   : > { %1829 = vmatprep.subr.mxu1 %v1780_v19  ;;  %2046 = vmatpush2.msra.mxu0 %v1991_v20 }
 0x2d5   : > { %1830 = vmatpush2.msra.mxu1 %v1779_v21  ;;  %2047 = vmatprep.subr.mxu0 %v1990_v22 }
 0x2d6   : > { %1831 = vmatprep.subr.mxu1 %v1778_v23  ;;  %2048 = vmatpush2.msra.mxu0 %v1989_v24 }
 0x2d7   : > { %1832 = vmatpush2.msra.mxu1 %v1777_v25  ;;  %2049 = vmatprep.subr.mxu0 %v1988_v26 }
 0x2d8   : > { %1833 = vmatprep.subr.mxu1 %v1776_v27  ;;  %2050 = vmatpush2.msra.mxu0 %v1987_v28 }
 0x2d9   : > { %1834 = vmatpush2.msra.mxu1 %v1775_v1  ;;  %2051 = vmatprep.subr.mxu0 %v1986_v29  ;;  %v2092_v29 = vld [vmem:[%s4682_s3] sm:$0xf] }
 0x2da   : > { %1835 = vmatprep.subr.mxu1 %v1774_v30  ;;  %2052 = vmatpush2.msra.mxu0 %v1985_v31  ;;  %v3523_v31 = vld [vmem:[%s4682_s3 + $0x10] sm:$0xf] }
 0x2db   : > { %1836 = vmatpush2.msra.mxu1 %v1773_v33  ;;  %2053 = vmatprep.subr.mxu0 %v1984_v35  ;;  %v3629_v33 = vld [vmem:[#allocation5 + $0xf8] sm:$0xff]  ;;  %v3630_v35 = vld [vmem:[#allocation5 + $0xf0] sm:$0xff] }
 0x2dc   : > { %1837 = vmatprep.subr.mxu1 %v1772_v37  ;;  %2054 = vmatpush2.msra.mxu0 %v1983_v38  ;;  %v3530_v37 = vld [vmem:[%s4682_s3 + $0x4] sm:$0xf]  ;;  %v3631_v38 = vld [vmem:[#allocation5 + $0xe8] sm:$0xff] }
 0x2dd   : > { %1838 = vmatpush2.msra.mxu1 %v1771_v39  ;;  %2055 = vmatprep.subr.mxu0 %v1982_v40  ;;  %v3632_v39 = vld [vmem:[#allocation5 + $0xe0] sm:$0xff]  ;;  %v3633_v40 = vld [vmem:[#allocation5 + $0x2f8] sm:$0xff] }
 0x2de   : > { %1839 = vmatprep.subr.mxu1 %v1770_v41  ;;  %2056 = vmatpush2.msra.mxu0 %v1981_v42  ;;  %v3634_v41 = vld [vmem:[#allocation5 + $0xd8] sm:$0xff]  ;;  %v3635_v42 = vld [vmem:[#allocation5 + $0x2f0] sm:$0xff] }
 0x2df   : > { %1840 = vmatpush2.msra.mxu1 %v1769_v43  ;;  %2057 = vmatprep.subr.mxu0 %v1980_v44  ;;  %v3636_v43 = vld [vmem:[#allocation5 + $0xd0] sm:$0xff]  ;;  %v3637_v44 = vld [vmem:[#allocation5 + $0x2e8] sm:$0xff] }
 0x2e0   : > { %1841 = vmatprep.subr.mxu1 %v1768_v45  ;;  %2058 = vmatpush2.msra.mxu0 %v1979_v46  ;;  %v3638_v45 = vld [vmem:[#allocation5 + $0xc8] sm:$0xff]  ;;  %v3639_v46 = vld [vmem:[#allocation5 + $0x2e0] sm:$0xff] }
 0x2e1   : > { %1842 = vmatpush2.msra.mxu1 %v1767_v47  ;;  %2059 = vmatprep.subr.mxu0 %v1978_v48  ;;  %v3640_v47 = vld [vmem:[#allocation5 + $0xc0] sm:$0xff]  ;;  %v3641_v48 = vld [vmem:[#allocation5 + $0x2d8] sm:$0xff] }
 0x2e2   : > { %1843 = vmatprep.subr.mxu1 %v1766_v49  ;;  %2060 = vmatpush2.msra.mxu0 %v1977_v50  ;;  %v3642_v49 = vld [vmem:[#allocation5 + $0xb8] sm:$0xff]  ;;  %v3643_v50 = vld [vmem:[#allocation5 + $0x2d0] sm:$0xff] }
 0x2e3   : > { %1844 = vmatpush2.msra.mxu1 %v1765_v51  ;;  %2061 = vmatprep.subr.mxu0 %v1976_v52  ;;  %v3644_v51 = vld [vmem:[#allocation5 + $0xb0] sm:$0xff]  ;;  %v3645_v52 = vld [vmem:[#allocation5 + $0x2c8] sm:$0xff] }
 0x2e4   : > { %1845 = vmatprep.subr.mxu1 %v1764_v53  ;;  %2062 = vmatpush2.msra.mxu0 %v1975_v54  ;;  %v3646_v53 = vld [vmem:[#allocation5 + $0xa8] sm:$0xff]  ;;  %v3647_v54 = vld [vmem:[#allocation5 + $0x2c0] sm:$0xff] }
 0x2e5   : > { %1846 = vmatpush2.msra.mxu1 %v1763_v55  ;;  %2063 = vmatprep.subr.mxu0 %v1974_v56  ;;  %v3648_v55 = vld [vmem:[#allocation5 + $0xa0] sm:$0xff]  ;;  %v3649_v56 = vld [vmem:[#allocation5 + $0x2b8] sm:$0xff] }
 0x2e6   : > { %1847 = vmatprep.subr.mxu1 %v1762_v58  ;;  %2064 = vmatpush2.msra.mxu0 %v1973_v2  ;;  %v3650_v58 = vld [vmem:[#allocation5 + $0x98] sm:$0xff]  ;;  %v3651_v2 = vld [vmem:[#allocation5 + $0x2b0] sm:$0xff] }
 0x2e7   : > { %1848 = vmatpush2.msra.mxu1 %v1761_v59  ;;  %2065 = vmatprep.subr.mxu0 %v1972_v36  ;;  %v3652_v59 = vld [vmem:[#allocation5 + $0x90] sm:$0xff]  ;;  %v3653_v36 = vld [vmem:[#allocation5 + $0x2a8] sm:$0xff] }
 0x2e8   : > { %1849 = vmatprep.subr.mxu1 %v1760_v60  ;;  %2066 = vmatpush2.msra.mxu0 %v1971_v61  ;;  %v3654_v60 = vld [vmem:[#allocation5 + $0x88] sm:$0xff]  ;;  %v3655_v61 = vld [vmem:[#allocation5 + $0x2a0] sm:$0xff] }
 0x2e9   : > { %1850 = vmatpush2.msra.mxu1 %v1759_v62  ;;  %3626 = vset.pattern.permute.xlu0 %v4270_v5  ;;  %v3656_v62 = vld [vmem:[#allocation5 + $0x80] sm:$0xff]  ;;  %v3660_v5 = vld [vmem:[#allocation5 + $0x70] sm:$0xff] }
 0x2ea   : > { %1851 = vmatprep.subr.mxu1 %v1758_v63  ;;  %2079 = vperm.xlu0 %3626, %v2076_v4   ;;  %v3657_v63 = vld [vmem:[#allocation5 + $0x298] sm:$0xff]  ;;  %v3659_v4 = vld [vmem:[#allocation5 + $0x290] sm:$0xff] }
 0x2eb   : > { %1852 = vmatpush2.msra.mxu1 %v1757_v3  ;;  %v3658_v3 = vld [vmem:[#allocation5 + $0x78] sm:$0xff] }
 0x2ee   : > { %3366 = vperm.xlu0 %3626, %v3363_v6   ;;  %v3661_v6 = vld [vmem:[#allocation5 + $0x288] sm:$0xff] }
 0x364   : > { %v1641_v7 = vpop.f32.mrf.mxu0 }
 0x366   : > { %v1643_v8 = vpop.f32.mrf.mxu0 }
 0x368   : > { %v1427_v34 = vpop.f32.mrf.mxu1  ;;  %v1933_v9 = vpop.f32.mrf.mxu0 }
 0x369   : > { %v1432_v10 = vadd.f32 %v1427_v34, %v4513_v57  ;;  %v3664_v34 = vld [vmem:[#allocation5 + $0x60] sm:$0xff] }
 0x36a   : > { %v1429_v11 = vpop.f32.mrf.mxu1  ;;  %v1935_v12 = vpop.f32.mrf.mxu0 }
 0x36b   : > { %v1433_v13 = vadd.f32 %v1429_v11, %v4521_v32  ;;  %2067 = vmatprep.mubr.f32.mxu0 %v1935_v12  ;;  %v1646_v14 = vadd.f32 %v1641_v7, %v1432_v10  ;;  %v2080_v32 = vpop.permute.xlu0 %2079  ;;  %v3662_v7 = vld [vmem:[#allocation5 + $0x68] sm:$0xff]  ;;  %v3666_v10 = vld [vmem:[#allocation5 + $0x58] sm:$0xff]  ;;  %v3667_v11 = vld [vmem:[#allocation5 + $0x270] sm:$0xff] }
 0x36c   : > { %v1719_v15 = vpop.f32.mrf.mxu1  ;;  %2068 = vmatmul.mubr.f32.vlgmr.msra.gmra.mxu0 %v1933_v9  ;;  %v3665_v9 = vld [vmem:[#allocation5 + $0x278] sm:$0xff]  ;;  %v3668_v12 = vld [vmem:[#allocation5 + $0x50] sm:$0xff] }
 0x36d   : > { %v1647_v16 = vadd.f32 %v1643_v8, %v1433_v13  ;;  %2313 = vmatprep.mubr.f32.mxu0 %v4269_v0  ;;  %v3663_v8 = vld [vmem:[#allocation5 + $0x280] sm:$0xff]  ;;  %v3669_v13 = vld [vmem:[#allocation5 + $0x268] sm:$0xff] }
 0x36e   : > { %v1721_v17 = vpop.f32.mrf.mxu1 }
 0x36f   : > { %1853 = vmatprep.mubr.f32.mxu1 %v1721_v17  ;;  %v3673_v17 = vld [vmem:[#allocation5 + $0x258] sm:$0xff] }
 0x370   : > { %1854 = vmatmul.mubr.f32.vlgmr.msra.gmra.mxu1 %v1719_v15  ;;  %v3671_v15 = vld [vmem:[#allocation5 + $0x260] sm:$0xff] }
 0x371   : > { %2168 = vmatprep.mubr.f32.mxu1 %v4269_v0 }
 0x42c   : > { %v2069_v18 = vpop.f32.mrf.mxu0 }
 0x42e   : > { %v2071_v23 = vpop.f32.mrf.mxu0 }
 0x430   : > { %v1855_v19 = vpop.f32.mrf.mxu1 }
 0x431   : > { %v1860_v20 = vadd.f32 %v1855_v19, %v1646_v14  ;;  %v3670_v14 = vld [vmem:[#allocation5 + $0x48] sm:$0xff]  ;;  %v3675_v19 = vld [vmem:[#allocation5 + $0x250] sm:$0xff] }
 0x432   : > { %v1857_v57 = vpop.f32.mrf.mxu1 }
 0x433   : > { %v2074_v21 = vadd.f32 %v2069_v18, %v1860_v20  ;;  %v1861_v22 = vadd.f32 %v1857_v57, %v1647_v16  ;;  %v3672_v16 = vld [vmem:[#allocation5 + $0x40] sm:$0xff]  ;;  %v3674_v18 = vld [vmem:[#allocation5 + $0x38] sm:$0xff]  ;;  %v3676_v20 = vld [vmem:[#allocation5 + $0x30] sm:$0xff] }
 0x434   : > { %v3677_v57 = vld [vmem:[#allocation5 + $0x248] sm:$0xff] }
 0x435   : > { %v2082_v24 = vadd.f32 %v2080_v32, %v2074_v21  ;;  %v2075_v25 = vadd.f32 %v2071_v23, %v1861_v22  ;;  %v3678_v21 = vld [vmem:[#allocation5 + $0x28] sm:$0xff]  ;;  %v3679_v22 = vld [vmem:[#allocation5 + $0x240] sm:$0xff] }
 0x436   : > { %v3680_v23 = vld [vmem:[#allocation5 + $0x20] sm:$0xff] }
 0x437   : > { %v2083_v26 = vadd.f32 %v2080_v32, %v2075_v25  ;;  %v2086_v27 = vmul.f32 0.01, %v2082_v24  ;;  %vm2084_vm2 = vcmp.gt.f32.partialorder %v2082_v24, 0.0  ;;  %v3681_v32 = vld [vmem:[#allocation5 + $0x238] sm:$0xff]  ;;  %v3683_v25 = vld [vmem:[#allocation5 + $0x230] sm:$0xff] }
 0x439   : > { %vm2085_vm3 = vcmp.gt.f32.partialorder %v2083_v26, 0.0  ;;  %v2087_v28 = vmul.f32 0.01, %v2083_v26  ;;  %v4546_v30 = vsel %vm2084_vm2, %v2082_v24, %v2086_v27  ;;  %v3682_v24 = vld [vmem:[#allocation5 + $0x18] sm:$0xff]  ;;  %v3685_v27 = vld [vmem:[#allocation5 + $0x228] sm:$0xff] }
 0x43b   : > { %v4541_v1 = vsel %vm2085_vm3, %v2083_v26, %v2087_v28  ;;  %v3684_v26 = vld [vmem:[#allocation5 + $0x10] sm:$0xff]  ;;  %v3686_v28 = vld [vmem:[#allocation5 + $0x8] sm:$0xff] }
 0x43c   : > { %3524 = vmatprep.subr.msk.mxu1 %vm2097_vm4, %v4541_v1  ;;  %3527 = vmatprep.subr.msk.mxu0 %vm2097_vm4, %v4541_v1 }
 0x43d   : > { %3525 = vmatpush1.msk.msra.mxu1 %vm2097_vm4, %v4546_v30  ;;  %3528 = vmatpush1.msk.msra.mxu0 %vm2097_vm4, %v4546_v30 }
 0x43e   : > { %3526 = vmatmul.mubr.msk.f32.vlgmr.msra.gmra.mxu1 %vm2093_vm5, %v2092_v29  ;;  %2175 = vmatprep.subr.mxu1 %v3629_v33  ;;  %v3687_v29 = vld [vmem:[#allocation5 + $0x220] sm:$0xff]  ;;  %v3689_v33 = vld [vmem:[#allocation5 + $0x218] sm:$0xff] }
 0x43f   : > { %3529 = vmatmul.mubr.msk.f32.vlgmr.msra.gmra.mxu0 %vm2093_vm5, %v3523_v31  ;;  %3531 = vmatprep.subr.msk.mxu0 %vm2097_vm4, %v4541_v1  ;;  %v3688_v31 = vld [vmem:[#allocation5] sm:$0xff] }
 0x440   : > { %2176 = vmatpush1.msra.mxu1 %v3630_v35  ;;  %3532 = vmatpush1.msk.msra.mxu0 %vm2097_vm4, %v4546_v30  ;;  %v3690_v35 = vld [vmem:[#allocation5 + $0x1f8] sm:$0xff] }
 0x441   : > { %2177 = vmatprep.subr.mxu1 %v3631_v38  ;;  %2389 = vmatprep.mubr.f32.mxu0 %v4269_v0  ;;  %v3692_v38 = vld [vmem:[#allocation5 + $0x1f0] sm:$0xff] }
 0x442   : > { %2178 = vmatpush1.msra.mxu1 %v3632_v39  ;;  %2396 = vmatprep.subr.mxu0 %v3633_v40  ;;  %v3693_v39 = vld [vmem:[#allocation5 + $0x208] sm:$0xff] }
 0x443   : > { %2179 = vmatprep.subr.mxu1 %v3634_v41  ;;  %3533 = vmatmul.mubr.msk.f32.vlgmr.msra.gmra.mxu0 %vm2093_vm5, %v3530_v37  ;;  %v3691_v37 = vld [vmem:[#allocation5 + $0x210] sm:$0xff]  ;;  %v3694_v40 = vld [vmem:[#allocation5 + $0x1e8] sm:$0xff]  ;;  %v3695_v41 = vld [vmem:[#allocation5 + $0x200] sm:$0xff] }
 0x444   : > { %2397 = vmatpush1.msra.mxu0 %v3635_v42  ;;  %2180 = vmatpush1.msra.mxu1 %v3636_v43  ;;  %v3696_v42 = vld [vmem:[#allocation5 + $0x1e0] sm:$0xff]  ;;  %v3697_v43 = vld [vmem:[#allocation5 + $0x3f8] sm:$0xff] }
 0x445   : > { %2398 = vmatprep.subr.mxu0 %v3637_v44  ;;  %2181 = vmatprep.subr.mxu1 %v3638_v45  ;;  %v3698_v44 = vld [vmem:[#allocation5 + $0x1d8] sm:$0xff]  ;;  %v3699_v45 = vld [vmem:[#allocation5 + $0x3f0] sm:$0xff] }
 0x446   : > { %2399 = vmatpush1.msra.mxu0 %v3639_v46  ;;  %2182 = vmatpush1.msra.mxu1 %v3640_v47  ;;  %v3700_v46 = vld [vmem:[#allocation5 + $0x1d0] sm:$0xff]  ;;  %v3701_v47 = vld [vmem:[#allocation5 + $0x3e8] sm:$0xff] }
 0x447   : > { %2400 = vmatprep.subr.mxu0 %v3641_v48  ;;  %2183 = vmatprep.subr.mxu1 %v3642_v49  ;;  %v3702_v48 = vld [vmem:[#allocation5 + $0x1c8] sm:$0xff]  ;;  %v3703_v49 = vld [vmem:[#allocation5 + $0x3e0] sm:$0xff] }
 0x448   : > { %2401 = vmatpush1.msra.mxu0 %v3643_v50  ;;  %2184 = vmatpush1.msra.mxu1 %v3644_v51  ;;  %v3704_v50 = vld [vmem:[#allocation5 + $0x1c0] sm:$0xff]  ;;  %v3705_v51 = vld [vmem:[#allocation5 + $0x3d8] sm:$0xff] }
 0x449   : > { %2402 = vmatprep.subr.mxu0 %v3645_v52  ;;  %2185 = vmatprep.subr.mxu1 %v3646_v53  ;;  %v3706_v52 = vld [vmem:[#allocation5 + $0x1b8] sm:$0xff]  ;;  %v3707_v53 = vld [vmem:[#allocation5 + $0x3d0] sm:$0xff] }
 0x44a   : > { %2403 = vmatpush1.msra.mxu0 %v3647_v54  ;;  %2186 = vmatpush1.msra.mxu1 %v3648_v55  ;;  %v3708_v54 = vld [vmem:[#allocation5 + $0x1b0] sm:$0xff]  ;;  %v3709_v55 = vld [vmem:[#allocation5 + $0x3c8] sm:$0xff] }
 0x44b   : > { %2404 = vmatprep.subr.mxu0 %v3649_v56  ;;  %2187 = vmatprep.subr.mxu1 %v3650_v58  ;;  %v3710_v56 = vld [vmem:[#allocation5 + $0x1a8] sm:$0xff]  ;;  %v3711_v58 = vld [vmem:[#allocation5 + $0x3c0] sm:$0xff] }
 0x44c   : > { %2405 = vmatpush1.msra.mxu0 %v3651_v2  ;;  %2188 = vmatpush1.msra.mxu1 %v3652_v59  ;;  %v3712_v2 = vld [vmem:[#allocation5 + $0x1a0] sm:$0xff]  ;;  %v3713_v59 = vld [vmem:[#allocation5 + $0x3b8] sm:$0xff] }
 0x44d   : > { %2406 = vmatprep.subr.mxu0 %v3653_v36  ;;  %2189 = vmatprep.subr.mxu1 %v3654_v60  ;;  %v3714_v36 = vld [vmem:[#allocation5 + $0x198] sm:$0xff]  ;;  %v3715_v60 = vld [vmem:[#allocation5 + $0x3b0] sm:$0xff] }
 0x44e   : > { %2407 = vmatpush1.msra.mxu0 %v3655_v61  ;;  %2190 = vmatpush1.msra.mxu1 %v3656_v62  ;;  %v3716_v61 = vld [vmem:[#allocation5 + $0x190] sm:$0xff]  ;;  %v3717_v62 = vld [vmem:[#allocation5 + $0x3a8] sm:$0xff] }
 0x44f   : > { %2408 = vmatprep.subr.mxu0 %v3657_v63  ;;  %2191 = vmatprep.subr.mxu1 %v3658_v3  ;;  %v3718_v63 = vld [vmem:[#allocation5 + $0x188] sm:$0xff]  ;;  %v3719_v3 = vld [vmem:[#allocation5 + $0x3a0] sm:$0xff] }
 0x450   : > { %2409 = vmatpush1.msra.mxu0 %v3659_v4  ;;  %2192 = vmatpush1.msra.mxu1 %v3660_v5  ;;  %v3720_v4 = vld [vmem:[#allocation5 + $0x180] sm:$0xff]  ;;  %v3721_v5 = vld [vmem:[#allocation5 + $0x398] sm:$0xff] }
 0x451   : > { %2410 = vmatprep.subr.mxu0 %v3661_v6  ;;  %2193 = vmatprep.subr.mxu1 %v3662_v7  ;;  %v3722_v6 = vld [vmem:[#allocation5 + $0x178] sm:$0xff]  ;;  %v3723_v7 = vld [vmem:[#allocation5 + $0x390] sm:$0xff] }
 0x452   : > { %2411 = vmatpush1.msra.mxu0 %v3663_v8  ;;  %2194 = vmatpush1.msra.mxu1 %v3664_v34  ;;  %v3724_v8 = vld [vmem:[#allocation5 + $0x170] sm:$0xff]  ;;  %v3725_v34 = vld [vmem:[#allocation5 + $0x388] sm:$0xff] }
 0x453   : > { %2412 = vmatprep.subr.mxu0 %v3665_v9  ;;  %2195 = vmatprep.subr.mxu1 %v3666_v10  ;;  %v3726_v9 = vld [vmem:[#allocation5 + $0x168] sm:$0xff]  ;;  %v3727_v10 = vld [vmem:[#allocation5 + $0x380] sm:$0xff] }
 0x454   : > { %2413 = vmatpush1.msra.mxu0 %v3667_v11  ;;  %2196 = vmatpush1.msra.mxu1 %v3668_v12  ;;  %v3728_v11 = vld [vmem:[#allocation5 + $0x160] sm:$0xff]  ;;  %v3729_v12 = vld [vmem:[#allocation5 + $0x378] sm:$0xff] }
 0x455   : > { %2414 = vmatprep.subr.mxu0 %v3669_v13  ;;  %2197 = vmatprep.subr.mxu1 %v3670_v14  ;;  %v3730_v13 = vld [vmem:[#allocation5 + $0x158] sm:$0xff]  ;;  %v3731_v14 = vld [vmem:[#allocation5 + $0x370] sm:$0xff] }
 0x456   : > { %2415 = vmatpush1.msra.mxu0 %v3671_v15  ;;  %2198 = vmatpush1.msra.mxu1 %v3672_v16  ;;  %v3732_v15 = vld [vmem:[#allocation5 + $0x150] sm:$0xff]  ;;  %v3733_v16 = vld [vmem:[#allocation5 + $0x368] sm:$0xff] }
 0x457   : > { %2416 = vmatprep.subr.mxu0 %v3673_v17  ;;  %2199 = vmatprep.subr.mxu1 %v3674_v18  ;;  %v3734_v17 = vld [vmem:[#allocation5 + $0x148] sm:$0xff]  ;;  %v3735_v18 = vld [vmem:[#allocation5 + $0x360] sm:$0xff] }
 0x458   : > { %2417 = vmatpush1.msra.mxu0 %v3675_v19  ;;  %2200 = vmatpush1.msra.mxu1 %v3676_v20  ;;  %v3736_v19 = vld [vmem:[#allocation5 + $0x140] sm:$0xff]  ;;  %v3737_v20 = vld [vmem:[#allocation5 + $0x358] sm:$0xff] }
 0x459   : > { %2418 = vmatprep.subr.mxu0 %v3677_v57  ;;  %2201 = vmatprep.subr.mxu1 %v3678_v21  ;;  %v3738_v57 = vld [vmem:[#allocation5 + $0x138] sm:$0xff]  ;;  %v3739_v21 = vld [vmem:[#allocation5 + $0x350] sm:$0xff] }
 0x45a   : > { %2419 = vmatpush1.msra.mxu0 %v3679_v22  ;;  %2202 = vmatpush1.msra.mxu1 %v3680_v23  ;;  %v3740_v22 = vld [vmem:[#allocation5 + $0x130] sm:$0xff]  ;;  %v3741_v23 = vld [vmem:[#allocation5 + $0x348] sm:$0xff] }
 0x45b   : > { %2420 = vmatprep.subr.mxu0 %v3681_v32  ;;  %2203 = vmatprep.subr.mxu1 %v3682_v24  ;;  %v3742_v32 = vld [vmem:[#allocation5 + $0x128] sm:$0xff]  ;;  %v3743_v24 = vld [vmem:[#allocation5 + $0x340] sm:$0xff] }
 0x45c   : > { %2421 = vmatpush1.msra.mxu0 %v3683_v25  ;;  %2204 = vmatpush1.msra.mxu1 %v3684_v26  ;;  %v3744_v25 = vld [vmem:[#allocation5 + $0x120] sm:$0xff]  ;;  %v3745_v26 = vld [vmem:[#allocation5 + $0x338] sm:$0xff] }
 0x45d   : > { %2422 = vmatprep.subr.mxu0 %v3685_v27  ;;  %2205 = vmatprep.subr.mxu1 %v3686_v28  ;;  %v3746_v27 = vld [vmem:[#allocation5 + $0x118] sm:$0xff]  ;;  %v3747_v28 = vld [vmem:[#allocation5 + $0x330] sm:$0xff] }
 0x45e   : > { %2423 = vmatpush1.msra.mxu0 %v3687_v29  ;;  %2206 = vmatpush1.msra.mxu1 %v3688_v31  ;;  %v3748_v29 = vld [vmem:[#allocation5 + $0x110] sm:$0xff]  ;;  %v3749_v31 = vld [vmem:[#allocation5 + $0x328] sm:$0xff] }
 0x45f   : > { %2424 = vmatprep.subr.mxu0 %v3689_v33  ;;  %2207 = vmatprep.subr.mxu1 %v3690_v35  ;;  %v3750_v33 = vld [vmem:[#allocation5 + $0x108] sm:$0xff]  ;;  %v3751_v35 = vld [vmem:[#allocation5 + $0x320] sm:$0xff] }
 0x460   : > { %2425 = vmatpush1.msra.mxu0 %v3691_v37  ;;  %2208 = vmatpush2.msra.mxu1 %v3692_v38  ;;  %v3752_v37 = vld [vmem:[#allocation5 + $0x100] sm:$0xff]  ;;  %v3753_v38 = vld [vmem:[#allocation5 + $0x318] sm:$0xff] }
 0x461   : > { %2426 = vmatprep.subr.mxu0 %v3693_v39  ;;  %2209 = vmatprep.subr.mxu1 %v3694_v40  ;;  %v3754_v39 = vld [vmem:[#allocation5 + $0x310] sm:$0xff]  ;;  %v3755_v40 = vld [vmem:[#allocation5 + $0x308] sm:$0xff] }
 0x462   : > { %2427 = vmatpush1.msra.mxu0 %v3695_v41  ;;  %2210 = vmatpush2.msra.mxu1 %v3696_v42  ;;  %v3756_v41 = vld [vmem:[#allocation5 + $0x300] sm:$0xff] }
 0x463   : > { %2428 = vmatprep.subr.mxu0 %v3697_v43  ;;  %2211 = vmatprep.subr.mxu1 %v3698_v44 }
 0x464   : > { %2429 = vmatpush2.msra.mxu0 %v3699_v45  ;;  %2212 = vmatpush2.msra.mxu1 %v3700_v46 }
 0x465   : > { %2430 = vmatprep.subr.mxu0 %v3701_v47  ;;  %2213 = vmatprep.subr.mxu1 %v3702_v48  ;;  %v3534_v47 = vld [vmem:[%s4682_s3 + $0x8] sm:$0xf] }
 0x466   : > { %2431 = vmatpush2.msra.mxu0 %v3703_v49  ;;  %2214 = vmatpush2.msra.mxu1 %v3704_v50  ;;  %v3757_v48 = vld [vmem:[#allocation5 + $0x4f8] sm:$0xff]  ;;  %v3758_v50 = vld [vmem:[#allocation5 + $0x4f0] sm:$0xff] }
 0x467   : > { %2432 = vmatprep.subr.mxu0 %v3705_v51  ;;  %2215 = vmatprep.subr.mxu1 %v3706_v52  ;;  %v3759_v51 = vld [vmem:[#allocation5 + $0x4e8] sm:$0xff]  ;;  %v3538_v52 = vld [vmem:[%s4682_s3 + $0xc] sm:$0xf] }
 0x468   : > { %2433 = vmatpush2.msra.mxu0 %v3707_v53  ;;  %2216 = vmatpush2.msra.mxu1 %v3708_v54  ;;  %v3760_v53 = vld [vmem:[#allocation5 + $0x4e0] sm:$0xff]  ;;  %v3761_v54 = vld [vmem:[#allocation5 + $0x4d8] sm:$0xff] }
 0x469   : > { %2434 = vmatprep.subr.mxu0 %v3709_v55  ;;  %2217 = vmatprep.subr.mxu1 %v3710_v56  ;;  %v3762_v55 = vld [vmem:[#allocation5 + $0x6f8] sm:$0xff]  ;;  %v3763_v56 = vld [vmem:[#allocation5 + $0x4d0] sm:$0xff] }
 0x46a   : > { %2435 = vmatpush2.msra.mxu0 %v3711_v58  ;;  %2218 = vmatpush2.msra.mxu1 %v3712_v2  ;;  %v3764_v58 = vld [vmem:[#allocation5 + $0x6f0] sm:$0xff]  ;;  %v3765_v2 = vld [vmem:[#allocation5 + $0x4c8] sm:$0xff] }
 0x46b   : > { %2436 = vmatprep.subr.mxu0 %v3713_v59  ;;  %2219 = vmatprep.subr.mxu1 %v3714_v36  ;;  %v3766_v59 = vld [vmem:[#allocation5 + $0x6e8] sm:$0xff]  ;;  %v3767_v36 = vld [vmem:[#allocation5 + $0x4c0] sm:$0xff] }
 0x46c   : > { %2437 = vmatpush2.msra.mxu0 %v3715_v60  ;;  %2220 = vmatpush2.msra.mxu1 %v3716_v61  ;;  %v3768_v60 = vld [vmem:[#allocation5 + $0x6e0] sm:$0xff]  ;;  %v3769_v61 = vld [vmem:[#allocation5 + $0x4b8] sm:$0xff] }
 0x46d   : > { %2438 = vmatprep.subr.mxu0 %v3717_v62  ;;  %2221 = vmatprep.subr.mxu1 %v3718_v63  ;;  %v3770_v62 = vld [vmem:[#allocation5 + $0x6d8] sm:$0xff]  ;;  %v3771_v63 = vld [vmem:[#allocation5 + $0x4b0] sm:$0xff] }
 0x46e   : > { %2439 = vmatpush2.msra.mxu0 %v3719_v3  ;;  %2222 = vmatpush2.msra.mxu1 %v3720_v4  ;;  %v3772_v3 = vld [vmem:[#allocation5 + $0x6d0] sm:$0xff]  ;;  %v3773_v4 = vld [vmem:[#allocation5 + $0x4a8] sm:$0xff] }
 0x46f   : > { %2440 = vmatprep.subr.mxu0 %v3721_v5  ;;  %2223 = vmatprep.subr.mxu1 %v3722_v6  ;;  %v3774_v5 = vld [vmem:[#allocation5 + $0x6c8] sm:$0xff]  ;;  %v3775_v6 = vld [vmem:[#allocation5 + $0x4a0] sm:$0xff] }
 0x470   : > { %2441 = vmatpush2.msra.mxu0 %v3723_v7  ;;  %2224 = vmatpush2.msra.mxu1 %v3724_v8  ;;  %v3776_v7 = vld [vmem:[#allocation5 + $0x6c0] sm:$0xff]  ;;  %v3777_v8 = vld [vmem:[#allocation5 + $0x498] sm:$0xff] }
 0x471   : > { %2442 = vmatprep.subr.mxu0 %v3725_v34  ;;  %2225 = vmatprep.subr.mxu1 %v3726_v9  ;;  %v3778_v34 = vld [vmem:[#allocation5 + $0x6b8] sm:$0xff]  ;;  %v3779_v9 = vld [vmem:[#allocation5 + $0x490] sm:$0xff] }
 0x472   : > { %2443 = vmatpush2.msra.mxu0 %v3727_v10  ;;  %2226 = vmatpush2.msra.mxu1 %v3728_v11  ;;  %v3780_v10 = vld [vmem:[#allocation5 + $0x6b0] sm:$0xff]  ;;  %v3781_v11 = vld [vmem:[#allocation5 + $0x488] sm:$0xff] }
 0x473   : > { %2444 = vmatprep.subr.mxu0 %v3729_v12  ;;  %2227 = vmatprep.subr.mxu1 %v3730_v13  ;;  %v3782_v12 = vld [vmem:[#allocation5 + $0x6a8] sm:$0xff]  ;;  %v3783_v13 = vld [vmem:[#allocation5 + $0x480] sm:$0xff] }
 0x474   : > { %2445 = vmatpush2.msra.mxu0 %v3731_v14  ;;  %2228 = vmatpush2.msra.mxu1 %v3732_v15  ;;  %v3784_v14 = vld [vmem:[#allocation5 + $0x6a0] sm:$0xff]  ;;  %v3785_v15 = vld [vmem:[#allocation5 + $0x478] sm:$0xff] }
 0x475   : > { %2446 = vmatprep.subr.mxu0 %v3733_v16  ;;  %2229 = vmatprep.subr.mxu1 %v3734_v17  ;;  %v3786_v16 = vld [vmem:[#allocation5 + $0x698] sm:$0xff]  ;;  %v3787_v17 = vld [vmem:[#allocation5 + $0x470] sm:$0xff] }
 0x476   : > { %2447 = vmatpush2.msra.mxu0 %v3735_v18  ;;  %2230 = vmatpush2.msra.mxu1 %v3736_v19  ;;  %v3788_v18 = vld [vmem:[#allocation5 + $0x690] sm:$0xff]  ;;  %v3789_v19 = vld [vmem:[#allocation5 + $0x468] sm:$0xff] }
 0x477   : > { %2448 = vmatprep.subr.mxu0 %v3737_v20  ;;  %2231 = vmatprep.subr.mxu1 %v3738_v57  ;;  %v3790_v20 = vld [vmem:[#allocation5 + $0x688] sm:$0xff]  ;;  %v3791_v57 = vld [vmem:[#allocation5 + $0x460] sm:$0xff] }
 0x478   : > { %2449 = vmatpush2.msra.mxu0 %v3739_v21  ;;  %2232 = vmatpush2.msra.mxu1 %v3740_v22  ;;  %v3792_v21 = vld [vmem:[#allocation5 + $0x680] sm:$0xff]  ;;  %v3793_v22 = vld [vmem:[#allocation5 + $0x458] sm:$0xff] }
 0x479   : > { %2450 = vmatprep.subr.mxu0 %v3741_v23  ;;  %2233 = vmatprep.subr.mxu1 %v3742_v32  ;;  %v3794_v23 = vld [vmem:[#allocation5 + $0x678] sm:$0xff]  ;;  %v3795_v32 = vld [vmem:[#allocation5 + $0x450] sm:$0xff] }
 0x47a   : > { %2451 = vmatpush2.msra.mxu0 %v3743_v24  ;;  %2234 = vmatpush2.msra.mxu1 %v3744_v25  ;;  %v3796_v24 = vld [vmem:[#allocation5 + $0x670] sm:$0xff]  ;;  %v3797_v25 = vld [vmem:[#allocation5 + $0x448] sm:$0xff] }
 0x47b   : > { %2452 = vmatprep.subr.mxu0 %v3745_v26  ;;  %2235 = vmatprep.subr.mxu1 %v3746_v27  ;;  %v3798_v26 = vld [vmem:[#allocation5 + $0x668] sm:$0xff]  ;;  %v3799_v27 = vld [vmem:[#allocation5 + $0x440] sm:$0xff] }
 0x47c   : > { %2453 = vmatpush2.msra.mxu0 %v3747_v28  ;;  %2236 = vmatpush2.msra.mxu1 %v3748_v29  ;;  %v3800_v28 = vld [vmem:[#allocation5 + $0x660] sm:$0xff]  ;;  %v3801_v29 = vld [vmem:[#allocation5 + $0x438] sm:$0xff] }
 0x47d   : > { %2454 = vmatprep.subr.mxu0 %v3749_v31  ;;  %2237 = vmatprep.subr.mxu1 %v3750_v33  ;;  %v3802_v31 = vld [vmem:[#allocation5 + $0x658] sm:$0xff]  ;;  %v3803_v33 = vld [vmem:[#allocation5 + $0x430] sm:$0xff] }
 0x47e   : > { %2455 = vmatpush2.msra.mxu0 %v3751_v35  ;;  %2238 = vmatpush2.msra.mxu1 %v3752_v37  ;;  %v3804_v35 = vld [vmem:[#allocation5 + $0x650] sm:$0xff]  ;;  %v3805_v37 = vld [vmem:[#allocation5 + $0x428] sm:$0xff] }
 0x47f   : > { %2456 = vmatprep.subr.mxu0 %v3753_v38  ;;  %3535 = vmatprep.subr.msk.mxu1 %vm2097_vm4, %v4541_v1  ;;  %v3806_v38 = vld [vmem:[#allocation5 + $0x648] sm:$0xff] }
 0x480   : > { %2457 = vmatpush2.msra.mxu0 %v3754_v39  ;;  %v3807_v39 = vld [vmem:[#allocation5 + $0x420] sm:$0xff] }
 0x481   : > { %2458 = vmatprep.subr.mxu0 %v3755_v40  ;;  %v3808_v40 = vld [vmem:[#allocation5 + $0x640] sm:$0xff] }
 0x482   : > { %2459 = vmatpush2.msra.mxu0 %v3756_v41  ;;  %v3809_v41 = vld [vmem:[#allocation5 + $0x418] sm:$0xff] }
 0x483   : > { %3539 = vmatprep.subr.msk.mxu0 %vm2097_vm4, %v4541_v1 }
 0x4fe   : > { %v2170_v42 = vpop.f32.mrf.mxu1 }
 0x4ff   : > { %v4574_v43 = vpop.f32.mrf.mxu0 }
 0x500   : > { %v2172_v44 = vpop.f32.mrf.mxu1 }
 0x501   : > { %v4576_v45 = vpop.f32.mrf.mxu0  ;;  %2239 = vmatprep.mubr.f32.mxu1 %v2172_v44  ;;  %v3811_v44 = vld [vmem:[#allocation5 + $0x410] sm:$0xff] }
 0x502   : > { %2240 = vmatmul.mubr.f32.vlgmr.msra.gmra.mxu1 %v2170_v42  ;;  %v3810_v42 = vld [vmem:[#allocation5 + $0x638] sm:$0xff] }
 0x503   : > { %v2391_v46 = vpop.f32.mrf.mxu0  ;;  %3536 = vmatpush1.msk.msra.mxu1 %vm2097_vm4, %v4546_v30  ;;  %2538 = vmatprep.mubr.f32.mxu1 %v4269_v0 }
 0x504   : > { %2545 = vmatprep.subr.mxu1 %v3757_v48  ;;  %v3814_v48 = vld [vmem:[#allocation5 + $0x628] sm:$0xff] }
 0x505   : > { %v2393_v49 = vpop.f32.mrf.mxu0 }
 0x506   : > { %2460 = vmatprep.mubr.f32.mxu0 %v2393_v49  ;;  %3537 = vmatmul.mubr.msk.f32.vlgmr.msra.gmra.mxu1 %vm2093_vm5, %v3534_v47  ;;  %v3813_v47 = vld [vmem:[#allocation5 + $0x408] sm:$0xff]  ;;  %v3815_v49 = vld [vmem:[#allocation5 + $0x400] sm:$0xff] }
 0x507   : > { %2461 = vmatmul.mubr.f32.vlgmr.msra.gmra.mxu0 %v2391_v46  ;;  %2546 = vmatpush1.msra.mxu1 %v3758_v50  ;;  %v3812_v46 = vld [vmem:[#allocation5 + $0x630] sm:$0xff]  ;;  %v3816_v50 = vld [vmem:[#allocation5 + $0x620] sm:$0xff] }
 0x508   : > { %3540 = vmatpush1.msk.msra.mxu0 %vm2097_vm4, %v4546_v30  ;;  %2547 = vmatprep.subr.mxu1 %v3759_v51  ;;  %v3817_v51 = vld [vmem:[#allocation5 + $0x5f8] sm:$0xff] }
 0x509   : > { %2548 = vmatpush1.msra.mxu1 %v3760_v53  ;;  %2687 = vmatprep.mubr.f32.mxu0 %v4269_v0  ;;  %v3819_v53 = vld [vmem:[#allocation5 + $0x5f0] sm:$0xff] }
 0x50a   : > { %2549 = vmatprep.subr.mxu1 %v3761_v54  ;;  %2694 = vmatprep.subr.mxu0 %v3762_v55  ;;  %v3820_v54 = vld [vmem:[#allocation5 + $0x610] sm:$0xff]  ;;  %v3821_v55 = vld [vmem:[#allocation5 + $0x5e8] sm:$0xff] }
 0x50b   : > { %2550 = vmatpush1.msra.mxu1 %v3763_v56  ;;  %3541 = vmatmul.mubr.msk.f32.vlgmr.msra.gmra.mxu0 %vm2093_vm5, %v3538_v52  ;;  %v3818_v52 = vld [vmem:[#allocation5 + $0x618] sm:$0xff]  ;;  %v3822_v56 = vld [vmem:[#allocation5 + $0x608] sm:$0xff] }
 0x50c   : > { %2695 = vmatpush1.msra.mxu0 %v3764_v58  ;;  %2551 = vmatprep.subr.mxu1 %v3765_v2  ;;  %v3823_v58 = vld [vmem:[#allocation5 + $0x5e0] sm:$0xff] }
 0x50d   : > { %2696 = vmatprep.subr.mxu0 %v3766_v59  ;;  %2552 = vmatpush1.msra.mxu1 %v3767_v36  ;;  %v3824_v2 = vld [vmem:[#allocation5 + $0x600] sm:$0xff]  ;;  %v3825_v59 = vld [vmem:[#allocation5 + $0x5d8] sm:$0xff] }
 0x50e   : > { %2697 = vmatpush1.msra.mxu0 %v3768_v60  ;;  %2553 = vmatprep.subr.mxu1 %v3769_v61  ;;  %v3826_v36 = vld [vmem:[#allocation5 + $0x7f8] sm:$0xff]  ;;  %v3827_v60 = vld [vmem:[#allocation5 + $0x5d0] sm:$0xff] }
 0x50f   : > { %2698 = vmatprep.subr.mxu0 %v3770_v62  ;;  %2554 = vmatpush1.msra.mxu1 %v3771_v63  ;;  %v3828_v61 = vld [vmem:[#allocation5 + $0x7f0] sm:$0xff]  ;;  %v3829_v62 = vld [vmem:[#allocation5 + $0x5c8] sm:$0xff] }
 0x510   : > { %2699 = vmatpush1.msra.mxu0 %v3772_v3  ;;  %2555 = vmatprep.subr.mxu1 %v3773_v4  ;;  %v3830_v63 = vld [vmem:[#allocation5 + $0x7e8] sm:$0xff]  ;;  %v3831_v3 = vld [vmem:[#allocation5 + $0x5c0] sm:$0xff] }
 0x511   : > { %2700 = vmatprep.subr.mxu0 %v3774_v5  ;;  %2556 = vmatpush1.msra.mxu1 %v3775_v6  ;;  %v3832_v4 = vld [vmem:[#allocation5 + $0x7e0] sm:$0xff]  ;;  %v3833_v5 = vld [vmem:[#allocation5 + $0x5b8] sm:$0xff] }
 0x512   : > { %2701 = vmatpush1.msra.mxu0 %v3776_v7  ;;  %2557 = vmatprep.subr.mxu1 %v3777_v8  ;;  %v3834_v6 = vld [vmem:[#allocation5 + $0x7d8] sm:$0xff]  ;;  %v3835_v7 = vld [vmem:[#allocation5 + $0x5b0] sm:$0xff] }
 0x513   : > { %2702 = vmatprep.subr.mxu0 %v3778_v34  ;;  %2558 = vmatpush1.msra.mxu1 %v3779_v9  ;;  %v3836_v8 = vld [vmem:[#allocation5 + $0x7d0] sm:$0xff]  ;;  %v3837_v34 = vld [vmem:[#allocation5 + $0x5a8] sm:$0xff] }
 0x514   : > { %2703 = vmatpush1.msra.mxu0 %v3780_v10  ;;  %2559 = vmatprep.subr.mxu1 %v3781_v11  ;;  %v3838_v9 = vld [vmem:[#allocation5 + $0x7c8] sm:$0xff]  ;;  %v3839_v10 = vld [vmem:[#allocation5 + $0x5a0] sm:$0xff] }
 0x515   : > { %2704 = vmatprep.subr.mxu0 %v3782_v12  ;;  %2560 = vmatpush1.msra.mxu1 %v3783_v13  ;;  %v3840_v11 = vld [vmem:[#allocation5 + $0x7c0] sm:$0xff]  ;;  %v3841_v12 = vld [vmem:[#allocation5 + $0x598] sm:$0xff] }
 0x516   : > { %2705 = vmatpush1.msra.mxu0 %v3784_v14  ;;  %2561 = vmatprep.subr.mxu1 %v3785_v15  ;;  %v3842_v13 = vld [vmem:[#allocation5 + $0x7b8] sm:$0xff]  ;;  %v3843_v14 = vld [vmem:[#allocation5 + $0x590] sm:$0xff] }
 0x517   : > { %2706 = vmatprep.subr.mxu0 %v3786_v16  ;;  %2562 = vmatpush1.msra.mxu1 %v3787_v17  ;;  %v3844_v15 = vld [vmem:[#allocation5 + $0x7b0] sm:$0xff]  ;;  %v3845_v16 = vld [vmem:[#allocation5 + $0x588] sm:$0xff] }
 0x518   : > { %2707 = vmatpush1.msra.mxu0 %v3788_v18  ;;  %2563 = vmatprep.subr.mxu1 %v3789_v19  ;;  %v3846_v17 = vld [vmem:[#allocation5 + $0x7a8] sm:$0xff]  ;;  %v3847_v18 = vld [vmem:[#allocation5 + $0x580] sm:$0xff] }
 0x519   : > { %2708 = vmatprep.subr.mxu0 %v3790_v20  ;;  %2564 = vmatpush1.msra.mxu1 %v3791_v57  ;;  %v3848_v19 = vld [vmem:[#allocation5 + $0x7a0] sm:$0xff]  ;;  %v3849_v20 = vld [vmem:[#allocation5 + $0x578] sm:$0xff] }
 0x51a   : > { %2709 = vmatpush1.msra.mxu0 %v3792_v21  ;;  %2565 = vmatprep.subr.mxu1 %v3793_v22  ;;  %v3850_v57 = vld [vmem:[#allocation5 + $0x798] sm:$0xff]  ;;  %v3851_v21 = vld [vmem:[#allocation5 + $0x570] sm:$0xff] }
 0x51b   : > { %2710 = vmatprep.subr.mxu0 %v3794_v23  ;;  %2566 = vmatpush1.msra.mxu1 %v3795_v32  ;;  %v3852_v22 = vld [vmem:[#allocation5 + $0x790] sm:$0xff]  ;;  %v3853_v23 = vld [vmem:[#allocation5 + $0x568] sm:$0xff] }
 0x51c   : > { %2711 = vmatpush1.msra.mxu0 %v3796_v24  ;;  %2567 = vmatprep.subr.mxu1 %v3797_v25  ;;  %v3854_v32 = vld [vmem:[#allocation5 + $0x788] sm:$0xff]  ;;  %v3855_v24 = vld [vmem:[#allocation5 + $0x560] sm:$0xff] }
 0x51d   : > { %2712 = vmatprep.subr.mxu0 %v3798_v26  ;;  %2568 = vmatpush1.msra.mxu1 %v3799_v27  ;;  %v3856_v25 = vld [vmem:[#allocation5 + $0x780] sm:$0xff]  ;;  %v3857_v26 = vld [vmem:[#allocation5 + $0x558] sm:$0xff] }
 0x51e   : > { %2713 = vmatpush1.msra.mxu0 %v3800_v28  ;;  %2569 = vmatprep.subr.mxu1 %v3801_v29  ;;  %v3858_v27 = vld [vmem:[#allocation5 + $0x778] sm:$0xff]  ;;  %v3859_v28 = vld [vmem:[#allocation5 + $0x550] sm:$0xff] }
 0x51f   : > { %2714 = vmatprep.subr.mxu0 %v3802_v31  ;;  %2570 = vmatpush1.msra.mxu1 %v3803_v33  ;;  %v3860_v29 = vld [vmem:[#allocation5 + $0x770] sm:$0xff]  ;;  %v3861_v31 = vld [vmem:[#allocation5 + $0x548] sm:$0xff] }
 0x520   : > { %2715 = vmatpush1.msra.mxu0 %v3804_v35  ;;  %2571 = vmatprep.subr.mxu1 %v3805_v37  ;;  %v3862_v33 = vld [vmem:[#allocation5 + $0x768] sm:$0xff]  ;;  %v3863_v35 = vld [vmem:[#allocation5 + $0x540] sm:$0xff] }
 0x521   : > { %2716 = vmatprep.subr.mxu0 %v3806_v38  ;;  %2572 = vmatpush1.msra.mxu1 %v3807_v39  ;;  %v3864_v37 = vld [vmem:[#allocation5 + $0x760] sm:$0xff]  ;;  %v3865_v38 = vld [vmem:[#allocation5 + $0x538] sm:$0xff] }
 0x522   : > { %2717 = vmatpush1.msra.mxu0 %v3808_v40  ;;  %2573 = vmatprep.subr.mxu1 %v3809_v41  ;;  %v3866_v39 = vld [vmem:[#allocation5 + $0x758] sm:$0xff]  ;;  %v3867_v40 = vld [vmem:[#allocation5 + $0x530] sm:$0xff] }
 0x523   : > { %2718 = vmatprep.subr.mxu0 %v3810_v42  ;;  %2574 = vmatpush1.msra.mxu1 %v3811_v44  ;;  %v3868_v41 = vld [vmem:[#allocation5 + $0x750] sm:$0xff]  ;;  %v3869_v42 = vld [vmem:[#allocation5 + $0x528] sm:$0xff] }
 0x524   : > { %2719 = vmatpush1.msra.mxu0 %v3812_v46  ;;  %2575 = vmatprep.subr.mxu1 %v3813_v47  ;;  %v3870_v44 = vld [vmem:[#allocation5 + $0x748] sm:$0xff]  ;;  %v3871_v46 = vld [vmem:[#allocation5 + $0x520] sm:$0xff] }
 0x525   : > { %2720 = vmatprep.subr.mxu0 %v3814_v48  ;;  %2576 = vmatpush1.msra.mxu1 %v3815_v49  ;;  %v3872_v47 = vld [vmem:[#allocation5 + $0x740] sm:$0xff]  ;;  %v3873_v48 = vld [vmem:[#allocation5 + $0x518] sm:$0xff] }
 0x526   : > { %2721 = vmatpush1.msra.mxu0 %v3816_v50  ;;  %2577 = vmatprep.subr.mxu1 %v3817_v51  ;;  %v3874_v49 = vld [vmem:[#allocation5 + $0x738] sm:$0xff]  ;;  %v3875_v50 = vld [vmem:[#allocation5 + $0x510] sm:$0xff] }
 0x527   : > { %2722 = vmatprep.subr.mxu0 %v3818_v52  ;;  %2578 = vmatpush2.msra.mxu1 %v3819_v53  ;;  %v3876_v51 = vld [vmem:[#allocation5 + $0x730] sm:$0xff]  ;;  %v3877_v52 = vld [vmem:[#allocation5 + $0x508] sm:$0xff] }
 0x528   : > { %2723 = vmatpush1.msra.mxu0 %v3820_v54  ;;  %2579 = vmatprep.subr.mxu1 %v3821_v55  ;;  %v3878_v53 = vld [vmem:[#allocation5 + $0x728] sm:$0xff]  ;;  %v3879_v54 = vld [vmem:[#allocation5 + $0x500] sm:$0xff] }
 0x529   : > { %2724 = vmatprep.subr.mxu0 %v3822_v56  ;;  %2580 = vmatpush2.msra.mxu1 %v3823_v58  ;;  %v3880_v55 = vld [vmem:[#allocation5 + $0x720] sm:$0xff]  ;;  %v3881_v56 = vld [vmem:[#allocation5 + $0x718] sm:$0xff]  ;;  %v3882_v58 = vld [vmem:[#allocation5 + $0x710] sm:$0xff] }
 0x52a   : > { %2725 = vmatpush1.msra.mxu0 %v3824_v2  ;;  %2581 = vmatprep.subr.mxu1 %v3825_v59  ;;  %v3883_v2 = vld [vmem:[#allocation5 + $0x708] sm:$0xff]  ;;  %v3884_v59 = vld [vmem:[#allocation5 + $0x700] sm:$0xff] }
 0x52b   : > { %2726 = vmatprep.subr.mxu0 %v3826_v36  ;;  %2582 = vmatpush2.msra.mxu1 %v3827_v60 }
 0x52c   : > { %2727 = vmatpush2.msra.mxu0 %v3828_v61  ;;  %2583 = vmatprep.subr.mxu1 %v3829_v62 }
 0x52d   : > { %2728 = vmatprep.subr.mxu0 %v3830_v63  ;;  %2584 = vmatpush2.msra.mxu1 %v3831_v3 }
 0x52e   : > { %2729 = vmatpush2.msra.mxu0 %v3832_v4  ;;  %2585 = vmatprep.subr.mxu1 %v3833_v5 }
 0x52f   : > { %2730 = vmatprep.subr.mxu0 %v3834_v6  ;;  %2586 = vmatpush2.msra.mxu1 %v3835_v7 }
 0x530   : > { %2731 = vmatpush2.msra.mxu0 %v3836_v8  ;;  %2587 = vmatprep.subr.mxu1 %v3837_v34  ;;  %v3885_v34 = vld [vmem:[#allocation5 + $0xaf8] sm:$0xff] }
 0x531   : > { %2732 = vmatprep.subr.mxu0 %v3838_v9  ;;  %2588 = vmatpush2.msra.mxu1 %v3839_v10  ;;  %v3886_v9 = vld [vmem:[#allocation5 + $0xaf0] sm:$0xff]  ;;  %v3887_v10 = vld [vmem:[#allocation5 + $0xae8] sm:$0xff] }
 0x532   : > { %2733 = vmatpush2.msra.mxu0 %v3840_v11  ;;  %2589 = vmatprep.subr.mxu1 %v3841_v12  ;;  %v3546_v11 = vld [vmem:[%s4682_s3 + $0x18] sm:$0xf]  ;;  %v3888_v12 = vld [vmem:[#allocation5 + $0xae0] sm:$0xff] }
 0x533   : > { %2734 = vmatprep.subr.mxu0 %v3842_v13  ;;  %2590 = vmatpush2.msra.mxu1 %v3843_v14  ;;  %v3889_v13 = vld [vmem:[#allocation5 + $0xad8] sm:$0xff] }
 0x534   : > { %2735 = vmatpush2.msra.mxu0 %v3844_v15  ;;  %2591 = vmatprep.subr.mxu1 %v3845_v16  ;;  %v3890_v14 = vld [vmem:[#allocation5 + $0xcf8] sm:$0xff]  ;;  %v3891_v15 = vld [vmem:[#allocation5 + $0xad0] sm:$0xff] }
 0x535   : > { %2736 = vmatprep.subr.mxu0 %v3846_v17  ;;  %2592 = vmatpush2.msra.mxu1 %v3847_v18  ;;  %v3892_v16 = vld [vmem:[#allocation5 + $0xcf0] sm:$0xff]  ;;  %v3893_v17 = vld [vmem:[#allocation5 + $0xac8] sm:$0xff] }
 0x536   : > { %2737 = vmatpush2.msra.mxu0 %v3848_v19  ;;  %2593 = vmatprep.subr.mxu1 %v3849_v20  ;;  %v3894_v18 = vld [vmem:[#allocation5 + $0xce8] sm:$0xff]  ;;  %v3895_v19 = vld [vmem:[#allocation5 + $0xac0] sm:$0xff] }
 0x537   : > { %2738 = vmatprep.subr.mxu0 %v3850_v57  ;;  %2594 = vmatpush2.msra.mxu1 %v3851_v21  ;;  %v3896_v20 = vld [vmem:[#allocation5 + $0xce0] sm:$0xff]  ;;  %v3897_v57 = vld [vmem:[#allocation5 + $0xab8] sm:$0xff] }
 0x538   : > { %2739 = vmatpush2.msra.mxu0 %v3852_v22  ;;  %2595 = vmatprep.subr.mxu1 %v3853_v23  ;;  %v3898_v21 = vld [vmem:[#allocation5 + $0xcd8] sm:$0xff]  ;;  %v3899_v22 = vld [vmem:[#allocation5 + $0xab0] sm:$0xff] }
 0x539   : > { %2740 = vmatprep.subr.mxu0 %v3854_v32  ;;  %2596 = vmatpush2.msra.mxu1 %v3855_v24  ;;  %v3900_v23 = vld [vmem:[#allocation5 + $0xcd0] sm:$0xff]  ;;  %v3901_v32 = vld [vmem:[#allocation5 + $0xaa8] sm:$0xff] }
 0x53a   : > { %2741 = vmatpush2.msra.mxu0 %v3856_v25  ;;  %2597 = vmatprep.subr.mxu1 %v3857_v26  ;;  %v3902_v24 = vld [vmem:[#allocation5 + $0xcc8] sm:$0xff]  ;;  %v3903_v25 = vld [vmem:[#allocation5 + $0xaa0] sm:$0xff] }
 0x53b   : > { %2742 = vmatprep.subr.mxu0 %v3858_v27  ;;  %2598 = vmatpush2.msra.mxu1 %v3859_v28  ;;  %v3904_v26 = vld [vmem:[#allocation5 + $0xcc0] sm:$0xff]  ;;  %v3905_v27 = vld [vmem:[#allocation5 + $0xa98] sm:$0xff] }
 0x53c   : > { %2743 = vmatpush2.msra.mxu0 %v3860_v29  ;;  %2599 = vmatprep.subr.mxu1 %v3861_v31  ;;  %v3906_v28 = vld [vmem:[#allocation5 + $0xcb8] sm:$0xff]  ;;  %v3907_v29 = vld [vmem:[#allocation5 + $0xa90] sm:$0xff] }
 0x53d   : > { %2744 = vmatprep.subr.mxu0 %v3862_v33  ;;  %2600 = vmatpush2.msra.mxu1 %v3863_v35  ;;  %v3908_v31 = vld [vmem:[#allocation5 + $0xcb0] sm:$0xff]  ;;  %v3909_v33 = vld [vmem:[#allocation5 + $0xa88] sm:$0xff] }
 0x53e   : > { %2745 = vmatpush2.msra.mxu0 %v3864_v37  ;;  %2601 = vmatprep.subr.mxu1 %v3865_v38  ;;  %v3910_v35 = vld [vmem:[#allocation5 + $0xca8] sm:$0xff]  ;;  %v3911_v37 = vld [vmem:[#allocation5 + $0xa80] sm:$0xff] }
 0x53f   : > { %2746 = vmatprep.subr.mxu0 %v3866_v39  ;;  %2602 = vmatpush2.msra.mxu1 %v3867_v40  ;;  %v3912_v38 = vld [vmem:[#allocation5 + $0xca0] sm:$0xff]  ;;  %v3913_v39 = vld [vmem:[#allocation5 + $0xa78] sm:$0xff] }
 0x540   : > { %2747 = vmatpush2.msra.mxu0 %v3868_v41  ;;  %2603 = vmatprep.subr.mxu1 %v3869_v42  ;;  %v3914_v40 = vld [vmem:[#allocation5 + $0xc98] sm:$0xff]  ;;  %v3915_v41 = vld [vmem:[#allocation5 + $0xa70] sm:$0xff] }
 0x541   : > { %2748 = vmatprep.subr.mxu0 %v3870_v44  ;;  %2604 = vmatpush2.msra.mxu1 %v3871_v46  ;;  %v3916_v42 = vld [vmem:[#allocation5 + $0xc90] sm:$0xff]  ;;  %v3917_v44 = vld [vmem:[#allocation5 + $0xa68] sm:$0xff] }
 0x542   : > { %2749 = vmatpush2.msra.mxu0 %v3872_v47  ;;  %2605 = vmatprep.subr.mxu1 %v3873_v48  ;;  %v3918_v46 = vld [vmem:[#allocation5 + $0xc88] sm:$0xff]  ;;  %v3919_v47 = vld [vmem:[#allocation5 + $0xa60] sm:$0xff] }
 0x543   : > { %2750 = vmatprep.subr.mxu0 %v3874_v49  ;;  %2606 = vmatpush2.msra.mxu1 %v3875_v50  ;;  %v3920_v48 = vld [vmem:[#allocation5 + $0xc80] sm:$0xff]  ;;  %v3921_v49 = vld [vmem:[#allocation5 + $0xa58] sm:$0xff] }
 0x544   : > { %2751 = vmatpush2.msra.mxu0 %v3876_v51  ;;  %2607 = vmatprep.subr.mxu1 %v3877_v52  ;;  %v3922_v50 = vld [vmem:[#allocation5 + $0xc78] sm:$0xff]  ;;  %v3923_v51 = vld [vmem:[#allocation5 + $0xa50] sm:$0xff] }
 0x545   : > { %2752 = vmatprep.subr.mxu0 %v3878_v53  ;;  %2608 = vmatpush2.msra.mxu1 %v3879_v54  ;;  %v3924_v52 = vld [vmem:[#allocation5 + $0xc70] sm:$0xff]  ;;  %v3925_v53 = vld [vmem:[#allocation5 + $0xa48] sm:$0xff] }
 0x546   : > { %2753 = vmatpush2.msra.mxu0 %v3880_v55  ;;  %3543 = vmatprep.subr.msk.mxu1 %vm2097_vm4, %v4541_v1  ;;  %v3926_v54 = vld [vmem:[#allocation5 + $0xc68] sm:$0xff]  ;;  %v3927_v55 = vld [vmem:[#allocation5 + $0xa40] sm:$0xff] }
 0x547   : > { %2754 = vmatprep.subr.mxu0 %v3881_v56  ;;  %v3928_v56 = vld [vmem:[#allocation5 + $0xc60] sm:$0xff] }
 0x548   : > { %2755 = vmatpush2.msra.mxu0 %v3882_v58  ;;  %v3929_v58 = vld [vmem:[#allocation5 + $0xa38] sm:$0xff] }
 0x549   : > { %2756 = vmatprep.subr.mxu0 %v3883_v2  ;;  %v3930_v2 = vld [vmem:[#allocation5 + $0xc58] sm:$0xff] }
 0x54a   : > { %2757 = vmatpush2.msra.mxu0 %v3884_v59  ;;  %v3931_v59 = vld [vmem:[#allocation5 + $0xa30] sm:$0xff] }
 0x54b   : > { %3547 = vmatprep.subr.msk.mxu0 %vm2097_vm4, %v4541_v1 }
 0x5c2   : > { %v2241_v36 = vpop.f32.mrf.mxu1 }
 0x5c3   : > { %v2316_v61 = vadd.f32 %v4574_v43, %v2241_v36  ;;  %v3542_v43 = vld [vmem:[%s4682_s3 + $0x14] sm:$0xf]  ;;  %v3932_v36 = vld [vmem:[#allocation5 + $0xc50] sm:$0xff] }
 0x5c4   : > { %v2243_v60 = vpop.f32.mrf.mxu1 }
 0x5c5   : > { %v2318_v3 = vadd.f32 %v4576_v45, %v2243_v60  ;;  %v3933_v60 = vld [vmem:[#allocation5 + $0xa28] sm:$0xff] }
 0x5c6   : > { %v2540_v62 = vpop.f32.mrf.mxu1 }
 0x5c7   : > { %v2462_v63 = vpop.f32.mrf.mxu0 }
 0x5c8   : > { %v4598_v4 = vadd.f32 %v2462_v63, %v2316_v61  ;;  %v2542_v5 = vpop.f32.mrf.mxu1  ;;  %v3934_v61 = vld [vmem:[#allocation5 + $0xc48] sm:$0xff]  ;;  %v3936_v63 = vld [vmem:[#allocation5 + $0xc40] sm:$0xff] }
 0x5c9   : > { %v2464_v6 = vpop.f32.mrf.mxu0  ;;  %2609 = vmatprep.mubr.f32.mxu1 %v2542_v5  ;;  %v3938_v5 = vld [vmem:[#allocation5 + $0xc38] sm:$0xff] }
 0x5ca   : > { %v4600_v7 = vadd.f32 %v2464_v6, %v2318_v3  ;;  %2610 = vmatmul.mubr.f32.vlgmr.msra.gmra.mxu1 %v2540_v62  ;;  %v3935_v62 = vld [vmem:[#allocation5 + $0xa20] sm:$0xff]  ;;  %v3937_v3 = vld [vmem:[#allocation5 + $0xa18] sm:$0xff]  ;;  %v3939_v6 = vld [vmem:[#allocation5 + $0xa10] sm:$0xff] }
 0x5cb   : > { %v2689_v8 = vpop.f32.mrf.mxu0  ;;  %3544 = vmatpush1.msk.msra.mxu1 %vm2097_vm4, %v4546_v30  ;;  %2836 = vmatprep.mubr.f32.mxu1 %v4269_v0 }
 0x5cc   : > { %2843 = vmatprep.subr.mxu1 %v3885_v34  ;;  %v3942_v34 = vld [vmem:[#allocation5 + $0xc28] sm:$0xff] }
 0x5cd   : > { %v2691_v45 = vpop.f32.mrf.mxu0 }
 0x5ce   : > { %2758 = vmatprep.mubr.f32.mxu0 %v2691_v45  ;;  %3545 = vmatmul.mubr.msk.f32.vlgmr.msra.gmra.mxu1 %vm2093_vm5, %v3542_v43  ;;  %v3941_v43 = vld [vmem:[#allocation5 + $0xa08] sm:$0xff]  ;;  %v3943_v45 = vld [vmem:[#allocation5 + $0xa00] sm:$0xff] }
 0x5cf   : > { %2759 = vmatmul.mubr.f32.vlgmr.msra.gmra.mxu0 %v2689_v8  ;;  %2844 = vmatpush1.msra.mxu1 %v3886_v9  ;;  %v3940_v8 = vld [vmem:[#allocation5 + $0xc30] sm:$0xff]  ;;  %v3944_v9 = vld [vmem:[#allocation5 + $0xc20] sm:$0xff] }
 0x5d0   : > { %3548 = vmatpush1.msk.msra.mxu0 %vm2097_vm4, %v4546_v30  ;;  %2845 = vmatprep.subr.mxu1 %v3887_v10  ;;  %v3945_v10 = vld [vmem:[#allocation5 + $0xbf8] sm:$0xff] }
 0x5d1   : > { %2846 = vmatpush1.msra.mxu1 %v3888_v12  ;;  %2985 = vmatprep.mubr.f32.mxu0 %v4269_v0  ;;  %v3947_v12 = vld [vmem:[#allocation5 + $0xbf0] sm:$0xff] }
 0x5d2   : > { %2847 = vmatprep.subr.mxu1 %v3889_v13  ;;  %2992 = vmatprep.subr.mxu0 %v3890_v14  ;;  %v3948_v13 = vld [vmem:[#allocation5 + $0xc10] sm:$0xff]  ;;  %v3949_v14 = vld [vmem:[#allocation5 + $0xbe8] sm:$0xff] }
 0x5d3   : > { %2848 = vmatpush1.msra.mxu1 %v3891_v15  ;;  %3549 = vmatmul.mubr.msk.f32.vlgmr.msra.gmra.mxu0 %vm2093_vm5, %v3546_v11  ;;  %v3946_v11 = vld [vmem:[#allocation5 + $0xc18] sm:$0xff]  ;;  %v3950_v15 = vld [vmem:[#allocation5 + $0xc08] sm:$0xff] }
 0x5d4   : > { %2993 = vmatpush1.msra.mxu0 %v3892_v16  ;;  %2849 = vmatprep.subr.mxu1 %v3893_v17  ;;  %v3951_v16 = vld [vmem:[#allocation5 + $0xbe0] sm:$0xff] }
 0x5d5   : > { %2994 = vmatprep.subr.mxu0 %v3894_v18  ;;  %2850 = vmatpush1.msra.mxu1 %v3895_v19  ;;  %v3952_v17 = vld [vmem:[#allocation5 + $0xc00] sm:$0xff]  ;;  %v3953_v18 = vld [vmem:[#allocation5 + $0xbd8] sm:$0xff] }
 0x5d6   : > { %2995 = vmatpush1.msra.mxu0 %v3896_v20  ;;  %2851 = vmatprep.subr.mxu1 %v3897_v57  ;;  %v3954_v19 = vld [vmem:[#allocation5 + $0xdf8] sm:$0xff]  ;;  %v3955_v20 = vld [vmem:[#allocation5 + $0xbd0] sm:$0xff] }
 0x5d7   : > { %2996 = vmatprep.subr.mxu0 %v3898_v21  ;;  %2852 = vmatpush1.msra.mxu1 %v3899_v22  ;;  %v3956_v57 = vld [vmem:[#allocation5 + $0xdf0] sm:$0xff]  ;;  %v3957_v21 = vld [vmem:[#allocation5 + $0xbc8] sm:$0xff] }
 0x5d8   : > { %2997 = vmatpush1.msra.mxu0 %v3900_v23  ;;  %2853 = vmatprep.subr.mxu1 %v3901_v32  ;;  %v3958_v22 = vld [vmem:[#allocation5 + $0xde8] sm:$0xff]  ;;  %v3959_v23 = vld [vmem:[#allocation5 + $0xbc0] sm:$0xff] }
 0x5d9   : > { %2998 = vmatprep.subr.mxu0 %v3902_v24  ;;  %2854 = vmatpush1.msra.mxu1 %v3903_v25  ;;  %v3960_v32 = vld [vmem:[#allocation5 + $0xde0] sm:$0xff]  ;;  %v3961_v24 = vld [vmem:[#allocation5 + $0xbb8] sm:$0xff] }
 0x5da   : > { %2999 = vmatpush1.msra.mxu0 %v3904_v26  ;;  %2855 = vmatprep.subr.mxu1 %v3905_v27  ;;  %v3962_v25 = vld [vmem:[#allocation5 + $0xdd8] sm:$0xff]  ;;  %v3963_v26 = vld [vmem:[#allocation5 + $0xbb0] sm:$0xff] }
 0x5db   : > { %3000 = vmatprep.subr.mxu0 %v3906_v28  ;;  %2856 = vmatpush1.msra.mxu1 %v3907_v29  ;;  %v3964_v27 = vld [vmem:[#allocation5 + $0xdd0] sm:$0xff]  ;;  %v3965_v28 = vld [vmem:[#allocation5 + $0xba8] sm:$0xff] }
 0x5dc   : > { %3001 = vmatpush1.msra.mxu0 %v3908_v31  ;;  %2857 = vmatprep.subr.mxu1 %v3909_v33  ;;  %v3966_v29 = vld [vmem:[#allocation5 + $0xdc8] sm:$0xff]  ;;  %v3967_v31 = vld [vmem:[#allocation5 + $0xba0] sm:$0xff] }
 0x5dd   : > { %3002 = vmatprep.subr.mxu0 %v3910_v35  ;;  %2858 = vmatpush1.msra.mxu1 %v3911_v37  ;;  %v3968_v33 = vld [vmem:[#allocation5 + $0xdc0] sm:$0xff]  ;;  %v3969_v35 = vld [vmem:[#allocation5 + $0xb98] sm:$0xff] }
 0x5de   : > { %3003 = vmatpush1.msra.mxu0 %v3912_v38  ;;  %2859 = vmatprep.subr.mxu1 %v3913_v39  ;;  %v3970_v37 = vld [vmem:[#allocation5 + $0xdb8] sm:$0xff]  ;;  %v3971_v38 = vld [vmem:[#allocation5 + $0xb90] sm:$0xff] }
 0x5df   : > { %3004 = vmatprep.subr.mxu0 %v3914_v40  ;;  %2860 = vmatpush1.msra.mxu1 %v3915_v41  ;;  %v3972_v39 = vld [vmem:[#allocation5 + $0xdb0] sm:$0xff]  ;;  %v3973_v40 = vld [vmem:[#allocation5 + $0xb88] sm:$0xff] }
 0x5e0   : > { %3005 = vmatpush1.msra.mxu0 %v3916_v42  ;;  %2861 = vmatprep.subr.mxu1 %v3917_v44  ;;  %v3974_v41 = vld [vmem:[#allocation5 + $0xda8] sm:$0xff]  ;;  %v3975_v42 = vld [vmem:[#allocation5 + $0xb80] sm:$0xff] }
 0x5e1   : > { %3006 = vmatprep.subr.mxu0 %v3918_v46  ;;  %2862 = vmatpush1.msra.mxu1 %v3919_v47  ;;  %v3976_v44 = vld [vmem:[#allocation5 + $0xda0] sm:$0xff]  ;;  %v3977_v46 = vld [vmem:[#allocation5 + $0xb78] sm:$0xff] }
 0x5e2   : > { %3007 = vmatpush1.msra.mxu0 %v3920_v48  ;;  %2863 = vmatprep.subr.mxu1 %v3921_v49  ;;  %v3978_v47 = vld [vmem:[#allocation5 + $0xd98] sm:$0xff]  ;;  %v3979_v48 = vld [vmem:[#allocation5 + $0xb70] sm:$0xff] }
 0x5e3   : > { %3008 = vmatprep.subr.mxu0 %v3922_v50  ;;  %2864 = vmatpush1.msra.mxu1 %v3923_v51  ;;  %v3980_v49 = vld [vmem:[#allocation5 + $0xd90] sm:$0xff]  ;;  %v3981_v50 = vld [vmem:[#allocation5 + $0xb68] sm:$0xff] }
 0x5e4   : > { %3009 = vmatpush1.msra.mxu0 %v3924_v52  ;;  %2865 = vmatprep.subr.mxu1 %v3925_v53  ;;  %v3982_v51 = vld [vmem:[#allocation5 + $0xd88] sm:$0xff]  ;;  %v3983_v52 = vld [vmem:[#allocation5 + $0xb60] sm:$0xff] }
 0x5e5   : > { %3010 = vmatprep.subr.mxu0 %v3926_v54  ;;  %2866 = vmatpush1.msra.mxu1 %v3927_v55  ;;  %v3984_v53 = vld [vmem:[#allocation5 + $0xd80] sm:$0xff]  ;;  %v3985_v54 = vld [vmem:[#allocation5 + $0xb58] sm:$0xff] }
 0x5e6   : > { %3011 = vmatpush1.msra.mxu0 %v3928_v56  ;;  %2867 = vmatprep.subr.mxu1 %v3929_v58  ;;  %v3986_v55 = vld [vmem:[#allocation5 + $0xd78] sm:$0xff]  ;;  %v3987_v56 = vld [vmem:[#allocation5 + $0xb50] sm:$0xff] }
 0x5e7   : > { %3012 = vmatprep.subr.mxu0 %v3930_v2  ;;  %2868 = vmatpush1.msra.mxu1 %v3931_v59  ;;  %v3988_v58 = vld [vmem:[#allocation5 + $0xd70] sm:$0xff]  ;;  %v3989_v2 = vld [vmem:[#allocation5 + $0xb48] sm:$0xff] }
 0x5e8   : > { %3013 = vmatpush1.msra.mxu0 %v3932_v36  ;;  %2869 = vmatprep.subr.mxu1 %v3933_v60  ;;  %v3990_v59 = vld [vmem:[#allocation5 + $0xd68] sm:$0xff]  ;;  %v3991_v36 = vld [vmem:[#allocation5 + $0xb40] sm:$0xff] }
 0x5e9   : > { %3014 = vmatprep.subr.mxu0 %v3934_v61  ;;  %2870 = vmatpush1.msra.mxu1 %v3935_v62  ;;  %v3992_v60 = vld [vmem:[#allocation5 + $0xd60] sm:$0xff]  ;;  %v3993_v61 = vld [vmem:[#allocation5 + $0xb38] sm:$0xff] }
 0x5ea   : > { %3015 = vmatpush1.msra.mxu0 %v3936_v63  ;;  %2871 = vmatprep.subr.mxu1 %v3937_v3  ;;  %v3994_v62 = vld [vmem:[#allocation5 + $0xd58] sm:$0xff]  ;;  %v3995_v63 = vld [vmem:[#allocation5 + $0xb30] sm:$0xff] }
 0x5eb   : > { %3016 = vmatprep.subr.mxu0 %v3938_v5  ;;  %2872 = vmatpush1.msra.mxu1 %v3939_v6  ;;  %v3996_v3 = vld [vmem:[#allocation5 + $0xd50] sm:$0xff]  ;;  %v3997_v5 = vld [vmem:[#allocation5 + $0xb28] sm:$0xff] }
 0x5ec   : > { %3017 = vmatpush1.msra.mxu0 %v3940_v8  ;;  %2873 = vmatprep.subr.mxu1 %v3941_v43  ;;  %v3998_v6 = vld [vmem:[#allocation5 + $0xd48] sm:$0xff]  ;;  %v3999_v8 = vld [vmem:[#allocation5 + $0xb20] sm:$0xff] }
 0x5ed   : > { %3018 = vmatprep.subr.mxu0 %v3942_v34  ;;  %2874 = vmatpush1.msra.mxu1 %v3943_v45  ;;  %v4000_v43 = vld [vmem:[#allocation5 + $0xd40] sm:$0xff]  ;;  %v4001_v34 = vld [vmem:[#allocation5 + $0xb18] sm:$0xff] }
 0x5ee   : > { %3019 = vmatpush1.msra.mxu0 %v3944_v9  ;;  %2875 = vmatprep.subr.mxu1 %v3945_v10  ;;  %v4002_v45 = vld [vmem:[#allocation5 + $0xd38] sm:$0xff]  ;;  %v4003_v9 = vld [vmem:[#allocation5 + $0xb10] sm:$0xff] }
 0x5ef   : > { %3020 = vmatprep.subr.mxu0 %v3946_v11  ;;  %2876 = vmatpush2.msra.mxu1 %v3947_v12  ;;  %v4004_v10 = vld [vmem:[#allocation5 + $0xd30] sm:$0xff]  ;;  %v4005_v11 = vld [vmem:[#allocation5 + $0xb08] sm:$0xff] }
 0x5f0   : > { %3021 = vmatpush1.msra.mxu0 %v3948_v13  ;;  %2877 = vmatprep.subr.mxu1 %v3949_v14  ;;  %v4006_v12 = vld [vmem:[#allocation5 + $0xd28] sm:$0xff]  ;;  %v4007_v13 = vld [vmem:[#allocation5 + $0xb00] sm:$0xff] }
 0x5f1   : > { %3022 = vmatprep.subr.mxu0 %v3950_v15  ;;  %2878 = vmatpush2.msra.mxu1 %v3951_v16  ;;  %v4008_v14 = vld [vmem:[#allocation5 + $0xd20] sm:$0xff]  ;;  %v4009_v15 = vld [vmem:[#allocation5 + $0xd18] sm:$0xff]  ;;  %v4010_v16 = vld [vmem:[#allocation5 + $0xd10] sm:$0xff] }
 0x5f2   : > { %3023 = vmatpush1.msra.mxu0 %v3952_v17  ;;  %2879 = vmatprep.subr.mxu1 %v3953_v18  ;;  %v4011_v17 = vld [vmem:[#allocation5 + $0xd08] sm:$0xff]  ;;  %v4012_v18 = vld [vmem:[#allocation5 + $0xd00] sm:$0xff] }
 0x5f3   : > { %3024 = vmatprep.subr.mxu0 %v3954_v19  ;;  %2880 = vmatpush2.msra.mxu1 %v3955_v20 }
 0x5f4   : > { %3025 = vmatpush2.msra.mxu0 %v3956_v57  ;;  %2881 = vmatprep.subr.mxu1 %v3957_v21 }
 0x5f5   : > { %3026 = vmatprep.subr.mxu0 %v3958_v22  ;;  %2882 = vmatpush2.msra.mxu1 %v3959_v23 }
 0x5f6   : > { %3027 = vmatpush2.msra.mxu0 %v3960_v32  ;;  %2883 = vmatprep.subr.mxu1 %v3961_v24 }
 0x5f7   : > { %3028 = vmatprep.subr.mxu0 %v3962_v25  ;;  %2884 = vmatpush2.msra.mxu1 %v3963_v26 }
 0x5f8   : > { %3029 = vmatpush2.msra.mxu0 %v3964_v27  ;;  %2885 = vmatprep.subr.mxu1 %v3965_v28  ;;  %v4014_v28 = vld [vmem:[#allocation5 + $0xef0] sm:$0xff] }
 0x5f9   : > { %3030 = vmatprep.subr.mxu0 %v3966_v29  ;;  %2886 = vmatpush2.msra.mxu1 %v3967_v31  ;;  %v3554_v29 = vld [vmem:[%s4682_s3 + $0x20] sm:$0xf]  ;;  %v4015_v31 = vld [vmem:[#allocation5 + $0xee8] sm:$0xff] }
 0x5fa   : > { %3031 = vmatpush2.msra.mxu0 %v3968_v33  ;;  %2887 = vmatprep.subr.mxu1 %v3969_v35  ;;  %v4016_v33 = vld [vmem:[#allocation5 + $0x10f8] sm:$0xff]  ;;  %v4017_v35 = vld [vmem:[#allocation5 + $0xee0] sm:$0xff] }
 0x5fb   : > { %3032 = vmatprep.subr.mxu0 %v3970_v37  ;;  %2888 = vmatpush2.msra.mxu1 %v3971_v38  ;;  %v4018_v37 = vld [vmem:[#allocation5 + $0xed8] sm:$0xff]  ;;  %v4019_v38 = vld [vmem:[#allocation5 + $0xed0] sm:$0xff] }
 0x5fc   : > { %3033 = vmatpush2.msra.mxu0 %v3972_v39  ;;  %2889 = vmatprep.subr.mxu1 %v3973_v40  ;;  %v4020_v39 = vld [vmem:[#allocation5 + $0x10f0] sm:$0xff]  ;;  %v4023_v40 = vld [vmem:[#allocation5 + $0xec0] sm:$0xff] }
 0x5fd   : > { %3034 = vmatprep.subr.mxu0 %v3974_v41  ;;  %2890 = vmatpush2.msra.mxu1 %v3975_v42  ;;  %v4024_v41 = vld [vmem:[#allocation5 + $0x10e0] sm:$0xff]  ;;  %v4025_v42 = vld [vmem:[#allocation5 + $0xeb8] sm:$0xff] }
 0x5fe   : > { %3035 = vmatpush2.msra.mxu0 %v3976_v44  ;;  %2891 = vmatprep.subr.mxu1 %v3977_v46  ;;  %v4026_v44 = vld [vmem:[#allocation5 + $0x10d8] sm:$0xff]  ;;  %v4027_v46 = vld [vmem:[#allocation5 + $0xeb0] sm:$0xff] }
 0x5ff   : > { %3036 = vmatprep.subr.mxu0 %v3978_v47  ;;  %2892 = vmatpush2.msra.mxu1 %v3979_v48  ;;  %v4028_v47 = vld [vmem:[#allocation5 + $0x10d0] sm:$0xff]  ;;  %v4029_v48 = vld [vmem:[#allocation5 + $0xea8] sm:$0xff] }
 0x600   : > { %3037 = vmatpush2.msra.mxu0 %v3980_v49  ;;  %2893 = vmatprep.subr.mxu1 %v3981_v50  ;;  %v4030_v49 = vld [vmem:[#allocation5 + $0x10c8] sm:$0xff]  ;;  %v4031_v50 = vld [vmem:[#allocation5 + $0xea0] sm:$0xff] }
 0x601   : > { %3038 = vmatprep.subr.mxu0 %v3982_v51  ;;  %2894 = vmatpush2.msra.mxu1 %v3983_v52  ;;  %v4032_v51 = vld [vmem:[#allocation5 + $0x10c0] sm:$0xff]  ;;  %v4033_v52 = vld [vmem:[#allocation5 + $0xe98] sm:$0xff] }
 0x602   : > { %3039 = vmatpush2.msra.mxu0 %v3984_v53  ;;  %2895 = vmatprep.subr.mxu1 %v3985_v54  ;;  %v4034_v53 = vld [vmem:[#allocation5 + $0x10b8] sm:$0xff]  ;;  %v4035_v54 = vld [vmem:[#allocation5 + $0xe90] sm:$0xff] }
 0x603   : > { %3040 = vmatprep.subr.mxu0 %v3986_v55  ;;  %2896 = vmatpush2.msra.mxu1 %v3987_v56  ;;  %v4036_v55 = vld [vmem:[#allocation5 + $0x10b0] sm:$0xff]  ;;  %v4037_v56 = vld [vmem:[#allocation5 + $0xe88] sm:$0xff] }
 0x604   : > { %3041 = vmatpush2.msra.mxu0 %v3988_v58  ;;  %2897 = vmatprep.subr.mxu1 %v3989_v2  ;;  %v4038_v58 = vld [vmem:[#allocation5 + $0x10a8] sm:$0xff]  ;;  %v4039_v2 = vld [vmem:[#allocation5 + $0xe80] sm:$0xff] }
 0x605   : > { %3042 = vmatprep.subr.mxu0 %v3990_v59  ;;  %2898 = vmatpush2.msra.mxu1 %v3991_v36  ;;  %v4040_v59 = vld [vmem:[#allocation5 + $0x10a0] sm:$0xff]  ;;  %v4041_v36 = vld [vmem:[#allocation5 + $0xe78] sm:$0xff] }
 0x606   : > { %3043 = vmatpush2.msra.mxu0 %v3992_v60  ;;  %2899 = vmatprep.subr.mxu1 %v3993_v61  ;;  %v4042_v60 = vld [vmem:[#allocation5 + $0x1098] sm:$0xff]  ;;  %v4043_v61 = vld [vmem:[#allocation5 + $0xe70] sm:$0xff] }
 0x607   : > { %3044 = vmatprep.subr.mxu0 %v3994_v62  ;;  %2900 = vmatpush2.msra.mxu1 %v3995_v63  ;;  %v4044_v62 = vld [vmem:[#allocation5 + $0x1090] sm:$0xff]  ;;  %v4045_v63 = vld [vmem:[#allocation5 + $0xe68] sm:$0xff] }
 0x608   : > { %3045 = vmatpush2.msra.mxu0 %v3996_v3  ;;  %2901 = vmatprep.subr.mxu1 %v3997_v5  ;;  %v4046_v3 = vld [vmem:[#allocation5 + $0x1088] sm:$0xff]  ;;  %v4047_v5 = vld [vmem:[#allocation5 + $0xe60] sm:$0xff] }
 0x609   : > { %3046 = vmatprep.subr.mxu0 %v3998_v6  ;;  %2902 = vmatpush2.msra.mxu1 %v3999_v8  ;;  %v4048_v6 = vld [vmem:[#allocation5 + $0x1080] sm:$0xff]  ;;  %v4049_v8 = vld [vmem:[#allocation5 + $0xe58] sm:$0xff] }
 0x60a   : > { %3047 = vmatpush2.msra.mxu0 %v4000_v43  ;;  %2903 = vmatprep.subr.mxu1 %v4001_v34  ;;  %v4050_v43 = vld [vmem:[#allocation5 + $0x1078] sm:$0xff]  ;;  %v4051_v34 = vld [vmem:[#allocation5 + $0xe50] sm:$0xff] }
 0x60b   : > { %3048 = vmatprep.subr.mxu0 %v4002_v45  ;;  %2904 = vmatpush2.msra.mxu1 %v4003_v9  ;;  %v4052_v45 = vld [vmem:[#allocation5 + $0x1070] sm:$0xff]  ;;  %v4053_v9 = vld [vmem:[#allocation5 + $0xe48] sm:$0xff] }
 0x60c   : > { %3049 = vmatpush2.msra.mxu0 %v4004_v10  ;;  %2905 = vmatprep.subr.mxu1 %v4005_v11  ;;  %v4054_v10 = vld [vmem:[#allocation5 + $0x1068] sm:$0xff]  ;;  %v4055_v11 = vld [vmem:[#allocation5 + $0xe40] sm:$0xff] }
 0x60d   : > { %3050 = vmatprep.subr.mxu0 %v4006_v12  ;;  %2906 = vmatpush2.msra.mxu1 %v4007_v13  ;;  %v4056_v12 = vld [vmem:[#allocation5 + $0x1060] sm:$0xff]  ;;  %v4057_v13 = vld [vmem:[#allocation5 + $0xe38] sm:$0xff] }
 0x60e   : > { %3051 = vmatpush2.msra.mxu0 %v4008_v14  ;;  %3551 = vmatprep.subr.msk.mxu1 %vm2097_vm4, %v4541_v1  ;;  %v4058_v14 = vld [vmem:[#allocation5 + $0x1058] sm:$0xff] }
 0x60f   : > { %3052 = vmatprep.subr.mxu0 %v4009_v15  ;;  %v4059_v15 = vld [vmem:[#allocation5 + $0xe30] sm:$0xff] }
 0x610   : > { %3053 = vmatpush2.msra.mxu0 %v4010_v16  ;;  %v4060_v16 = vld [vmem:[#allocation5 + $0x1050] sm:$0xff] }
 0x611   : > { %3054 = vmatprep.subr.mxu0 %v4011_v17  ;;  %v4061_v17 = vld [vmem:[#allocation5 + $0xe28] sm:$0xff] }
 0x612   : > { %3055 = vmatpush2.msra.mxu0 %v4012_v18  ;;  %v4062_v18 = vld [vmem:[#allocation5 + $0x1048] sm:$0xff] }
 0x613   : > { %3555 = vmatprep.subr.msk.mxu0 %vm2097_vm4, %v4541_v1  ;;  %v3550_v1 = vld [vmem:[%s4682_s3 + $0x1c] sm:$0xf] }
 0x68a   : > { %v2611_v19 = vpop.f32.mrf.mxu1 }
 0x68b   : > { %v2616_v20 = vadd.f32 %v2611_v19, %v4598_v4  ;;  %v4013_v4 = vld [vmem:[#allocation5 + $0xef8] sm:$0xff]  ;;  %v4063_v19 = vld [vmem:[#allocation5 + $0xe20] sm:$0xff] }
 0x68c   : > { %v2613_v57 = vpop.f32.mrf.mxu1 }
 0x68d   : > { %v2617_v21 = vadd.f32 %v2613_v57, %v4600_v7  ;;  %v4065_v57 = vld [vmem:[#allocation5 + $0xe18] sm:$0xff] }
 0x68e   : > { %v2838_v22 = vpop.f32.mrf.mxu1 }
 0x68f   : > { %v2760_v23 = vpop.f32.mrf.mxu0 }
 0x690   : > { %v4622_v32 = vadd.f32 %v2760_v23, %v2616_v20  ;;  %v2840_v24 = vpop.f32.mrf.mxu1  ;;  %v4064_v20 = vld [vmem:[#allocation5 + $0x1040] sm:$0xff]  ;;  %v4068_v23 = vld [vmem:[#allocation5 + $0x1030] sm:$0xff] }
 0x691   : > { %v2762_v25 = vpop.f32.mrf.mxu0  ;;  %2907 = vmatprep.mubr.f32.mxu1 %v2840_v24  ;;  %v4069_v24 = vld [vmem:[#allocation5 + $0xe08] sm:$0xff] }
 0x692   : > { %v4624_v26 = vadd.f32 %v2762_v25, %v2617_v21  ;;  %2908 = vmatmul.mubr.f32.vlgmr.msra.gmra.mxu1 %v2838_v22  ;;  %v4066_v21 = vld [vmem:[#allocation5 + $0x1038] sm:$0xff]  ;;  %v4067_v22 = vld [vmem:[#allocation5 + $0xe10] sm:$0xff]  ;;  %v4070_v25 = vld [vmem:[#allocation5 + $0x1028] sm:$0xff] }
 0x693   : > { %v2987_v27 = vpop.f32.mrf.mxu0  ;;  %3552 = vmatpush1.msk.msra.mxu1 %vm2097_vm4, %v4546_v30  ;;  %3134 = vmatprep.mubr.f32.mxu1 %v4269_v0 }
 0x694   : > { %3141 = vmatprep.subr.mxu1 %v4013_v4  ;;  %v4073_v4 = vld [vmem:[#allocation5 + $0xff8] sm:$0xff] }
 0x695   : > { %v2989_v7 = vpop.f32.mrf.mxu0 }
 0x696   : > { %3056 = vmatprep.mubr.f32.mxu0 %v2989_v7  ;;  %3553 = vmatmul.mubr.msk.f32.vlgmr.msra.gmra.mxu1 %vm2093_vm5, %v3550_v1  ;;  %v4072_v1 = vld [vmem:[#allocation5 + $0x1020] sm:$0xff]  ;;  %v4074_v7 = vld [vmem:[#allocation5 + $0x1018] sm:$0xff] }
 0x697   : > { %3057 = vmatmul.mubr.f32.vlgmr.msra.gmra.mxu0 %v2987_v27  ;;  %3142 = vmatpush1.msra.mxu1 %v4014_v28  ;;  %v4071_v27 = vld [vmem:[#allocation5 + $0xe00] sm:$0xff]  ;;  %v4075_v28 = vld [vmem:[#allocation5 + $0xff0] sm:$0xff] }
 0x698   : > { %3556 = vmatpush1.msk.msra.mxu0 %vm2097_vm4, %v4546_v30  ;;  %3283 = vmatprep.mubr.f32.mxu0 %v4269_v0  ;;  %v4021_v30 = vld [vmem:[#allocation5 + $0xec8] sm:$0xff] }
 0x699   : > { %3143 = vmatprep.subr.mxu1 %v4015_v31  ;;  %3290 = vmatprep.subr.mxu0 %v4016_v33  ;;  %v4022_v0 = vld [vmem:[#allocation5 + $0x10e8] sm:$0xff] }
 0x69a   : > { %3144 = vmatpush1.msra.mxu1 %v4017_v35  ;;  %v4077_v31 = vld [vmem:[#allocation5 + $0xfe8] sm:$0xff]  ;;  %v4079_v35 = vld [vmem:[#allocation5 + $0xfe0] sm:$0xff] }
 0x69b   : > { %3557 = vmatmul.mubr.msk.f32.vlgmr.msra.gmra.mxu0 %vm2093_vm5, %v3554_v29  ;;  %3145 = vmatprep.subr.mxu1 %v4018_v37  ;;  %v4076_v29 = vld [vmem:[#allocation5 + $0x1010] sm:$0xff]  ;;  %v4078_v33 = vld [vmem:[#allocation5 + $0x1008] sm:$0xff]  ;;  %v4080_v37 = vld [vmem:[#allocation5 + $0x1000] sm:$0xff] }
 0x69c   : > { %3146 = vmatpush1.msra.mxu1 %v4019_v38  ;;  %3291 = vmatpush1.msra.mxu0 %v4020_v39  ;;  %v4081_v38 = vld [vmem:[#allocation5 + $0xfd8] sm:$0xff] }
 0x69d   : > { %3147 = vmatprep.subr.mxu1 %v4021_v30  ;;  %3292 = vmatprep.subr.mxu0 %v4022_v0  ;;  %v4082_v39 = vld [vmem:[#allocation5 + $0x11f8] sm:$0xff]  ;;  %v4083_v30 = vld [vmem:[#allocation5 + $0xfd0] sm:$0xff] }
 0x69e   : > { %3148 = vmatpush1.msra.mxu1 %v4023_v40  ;;  %3293 = vmatpush1.msra.mxu0 %v4024_v41  ;;  %v4084_v0 = vld [vmem:[#allocation5 + $0x11f0] sm:$0xff]  ;;  %v4085_v40 = vld [vmem:[#allocation5 + $0xfc8] sm:$0xff] }
 0x69f   : > { %3149 = vmatprep.subr.mxu1 %v4025_v42  ;;  %3294 = vmatprep.subr.mxu0 %v4026_v44  ;;  %v4086_v41 = vld [vmem:[#allocation5 + $0x11e8] sm:$0xff]  ;;  %v4087_v42 = vld [vmem:[#allocation5 + $0xfc0] sm:$0xff] }
 0x6a0   : > { %3150 = vmatpush1.msra.mxu1 %v4027_v46  ;;  %3295 = vmatpush1.msra.mxu0 %v4028_v47  ;;  %v4088_v44 = vld [vmem:[#allocation5 + $0x11e0] sm:$0xff]  ;;  %v4089_v46 = vld [vmem:[#allocation5 + $0xfb8] sm:$0xff] }
 0x6a1   : > { %3151 = vmatprep.subr.mxu1 %v4029_v48  ;;  %3296 = vmatprep.subr.mxu0 %v4030_v49  ;;  %v4090_v47 = vld [vmem:[#allocation5 + $0x11d8] sm:$0xff]  ;;  %v4091_v48 = vld [vmem:[#allocation5 + $0xfb0] sm:$0xff] }
 0x6a2   : > { %3152 = vmatpush1.msra.mxu1 %v4031_v50  ;;  %3297 = vmatpush1.msra.mxu0 %v4032_v51  ;;  %v4092_v49 = vld [vmem:[#allocation5 + $0x11d0] sm:$0xff]  ;;  %v4093_v50 = vld [vmem:[#allocation5 + $0xfa8] sm:$0xff] }
 0x6a3   : > { %3153 = vmatprep.subr.mxu1 %v4033_v52  ;;  %3298 = vmatprep.subr.mxu0 %v4034_v53  ;;  %v4094_v51 = vld [vmem:[#allocation5 + $0x11c8] sm:$0xff]  ;;  %v4095_v52 = vld [vmem:[#allocation5 + $0xfa0] sm:$0xff] }
 0x6a4   : > { %3154 = vmatpush1.msra.mxu1 %v4035_v54  ;;  %3299 = vmatpush1.msra.mxu0 %v4036_v55  ;;  %v4096_v53 = vld [vmem:[#allocation5 + $0x11c0] sm:$0xff]  ;;  %v4097_v54 = vld [vmem:[#allocation5 + $0xf98] sm:$0xff] }
 0x6a5   : > { %3155 = vmatprep.subr.mxu1 %v4037_v56  ;;  %3300 = vmatprep.subr.mxu0 %v4038_v58  ;;  %v4098_v55 = vld [vmem:[#allocation5 + $0x11b8] sm:$0xff]  ;;  %v4099_v56 = vld [vmem:[#allocation5 + $0xf90] sm:$0xff] }
 0x6a6   : > { %3156 = vmatpush1.msra.mxu1 %v4039_v2  ;;  %3301 = vmatpush1.msra.mxu0 %v4040_v59  ;;  %v4100_v58 = vld [vmem:[#allocation5 + $0x11b0] sm:$0xff]  ;;  %v4101_v2 = vld [vmem:[#allocation5 + $0xf88] sm:$0xff] }
 0x6a7   : > { %3157 = vmatprep.subr.mxu1 %v4041_v36  ;;  %3302 = vmatprep.subr.mxu0 %v4042_v60  ;;  %v4102_v59 = vld [vmem:[#allocation5 + $0x11a8] sm:$0xff]  ;;  %v4103_v36 = vld [vmem:[#allocation5 + $0xf80] sm:$0xff] }
 0x6a8   : > { %3158 = vmatpush1.msra.mxu1 %v4043_v61  ;;  %3303 = vmatpush1.msra.mxu0 %v4044_v62  ;;  %v4104_v60 = vld [vmem:[#allocation5 + $0x11a0] sm:$0xff]  ;;  %v4105_v61 = vld [vmem:[#allocation5 + $0xf78] sm:$0xff] }
 0x6a9   : > { %3159 = vmatprep.subr.mxu1 %v4045_v63  ;;  %3304 = vmatprep.subr.mxu0 %v4046_v3  ;;  %v4106_v62 = vld [vmem:[#allocation5 + $0x1198] sm:$0xff]  ;;  %v4107_v63 = vld [vmem:[#allocation5 + $0xf70] sm:$0xff] }
 0x6aa   : > { %3160 = vmatpush1.msra.mxu1 %v4047_v5  ;;  %3305 = vmatpush1.msra.mxu0 %v4048_v6  ;;  %v4108_v3 = vld [vmem:[#allocation5 + $0x1190] sm:$0xff]  ;;  %v4109_v5 = vld [vmem:[#allocation5 + $0xf68] sm:$0xff] }
 0x6ab   : > { %3161 = vmatprep.subr.mxu1 %v4049_v8  ;;  %3306 = vmatprep.subr.mxu0 %v4050_v43  ;;  %v4110_v6 = vld [vmem:[#allocation5 + $0x1188] sm:$0xff]  ;;  %v4111_v8 = vld [vmem:[#allocation5 + $0xf60] sm:$0xff] }
 0x6ac   : > { %3162 = vmatpush1.msra.mxu1 %v4051_v34  ;;  %3307 = vmatpush1.msra.mxu0 %v4052_v45  ;;  %v4112_v43 = vld [vmem:[#allocation5 + $0x1180] sm:$0xff]  ;;  %v4113_v34 = vld [vmem:[#allocation5 + $0xf58] sm:$0xff] }
 0x6ad   : > { %3163 = vmatprep.subr.mxu1 %v4053_v9  ;;  %3308 = vmatprep.subr.mxu0 %v4054_v10  ;;  %v4114_v45 = vld [vmem:[#allocation5 + $0x1178] sm:$0xff]  ;;  %v4115_v9 = vld [vmem:[#allocation5 + $0xf50] sm:$0xff] }
 0x6ae   : > { %3164 = vmatpush1.msra.mxu1 %v4055_v11  ;;  %3309 = vmatpush1.msra.mxu0 %v4056_v12  ;;  %v4116_v10 = vld [vmem:[#allocation5 + $0x1170] sm:$0xff]  ;;  %v4117_v11 = vld [vmem:[#allocation5 + $0xf48] sm:$0xff] }
 0x6af   : > { %3165 = vmatprep.subr.mxu1 %v4057_v13  ;;  %3310 = vmatprep.subr.mxu0 %v4058_v14  ;;  %v4118_v12 = vld [vmem:[#allocation5 + $0x1168] sm:$0xff]  ;;  %v4119_v13 = vld [vmem:[#allocation5 + $0xf40] sm:$0xff] }
 0x6b0   : > { %3166 = vmatpush1.msra.mxu1 %v4059_v15  ;;  %3311 = vmatpush1.msra.mxu0 %v4060_v16  ;;  %v4120_v14 = vld [vmem:[#allocation5 + $0x1160] sm:$0xff]  ;;  %v4121_v15 = vld [vmem:[#allocation5 + $0xf38] sm:$0xff] }
 0x6b1   : > { %3167 = vmatprep.subr.mxu1 %v4061_v17  ;;  %3312 = vmatprep.subr.mxu0 %v4062_v18  ;;  %v4122_v16 = vld [vmem:[#allocation5 + $0x1158] sm:$0xff]  ;;  %v4123_v17 = vld [vmem:[#allocation5 + $0xf30] sm:$0xff] }
 0x6b2   : > { %3168 = vmatpush1.msra.mxu1 %v4063_v19  ;;  %3313 = vmatpush1.msra.mxu0 %v4064_v20  ;;  %v4124_v18 = vld [vmem:[#allocation5 + $0x1150] sm:$0xff]  ;;  %v4125_v19 = vld [vmem:[#allocation5 + $0xf28] sm:$0xff] }
 0x6b3   : > { %3169 = vmatprep.subr.mxu1 %v4065_v57  ;;  %3314 = vmatprep.subr.mxu0 %v4066_v21  ;;  %v4126_v20 = vld [vmem:[#allocation5 + $0x1148] sm:$0xff]  ;;  %v4127_v57 = vld [vmem:[#allocation5 + $0xf20] sm:$0xff] }
 0x6b4   : > { %3170 = vmatpush1.msra.mxu1 %v4067_v22  ;;  %3315 = vmatpush1.msra.mxu0 %v4068_v23  ;;  %v4128_v21 = vld [vmem:[#allocation5 + $0x1140] sm:$0xff]  ;;  %v4129_v22 = vld [vmem:[#allocation5 + $0xf18] sm:$0xff] }
 0x6b5   : > { %3171 = vmatprep.subr.mxu1 %v4069_v24  ;;  %3316 = vmatprep.subr.mxu0 %v4070_v25  ;;  %v4130_v23 = vld [vmem:[#allocation5 + $0x1138] sm:$0xff]  ;;  %v4131_v24 = vld [vmem:[#allocation5 + $0xf10] sm:$0xff] }
 0x6b6   : > { %3172 = vmatpush1.msra.mxu1 %v4071_v27  ;;  %3317 = vmatpush1.msra.mxu0 %v4072_v1  ;;  %v4132_v25 = vld [vmem:[#allocation5 + $0x1130] sm:$0xff]  ;;  %v4133_v27 = vld [vmem:[#allocation5 + $0xf08] sm:$0xff] }
 0x6b7   : > { %3173 = vmatprep.subr.mxu1 %v4073_v4  ;;  %3318 = vmatprep.subr.mxu0 %v4074_v7  ;;  %v4134_v1 = vld [vmem:[#allocation5 + $0x1128] sm:$0xff]  ;;  %v4135_v4 = vld [vmem:[#allocation5 + $0xf00] sm:$0xff] }
 0x6b8   : > { %3174 = vmatpush2.msra.mxu1 %v4075_v28  ;;  %3319 = vmatpush1.msra.mxu0 %v4076_v29  ;;  %v4136_v7 = vld [vmem:[#allocation5 + $0x1120] sm:$0xff]  ;;  %v4137_v28 = vld [vmem:[#allocation5 + $0x1118] sm:$0xff]  ;;  %v4138_v29 = vld [vmem:[#allocation5 + $0x1110] sm:$0xff] }
 0x6b9   : > { %3175 = vmatprep.subr.mxu1 %v4077_v31  ;;  %3320 = vmatprep.subr.mxu0 %v4078_v33  ;;  %v4139_v31 = vld [vmem:[#allocation5 + $0x1108] sm:$0xff]  ;;  %v4140_v33 = vld [vmem:[#allocation5 + $0x1100] sm:$0xff] }
 0x6ba   : > { %3176 = vmatpush2.msra.mxu1 %v4079_v35  ;;  %3321 = vmatpush1.msra.mxu0 %v4080_v37 }
 0x6bb   : > { %3177 = vmatprep.subr.mxu1 %v4081_v38  ;;  %3322 = vmatprep.subr.mxu0 %v4082_v39 }
 0x6bc   : > { %3178 = vmatpush2.msra.mxu1 %v4083_v30  ;;  %3323 = vmatpush2.msra.mxu0 %v4084_v0 }
 0x6bd   : > { %3179 = vmatprep.subr.mxu1 %v4085_v40  ;;  %3324 = vmatprep.subr.mxu0 %v4086_v41 }
 0x6be   : > { %3180 = vmatpush2.msra.mxu1 %v4087_v42  ;;  %3325 = vmatpush2.msra.mxu0 %v4088_v44 }
 0x6bf   : > { %3181 = vmatprep.subr.mxu1 %v4089_v46  ;;  %3326 = vmatprep.subr.mxu0 %v4090_v47 }
 0x6c0   : > { %3182 = vmatpush2.msra.mxu1 %v4091_v48  ;;  %3327 = vmatpush2.msra.mxu0 %v4092_v49 }
 0x6c1   : > { %3183 = vmatprep.subr.mxu1 %v4093_v50  ;;  %3328 = vmatprep.subr.mxu0 %v4094_v51 }
 0x6c2   : > { %3184 = vmatpush2.msra.mxu1 %v4095_v52  ;;  %3329 = vmatpush2.msra.mxu0 %v4096_v53  ;;  %v3367_v52 = vpop.permute.xlu0 %3366 }
 0x6c3   : > { %3185 = vmatprep.subr.mxu1 %v4097_v54  ;;  %3330 = vmatprep.subr.mxu0 %v4098_v55 }
 0x6c4   : > { %3186 = vmatpush2.msra.mxu1 %v4099_v56  ;;  %3331 = vmatpush2.msra.mxu0 %v4100_v58 }
 0x6c5   : > { %3187 = vmatprep.subr.mxu1 %v4101_v2  ;;  %3332 = vmatprep.subr.mxu0 %v4102_v59 }
 0x6c6   : > { %3188 = vmatpush2.msra.mxu1 %v4103_v36  ;;  %3333 = vmatpush2.msra.mxu0 %v4104_v60 }
 0x6c7   : > { %3189 = vmatprep.subr.mxu1 %v4105_v61  ;;  %3334 = vmatprep.subr.mxu0 %v4106_v62 }
 0x6c8   : > { %3190 = vmatpush2.msra.mxu1 %v4107_v63  ;;  %3335 = vmatpush2.msra.mxu0 %v4108_v3 }
 0x6c9   : > { %3191 = vmatprep.subr.mxu1 %v4109_v5  ;;  %3336 = vmatprep.subr.mxu0 %v4110_v6 }
 0x6ca   : > { %3192 = vmatpush2.msra.mxu1 %v4111_v8  ;;  %3337 = vmatpush2.msra.mxu0 %v4112_v43 }
 0x6cb   : > { %3193 = vmatprep.subr.mxu1 %v4113_v34  ;;  %3338 = vmatprep.subr.mxu0 %v4114_v45 }
 0x6cc   : > { %3194 = vmatpush2.msra.mxu1 %v4115_v9  ;;  %3339 = vmatpush2.msra.mxu0 %v4116_v10 }
 0x6cd   : > { %3195 = vmatprep.subr.mxu1 %v4117_v11  ;;  %3340 = vmatprep.subr.mxu0 %v4118_v12 }
 0x6ce   : > { %3196 = vmatpush2.msra.mxu1 %v4119_v13  ;;  %3341 = vmatpush2.msra.mxu0 %v4120_v14 }
 0x6cf   : > { %3197 = vmatprep.subr.mxu1 %v4121_v15  ;;  %3342 = vmatprep.subr.mxu0 %v4122_v16 }
 0x6d0   : > { %3198 = vmatpush2.msra.mxu1 %v4123_v17  ;;  %3343 = vmatpush2.msra.mxu0 %v4124_v18 }
 0x6d1   : > { %3199 = vmatprep.subr.mxu1 %v4125_v19  ;;  %3344 = vmatprep.subr.mxu0 %v4126_v20 }
 0x6d2   : > { %3200 = vmatpush2.msra.mxu1 %v4127_v57  ;;  %3345 = vmatpush2.msra.mxu0 %v4128_v21 }
 0x6d3   : > { %3201 = vmatprep.subr.mxu1 %v4129_v22  ;;  %3346 = vmatprep.subr.mxu0 %v4130_v23 }
 0x6d4   : > { %3202 = vmatpush2.msra.mxu1 %v4131_v24  ;;  %3347 = vmatpush2.msra.mxu0 %v4132_v25 }
 0x6d5   : > { %3203 = vmatprep.subr.mxu1 %v4133_v27  ;;  %3348 = vmatprep.subr.mxu0 %v4134_v1 }
 0x6d6   : > { %3204 = vmatpush2.msra.mxu1 %v4135_v4  ;;  %3349 = vmatpush2.msra.mxu0 %v4136_v7 }
 0x6d7   : > { %3350 = vmatprep.subr.mxu0 %v4137_v28 }
 0x6d8   : > { %3351 = vmatpush2.msra.mxu0 %v4138_v29 }
 0x6d9   : > { %3352 = vmatprep.subr.mxu0 %v4139_v31 }
 0x6da   : > { %3353 = vmatpush2.msra.mxu0 %v4140_v33 }
 0x752   : > { %v2909_v35 = vpop.f32.mrf.mxu1 }
 0x753   : > { %v2914_v37 = vadd.f32 %v2909_v35, %v4622_v32 }
 0x754   : > { %v2911_v38 = vpop.f32.mrf.mxu1 }
 0x755   : > { %v2915_v39 = vadd.f32 %v2911_v38, %v4624_v26 }
 0x756   : > { %v3136_v30 = vpop.f32.mrf.mxu1 }
 0x757   : > { %v3058_v0 = vpop.f32.mrf.mxu0 }
 0x758   : > { %v3063_v40 = vadd.f32 %v3058_v0, %v2914_v37  ;;  %v3138_v41 = vpop.f32.mrf.mxu1 }
 0x759   : > { %v3060_v42 = vpop.f32.mrf.mxu0  ;;  %3205 = vmatprep.mubr.f32.mxu1 %v3138_v41 }
 0x75a   : > { %v3064_v44 = vadd.f32 %v3060_v42, %v2915_v39  ;;  %3206 = vmatmul.mubr.f32.vlgmr.msra.gmra.mxu1 %v3136_v30 }
 0x75b   : > { %v3285_v46 = vpop.f32.mrf.mxu0 }
 0x75d   : > { %v3287_v47 = vpop.f32.mrf.mxu0 }
 0x75e   : > { %3354 = vmatprep.mubr.f32.mxu0 %v3287_v47 }
 0x75f   : > { %3355 = vmatmul.mubr.f32.vlgmr.msra.gmra.mxu0 %v3285_v46 }
 0x81a   : > { %v3207_v48 = vpop.f32.mrf.mxu1 }
 0x81b   : > { %v3212_v32 = vadd.f32 %v3207_v48, %v3063_v40 }
 0x81c   : > { %v3209_v49 = vpop.f32.mrf.mxu1 }
 0x81d   : > { %v3213_v51 = vadd.f32 %v3209_v49, %v3064_v44 }
 0x81f   : > { %v3356_v50 = vpop.f32.mrf.mxu0 }
 0x820   : > { %v3361_v26 = vadd.f32 %v3356_v50, %v3212_v32 }
 0x821   : > { %v3358_v53 = vpop.f32.mrf.mxu0 }
 0x822   : > { %v3369_v54 = vadd.f32 %v3367_v52, %v3361_v26  ;;  %v3362_v55 = vadd.f32 %v3358_v53, %v3213_v51 }
 0x824   : > { %v3373_v56 = vmul.f32 0.01, %v3369_v54  ;;  %v3370_v58 = vadd.f32 %v3367_v52, %v3362_v55  ;;  %vm3371_vm6 = vcmp.gt.f32.partialorder %v3369_v54, 0.0 }
 0x826   : > { %vm3372_vm7 = vcmp.gt.f32.partialorder %v3370_v58, 0.0  ;;  %v3374_v2 = vmul.f32 0.01, %v3370_v58  ;;  %v3375_v59 = vsel %vm3371_vm6, %v3369_v54, %v3373_v56 }
 0x828   : > { %v3376_v36 = vsel %vm3372_vm7, %v3370_v58, %v3374_v2 }
 0x829   : > { %v3379_v60 = vcombine.low %v3375_v59, %v3376_v36 }
 0x82b   : > { %3381 = vst [vmem:[%s282_s5] sm:$0xff] %v3379_v60 }
 0x82c   : > { %4208 = shalt.err (!%p4205_p0)
}
 0x82d   : > { %s4209_s30 = scalar_lea.hbm %s3395_s10, 128  ;;  %s4213_s8 = scalar_lea.hbm %s4685_s6, 256 }
 0x82e   : > { %p4210_p5 = scmp.ne.s32.totalorder %s3395_s10, %s4209_s30  ;;  %p4214_p1 = scmp.lt.s32.totalorder %s3395_s10, %s4685_s6 }
 0x82f   : > { %p4215_p4 = scmp.lt.s32.totalorder %s4213_s8, %s4209_s30 }
 0x830   : > { %p4211_p9 = pnand %p4210_p5, %p4703_p3 }
 0x831   : > { %p4216_p6 = por %p4215_p4, %p4214_p1 }
 0x832   : > { %p4212_p12 = pneg %p4211_p9 }
 0x834   : > { %p4217_p8 = pnand %p4216_p6, %p4212_p12 }
 0x836   : > { %4220 = shalt.err (!%p4217_p8)
}
 0x837   : > { %3571 = dma.vmem_to_hbm [thread:$0]  (%p4703_p3), %s3398_s27, 128, %s3395_s10, %s3383_s11  }
 0x838 PF: > { %s3409_s16 = sand.u32 1, %s4251_s21   ;;  %p4704_p11 = scmp.ne.s32.totalorder %s4692_s28, 0 }
 0x839   : > { %p4705_p7 = scmp.ge.s32.totalorder %s4263_s24, 2  ;;  %s3410_s5 = scalar_lea.sflag [#allocation4], %s3409_s16 }
 0x83b   : > { %p3582_p10 = pnand %p4705_p7, %p4704_p11 }
 0x83d   : > { %p3583_p2 = pneg %p3582_p10 }
 0x83f   : > { %4246 = dma.done.wait (%p3583_p2), %s3410_s5, 128  }
 0x840   : > { %4248 = vsyncadd (%p3583_p2), %s3410_s5, 4294967168  ;;  %p20_p13 = scmp.ge.s32.totalorder %s4361_s9, 4   ;;  %s4706_s21 = smov %s4255_s22 }
 0x841   : > { %s4707_s22 = smov %s4259_s23  ;;  %s4708_s23 = smov %s4378_s17 }
 0x842   : > { %s4709_s24 = smov %s4361_s9  ;;  %22 = sbr.rel (!%p20_p13) target bundleno = 8 (0x8), region = 116 }
 0x847   :  { %3415 = vsyncpa [#allocation3], 1 }
 0x848   :  { %3417 = vsyncpa [#allocation3 + $0x1], 1 }
 0x849   :  { %3418 = vsyncpa [#allocation6], 1 }
 0x84a   :  { %3419 = vsyncpa [#allocation4], 1 }
 0x84b   :  { %3421 = vsyncpa [#allocation4 + $0x1], 1 }

</bundles_post_ra>
